<compile_context>
chip_gen: v6e
topology: v6e:2x2x1
jax: 0.10.0
libtpu: 0.0.40
codegen_flags: <defaults>
</compile_context>

<pallas_src>
import functools

import jax
import jax.numpy as jnp
import numpy as np
from jax.experimental import pallas as pl
from jax.experimental.pallas import tpu as pltpu


def _gatv2_block(x_src, mask_bias, const, *, negative_slope, apply_elu, matmul_dtype):
    """One head-fused GATv2Conv applied to in-kernel values.

    x_src:     [N_src, D_in]
    mask_bias: [N_dst, N_src, HF]  additive edge mask (0 on edges, -1e30 elsewhere)
    const:     [D_in + pad8(HF) + 1, 2*HF] packed per-layer constants:
                 rows [0, D_in)                 : packed projection weight [w_src | w_dst]
                 rows [D_in, D_in+HF), cols[:HF]: block-diagonal column-replicated attn
                 row  D_in + pad8(HF), cols[:HF]: bias
    returns    [N_dst, HF]
    """
    N_dst, N_src, HF = mask_bias.shape
    attn_rows = ((HF + 7) // 8) * 8              # attn section padded to 8-row boundary
    D_in = const.shape[0] - attn_rows - 1

    w_packed = const[:D_in, :]                               # [D_in, 2*HF]
    attn_mat = const[D_in:D_in + HF, :HF]                    # [HF, HF]
    bias = const[D_in + attn_rows:D_in + attn_rows + 1, :HF]  # [1, HF]

    # Single head-fused projection matmul; fs/fd are static lane slices of one result.
    proj = jnp.dot(x_src.astype(matmul_dtype), w_packed.astype(matmul_dtype),
                   preferred_element_type=jnp.float32)       # [N_src, 2*HF]
    fs = proj[:, :HF]                                        # [N_src, HF]
    # DGL block convention: dst nodes are the leading rows of the src nodes.
    fd = proj[:N_dst, HF:]                                   # [N_dst, HF]

    # GATv2 logits: e[h,i,j] = sum_f attn[h,f] * leaky_relu(fs[j,hF+f] + fd[i,hF+f]).
    s = fd[:, None, :] + fs[None, :, :]                      # [N_dst, N_src, HF]
    lr = jnp.where(s > 0, s, jnp.float32(negative_slope) * s)
    # The (N_dst, N_src) -> (N_dst*N_src) collapse only merges dims at/above the sublane
    # axis with N_src % 8 == 0, so it is a free view (no relayout), and the contraction
    # stays one lane-dense 2-D MXU matmul with the per-head logit replicated on that
    # head's F lanes.
    lr_flat = lr.reshape(N_dst * N_src, HF)
    e_flat = jnp.dot(lr_flat.astype(matmul_dtype), attn_mat.astype(matmul_dtype),
                     preferred_element_type=jnp.float32)
    # Additive pre-baked edge mask: masked logits underflow to exactly 0 in exp below.
    e = e_flat.reshape(N_dst, N_src, HF) + mask_bias          # [N_dst, N_src, HF]

    # Masked edge softmax over incoming edges (allow_zero_in_degree=True: all-masked
    # rows give zero attention -> output = bias).
    m = jnp.max(e, axis=1, keepdims=True)                     # [N_dst, 1, HF]
    m_safe = jnp.where(m > jnp.float32(-1e29), m, jnp.float32(0.0))
    p = jnp.exp(e - m_safe)                                   # masked entries -> 0.0
    denom = jnp.maximum(jnp.sum(p, axis=1, keepdims=True), jnp.float32(1e-30))
    r = pl.reciprocal(denom, approx=True)
    r = r * (jnp.float32(2.0) - denom * r)                    # one Newton step
    a = p * r                                                 # [N_dst, N_src, HF]

    # Aggregation: attention for head h is replicated on its F lanes, so the per-head
    # weighted sum is an elementwise multiply + source-axis reduction (fine at toy size;
    # at scale this moves to per-head MXU matmuls — see header).
    rst = jnp.sum(a * fs[None, :, :], axis=1) + bias          # [N_dst, HF]
    if apply_elu:
        rst = jnp.where(rst > 0, rst,
                        jnp.exp(jnp.minimum(rst, jnp.float32(0.0))) - jnp.float32(1.0))
    return rst


def _fused_gat_kernel(*refs, apply_elu_flags, negative_slope, matmul_dtype):
    # refs = (x, [mask_bias, const] * n_layers, out)
    out_ref = refs[-1]
    x = refs[0][...]
    idx = 1
    for apply_elu in apply_elu_flags:                     # static Python unroll
        mask_ref, const_ref = refs[idx:idx + 2]
        idx += 2
        x = _gatv2_block(x, mask_ref[...], const_ref[...],
                         negative_slope=negative_slope, apply_elu=apply_elu,
                         matmul_dtype=matmul_dtype)
    out_ref[...] = x


def _build_attn_matrix(attn):
    """attn [H, F] -> block-diagonal, column-replicated [H*F, H*F]:
       A[h*F+f', h*F+f] = attn[h, f']."""
    H, F = attn.shape
    head_mask = jnp.kron(jnp.eye(H, dtype=jnp.float32),
                         jnp.ones((F, F), jnp.float32))   # 1 where same head
    return attn.astype(jnp.float32).reshape(H * F, 1) * head_mask


def gat_mini_dgl_forward(params, adjs, x, *, negative_slope=0.2,
                         matmul_dtype=jnp.float32):
    """Full GAT_MINI_DGL forward as a single fused pallas_call.

    params: list of dicts with 'w_src'/'w_dst' [H, D_in, F] and 'attn'/'bias' [H, F].
    adjs:   list of dense block adjacencies [N_dst_l, N_src_l]; dst nodes of each DGL
            block are the leading N_dst rows of its src nodes.
    x:      [N_src_0, input_dim] source-node features of the outermost block.
    matmul_dtype: jnp.bfloat16 recommended on v6e/v7x at scale (f32 here for accuracy).
    """
    n_layers = len(params)
    assert len(adjs) == n_layers
    n_src = x.shape[0]
    flat_inputs = [x.astype(jnp.float32)]
    apply_elu_flags = []
    out_dim = None
    for l, (p, adj) in enumerate(zip(params, adjs)):
        H, D_in, F = p["w_src"].shape
        HF = H * F
        N_dst, N_src = adj.shape
        # DGL block convention: dst nodes are the leading rows of the src nodes.
        assert N_src == n_src and N_dst <= N_src
        # Keeps the in-kernel flat <-> 3D reshapes sublane-aligned (free views).
        assert N_src % 8 == 0

        # Head-fused, src/dst-fused projection weight: [D_in, 2*HF].
        w_src = jnp.transpose(p["w_src"], (1, 0, 2)).reshape(D_in, HF)
        w_dst = jnp.transpose(p["w_dst"], (1, 0, 2)).reshape(D_in, HF)
        w_packed = jnp.concatenate([w_src, w_dst], axis=1).astype(jnp.float32)

        # Pack weight + attention matrix + bias into one per-layer constant buffer,
        # with each section starting on an 8-row (sublane-tile) boundary.
        attn_mat = _build_attn_matrix(p["attn"])                     # [HF, HF]
        bias = p["bias"].astype(jnp.float32).reshape(1, HF)
        attn_rows = ((HF + 7) // 8) * 8
        attn_pad = jnp.pad(attn_mat, ((0, attn_rows - HF), (0, HF)))  # [attn_rows, 2HF]
        bias_pad = jnp.pad(bias, ((0, 0), (0, HF)))                   # [1, 2HF]
        const = jnp.concatenate([w_packed, attn_pad, bias_pad], axis=0)

        # Pre-baked additive edge mask, already broadcast to the softmax layout
        # (dense DMA, no lane-padded [.,.,1] tensor, no in-kernel selects).
        mask_bias = jnp.where(adj > 0, jnp.float32(0.0), jnp.float32(-1e30))
        mask_bias3 = jnp.broadcast_to(mask_bias[:, :, None], (N_dst, N_src, HF))

        flat_inputs += [mask_bias3, const]
        apply_elu_flags.append(l < n_layers - 1)
        n_src = N_dst
        out_dim = HF

    kernel = functools.partial(_fused_gat_kernel,
                               apply_elu_flags=tuple(apply_elu_flags),
                               negative_slope=negative_slope,
                               matmul_dtype=matmul_dtype)
    vmem = pl.BlockSpec(memory_space=pltpu.MemorySpace.VMEM)
    return pl.pallas_call(
        kernel,
        out_shape=jax.ShapeDtypeStruct((n_src, out_dim), jnp.float32),
        in_specs=[vmem] * len(flat_inputs),
        out_specs=vmem,
    )(*flat_inputs)


# ----------------------- pure-JAX reference (for verification) -----------------------
def _ref_layer(x_src, adj, w_src, w_dst, attn, bias, apply_elu, negative_slope=0.2):
    N_dst = adj.shape[0]
    H, D_in, F = w_src.shape
    x_dst = x_src[:N_dst]
    fs = jnp.einsum("nd,hdf->hnf", x_src, w_src)          # [H, N_src, F]
    fd = jnp.einsum("nd,hdf->hnf", x_dst, w_dst)          # [H, N_dst, F]
    s = fd[:, :, None, :] + fs[:, None, :, :]             # [H, N_dst, N_src, F]
    lr = jnp.where(s > 0, s, negative_slope * s)
    e = jnp.sum(lr * attn[:, None, None, :], axis=-1)     # [H, N_dst, N_src]
    mask = (adj > 0)[None]
    e_m = jnp.where(mask, e, -1e30)
    m = jnp.max(e_m, axis=-1, keepdims=True)
    m_safe = jnp.where(m > -1e29, m, 0.0)
    p = jnp.where(mask, jnp.exp(e_m - m_safe), 0.0)
    a = p / jnp.maximum(jnp.sum(p, axis=-1, keepdims=True), 1e-30)
    rst = jnp.einsum("hij,hjf->hif", a, fs) + bias[:, None, :]
    if apply_elu:
        rst = jnp.where(rst > 0, rst, jnp.exp(rst) - 1.0)
    return jnp.transpose(rst, (1, 0, 2)).reshape(N_dst, H * F)


def _ref_forward(params, adjs, x):
    n_layers = len(params)
    for l, (p, adj) in enumerate(zip(params, adjs)):
        x = _ref_layer(x, adj, p["w_src"], p["w_dst"], p["attn"], p["bias"],
                       apply_elu=(l < n_layers - 1))
    return x


# --------------------------------------- main ---------------------------------------
if __name__ == "__main__":
    # Model config (small): input_dim=16, n_classes=4, n_layers=2, num_hidden=64, heads=8
    input_dim, n_classes, num_hidden, num_heads = 16, 4, 64, 8
    F_hidden = num_hidden // num_heads  # 8

    # Mini-batch block sizes (DGL blocks): 32 src -> 16 -> 8 final dst nodes
    N0, N1, N2 = 32, 16, 8

    key = jax.random.PRNGKey(0)
    keys = jax.random.split(key, 12)

    def init_layer(k, d_in, n_heads, f_out):
        k1, k2, k3, k4 = jax.random.split(k, 4)
        return {
            "w_src": 0.1 * jax.random.normal(k1, (n_heads, d_in, f_out), jnp.float32),
            "w_dst": 0.1 * jax.random.normal(k2, (n_heads, d_in, f_out), jnp.float32),
            "attn":  0.1 * jax.random.normal(k3, (n_heads, f_out), jnp.float32),
            "bias":  0.1 * jax.random.normal(k4, (n_heads, f_out), jnp.float32),
        }

    params = [
        init_layer(keys[0], input_dim, num_heads, F_hidden),   # GATv2Conv(16, 8, 8, act=elu)
        init_layer(keys[1], num_hidden, 1, n_classes),         # GATv2Conv(64, 4, 1)
    ]

    # Dense adjacency representation of the two DGL blocks
    adj0 = jax.random.bernoulli(keys[2], 0.3, (N1, N0)).astype(jnp.float32)
    adj1 = jax.random.bernoulli(keys[3], 0.3, (N2, N1)).astype(jnp.float32)
    adjs = [adj0, adj1]

    # Input node features for the outermost block's source nodes
    x = jax.random.normal(keys[4], (N0, input_dim), jnp.float32)

    out = gat_mini_dgl_forward(params, adjs, x)
    out = jax.block_until_ready(out)

    ref = _ref_forward(params, adjs, x)
    # Tolerance allows for MXU pass-precision differences vs. the f32 VPU reference path.
    np.testing.assert_allclose(np.asarray(out), np.asarray(ref), rtol=1e-3, atol=1e-3)
    assert out.shape == (N2, n_classes)

    print("KERNEL_OK")
</pallas_src>

<mosaic_0001>
module attributes {stable_mosaic.version = 11 : i64} {
  func.func @_fused_gat_kernel(%arg0: memref<32x16xf32, #tpu.memory_space<vmem>>, %arg1: memref<16x32x64xf32, #tpu.memory_space<vmem>>, %arg2: memref<81x128xf32, #tpu.memory_space<vmem>>, %arg3: memref<8x16x4xf32, #tpu.memory_space<vmem>>, %arg4: memref<73x8xf32, #tpu.memory_space<vmem>>, %arg5: memref<8x4xf32, #tpu.memory_space<vmem>>) attributes {dimension_semantics = [], scalar_prefetch = 0 : i64, scratch_operands = 0 : i64, tpu.core_type = #tpu.core_type<tc>} {
    %c0 = arith.constant 0 : index
    %c0_0 = arith.constant 0 : index
    %0 = vector.load %arg0[%c0, %c0_0] : memref<32x16xf32, #tpu.memory_space<vmem>>, vector<32x16xf32>
    %c0_1 = arith.constant 0 : index
    %c0_2 = arith.constant 0 : index
    %c0_3 = arith.constant 0 : index
    %1 = vector.load %arg1[%c0_1, %c0_2, %c0_3] : memref<16x32x64xf32, #tpu.memory_space<vmem>>, vector<16x32x64xf32>
    %c0_4 = arith.constant 0 : index
    %c0_5 = arith.constant 0 : index
    %2 = vector.load %arg2[%c0_4, %c0_5] : memref<81x128xf32, #tpu.memory_space<vmem>>, vector<81x128xf32>
    %3 = vector.extract_strided_slice %2 {offsets = [0, 0], sizes = [16, 128], strides = [1, 1]} : vector<81x128xf32> to vector<16x128xf32>
    %4 = vector.extract_strided_slice %2 {offsets = [16, 0], sizes = [64, 64], strides = [1, 1]} : vector<81x128xf32> to vector<64x64xf32>
    %5 = vector.extract_strided_slice %2 {offsets = [80, 0], sizes = [1, 64], strides = [1, 1]} : vector<81x128xf32> to vector<1x64xf32>
    %cst = arith.constant dense<0.000000e+00> : vector<32x128xf32>
    %6 = tpu.matmul %0, %3, %cst {dimension_numbers = #tpu.dot_dimension_numbers<[1], [0], [0], [1], [0, 0, 1, 1], [], []>} : vector<32x16xf32>, vector<16x128xf32>, vector<32x128xf32> -> vector<32x128xf32>
    %7 = vector.extract_strided_slice %6 {offsets = [0, 0], sizes = [32, 64], strides = [1, 1]} : vector<32x128xf32> to vector<32x64xf32>
    %8 = vector.extract_strided_slice %6 {offsets = [0, 64], sizes = [16, 64], strides = [1, 1]} : vector<32x128xf32> to vector<16x64xf32>
    %9 = vector.shape_cast %8 : vector<16x64xf32> to vector<16x1x64xf32>
    %10 = vector.shape_cast %7 : vector<32x64xf32> to vector<1x32x64xf32>
    %11 = vector.broadcast %9 : vector<16x1x64xf32> to vector<16x32x64xf32>
    %12 = vector.broadcast %10 : vector<1x32x64xf32> to vector<16x32x64xf32>
    %13 = arith.addf %11, %12 : vector<16x32x64xf32>
    %cst_6 = arith.constant 0.000000e+00 : f32
    %14 = vector.broadcast %cst_6 : f32 to vector<16x32x64xf32>
    %15 = arith.cmpf ogt, %13, %14 : vector<16x32x64xf32>
    %cst_7 = arith.constant 2.000000e-01 : f32
    %16 = vector.broadcast %cst_7 : f32 to vector<16x32x64xf32>
    %17 = arith.mulf %16, %13 : vector<16x32x64xf32>
    %18 = arith.select %15, %13, %17 : vector<16x32x64xi1>, vector<16x32x64xf32>
    %19 = vector.shape_cast %18 : vector<16x32x64xf32> to vector<512x64xf32>
    %cst_8 = arith.constant dense<0.000000e+00> : vector<512x64xf32>
    %20 = tpu.matmul %19, %4, %cst_8 {dimension_numbers = #tpu.dot_dimension_numbers<[1], [0], [0], [1], [0, 0, 1, 1], [], []>} : vector<512x64xf32>, vector<64x64xf32>, vector<512x64xf32> -> vector<512x64xf32>
    %21 = vector.shape_cast %20 : vector<512x64xf32> to vector<16x32x64xf32>
    %22 = arith.addf %21, %1 : vector<16x32x64xf32>
    %cst_9 = arith.constant dense<0xFF800000> : vector<16x64xf32>
    %23 = vector.multi_reduction <maximumf>, %22, %cst_9 [1] : vector<16x32x64xf32> to vector<16x64xf32>
    %24 = vector.shape_cast %23 : vector<16x64xf32> to vector<16x1x64xf32>
    %cst_10 = arith.constant -1.000000e+29 : f32
    %25 = vector.broadcast %cst_10 : f32 to vector<16x1x64xf32>
    %26 = arith.cmpf ogt, %24, %25 : vector<16x1x64xf32>
    %cst_11 = arith.constant 0.000000e+00 : f32
    %27 = vector.broadcast %cst_11 : f32 to vector<16x1x64xf32>
    %28 = arith.select %26, %24, %27 : vector<16x1x64xi1>, vector<16x1x64xf32>
    %29 = vector.broadcast %28 : vector<16x1x64xf32> to vector<16x32x64xf32>
    %30 = arith.subf %22, %29 : vector<16x32x64xf32>
    %31 = math.exp %30 : vector<16x32x64xf32>
    %cst_12 = arith.constant dense<0.000000e+00> : vector<16x64xf32>
    %32 = vector.multi_reduction <add>, %31, %cst_12 [1] : vector<16x32x64xf32> to vector<16x64xf32>
    %33 = vector.shape_cast %32 : vector<16x64xf32> to vector<16x1x64xf32>
    %cst_13 = arith.constant 1.000000e-30 : f32
    %34 = vector.broadcast %cst_13 : f32 to vector<16x1x64xf32>
    %35 = arith.maximumf %33, %34 : vector<16x1x64xf32>
    %36 = tpu.reciprocal %35 {approx = true} : vector<16x1x64xf32> -> vector<16x1x64xf32>
    %37 = arith.mulf %35, %36 : vector<16x1x64xf32>
    %cst_14 = arith.constant 2.000000e+00 : f32
    %38 = vector.broadcast %cst_14 : f32 to vector<16x1x64xf32>
    %39 = arith.subf %38, %37 : vector<16x1x64xf32>
    %40 = arith.mulf %36, %39 : vector<16x1x64xf32>
    %41 = vector.broadcast %40 : vector<16x1x64xf32> to vector<16x32x64xf32>
    %42 = arith.mulf %31, %41 : vector<16x32x64xf32>
    %43 = vector.shape_cast %7 : vector<32x64xf32> to vector<1x32x64xf32>
    %44 = vector.broadcast %43 : vector<1x32x64xf32> to vector<16x32x64xf32>
    %45 = arith.mulf %42, %44 : vector<16x32x64xf32>
    %cst_15 = arith.constant dense<0.000000e+00> : vector<16x64xf32>
    %46 = vector.multi_reduction <add>, %45, %cst_15 [1] : vector<16x32x64xf32> to vector<16x64xf32>
    %47 = vector.broadcast %5 : vector<1x64xf32> to vector<16x64xf32>
    %48 = arith.addf %46, %47 : vector<16x64xf32>
    %cst_16 = arith.constant 0.000000e+00 : f32
    %49 = vector.broadcast %cst_16 : f32 to vector<16x64xf32>
    %50 = arith.cmpf ogt, %48, %49 : vector<16x64xf32>
    %cst_17 = arith.constant 0.000000e+00 : f32
    %51 = vector.broadcast %cst_17 : f32 to vector<16x64xf32>
    %52 = arith.minimumf %48, %51 : vector<16x64xf32>
    %53 = math.exp %52 : vector<16x64xf32>
    %cst_18 = arith.constant 1.000000e+00 : f32
    %54 = vector.broadcast %cst_18 : f32 to vector<16x64xf32>
    %55 = arith.subf %53, %54 : vector<16x64xf32>
    %56 = arith.select %50, %48, %55 : vector<16x64xi1>, vector<16x64xf32>
    %c0_19 = arith.constant 0 : index
    %c0_20 = arith.constant 0 : index
    %c0_21 = arith.constant 0 : index
    %57 = vector.load %arg3[%c0_19, %c0_20, %c0_21] : memref<8x16x4xf32, #tpu.memory_space<vmem>>, vector<8x16x4xf32>
    %c0_22 = arith.constant 0 : index
    %c0_23 = arith.constant 0 : index
    %58 = vector.load %arg4[%c0_22, %c0_23] : memref<73x8xf32, #tpu.memory_space<vmem>>, vector<73x8xf32>
    %59 = vector.extract_strided_slice %58 {offsets = [0, 0], sizes = [64, 8], strides = [1, 1]} : vector<73x8xf32> to vector<64x8xf32>
    %60 = vector.extract_strided_slice %58 {offsets = [64, 0], sizes = [4, 4], strides = [1, 1]} : vector<73x8xf32> to vector<4x4xf32>
    %61 = vector.extract_strided_slice %58 {offsets = [72, 0], sizes = [1, 4], strides = [1, 1]} : vector<73x8xf32> to vector<1x4xf32>
    %cst_24 = arith.constant dense<0.000000e+00> : vector<16x8xf32>
    %62 = tpu.matmul %56, %59, %cst_24 {dimension_numbers = #tpu.dot_dimension_numbers<[1], [0], [0], [1], [0, 0, 1, 1], [], []>} : vector<16x64xf32>, vector<64x8xf32>, vector<16x8xf32> -> vector<16x8xf32>
    %63 = vector.extract_strided_slice %62 {offsets = [0, 0], sizes = [16, 4], strides = [1, 1]} : vector<16x8xf32> to vector<16x4xf32>
    %64 = vector.extract_strided_slice %62 {offsets = [0, 4], sizes = [8, 4], strides = [1, 1]} : vector<16x8xf32> to vector<8x4xf32>
    %65 = vector.shape_cast %64 : vector<8x4xf32> to vector<8x1x4xf32>
    %66 = vector.shape_cast %63 : vector<16x4xf32> to vector<1x16x4xf32>
    %67 = vector.broadcast %65 : vector<8x1x4xf32> to vector<8x16x4xf32>
    %68 = vector.broadcast %66 : vector<1x16x4xf32> to vector<8x16x4xf32>
    %69 = arith.addf %67, %68 : vector<8x16x4xf32>
    %cst_25 = arith.constant 0.000000e+00 : f32
    %70 = vector.broadcast %cst_25 : f32 to vector<8x16x4xf32>
    %71 = arith.cmpf ogt, %69, %70 : vector<8x16x4xf32>
    %cst_26 = arith.constant 2.000000e-01 : f32
    %72 = vector.broadcast %cst_26 : f32 to vector<8x16x4xf32>
    %73 = arith.mulf %72, %69 : vector<8x16x4xf32>
    %74 = arith.select %71, %69, %73 : vector<8x16x4xi1>, vector<8x16x4xf32>
    %75 = vector.shape_cast %74 : vector<8x16x4xf32> to vector<128x4xf32>
    %cst_27 = arith.constant dense<0.000000e+00> : vector<128x4xf32>
    %76 = tpu.matmul %75, %60, %cst_27 {dimension_numbers = #tpu.dot_dimension_numbers<[1], [0], [0], [1], [0, 0, 1, 1], [], []>} : vector<128x4xf32>, vector<4x4xf32>, vector<128x4xf32> -> vector<128x4xf32>
    %77 = vector.shape_cast %76 : vector<128x4xf32> to vector<8x16x4xf32>
    %78 = arith.addf %77, %57 : vector<8x16x4xf32>
    %cst_28 = arith.constant dense<0xFF800000> : vector<8x4xf32>
    %79 = vector.multi_reduction <maximumf>, %78, %cst_28 [1] : vector<8x16x4xf32> to vector<8x4xf32>
    %80 = vector.shape_cast %79 : vector<8x4xf32> to vector<8x1x4xf32>
    %cst_29 = arith.constant -1.000000e+29 : f32
    %81 = vector.broadcast %cst_29 : f32 to vector<8x1x4xf32>
    %82 = arith.cmpf ogt, %80, %81 : vector<8x1x4xf32>
    %cst_30 = arith.constant 0.000000e+00 : f32
    %83 = vector.broadcast %cst_30 : f32 to vector<8x1x4xf32>
    %84 = arith.select %82, %80, %83 : vector<8x1x4xi1>, vector<8x1x4xf32>
    %85 = vector.broadcast %84 : vector<8x1x4xf32> to vector<8x16x4xf32>
    %86 = arith.subf %78, %85 : vector<8x16x4xf32>
    %87 = math.exp %86 : vector<8x16x4xf32>
    %cst_31 = arith.constant dense<0.000000e+00> : vector<8x4xf32>
    %88 = vector.multi_reduction <add>, %87, %cst_31 [1] : vector<8x16x4xf32> to vector<8x4xf32>
    %89 = vector.shape_cast %88 : vector<8x4xf32> to vector<8x1x4xf32>
    %cst_32 = arith.constant 1.000000e-30 : f32
    %90 = vector.broadcast %cst_32 : f32 to vector<8x1x4xf32>
    %91 = arith.maximumf %89, %90 : vector<8x1x4xf32>
    %92 = tpu.reciprocal %91 {approx = true} : vector<8x1x4xf32> -> vector<8x1x4xf32>
    %93 = arith.mulf %91, %92 : vector<8x1x4xf32>
    %cst_33 = arith.constant 2.000000e+00 : f32
    %94 = vector.broadcast %cst_33 : f32 to vector<8x1x4xf32>
    %95 = arith.subf %94, %93 : vector<8x1x4xf32>
    %96 = arith.mulf %92, %95 : vector<8x1x4xf32>
    %97 = vector.broadcast %96 : vector<8x1x4xf32> to vector<8x16x4xf32>
    %98 = arith.mulf %87, %97 : vector<8x16x4xf32>
    %99 = vector.shape_cast %63 : vector<16x4xf32> to vector<1x16x4xf32>
    %100 = vector.broadcast %99 : vector<1x16x4xf32> to vector<8x16x4xf32>
    %101 = arith.mulf %98, %100 : vector<8x16x4xf32>
    %cst_34 = arith.constant dense<0.000000e+00> : vector<8x4xf32>
    %102 = vector.multi_reduction <add>, %101, %cst_34 [1] : vector<8x16x4xf32> to vector<8x4xf32>
    %103 = vector.broadcast %61 : vector<1x4xf32> to vector<8x4xf32>
    %104 = arith.addf %102, %103 : vector<8x4xf32>
    %c0_35 = arith.constant 0 : index
    %c0_36 = arith.constant 0 : index
    %105 = vector.load %arg5[%c0_35, %c0_36] : memref<8x4xf32, #tpu.memory_space<vmem>>, vector<8x4xf32>
    tpu.vector_store %arg5[%c0_35, %c0_36], %104 {strides = array<i32>} : memref<8x4xf32, #tpu.memory_space<vmem>>, vector<8x4xf32>,
    return
  }
}

</mosaic_0001>

<bundles_post_ra>
// kernel: tpu_custom_call.1
= control target key start
LH: loop header
LB: loop body
LE: loop exit
PB: predicated region body
PF: predicated region fallthrough
CT: control target
= control target key end

     0   :  { %10 = vsyncpa [#allocation3], 0  ;;  %s4221_s18 = smov [#allocation2]   ;;  %s6320_s0 = inlined_call_operand.vmem [shape: f32[32,16], index: 0, kind: input, shape index: {}]   ;;  %s6321_s1 = inlined_call_operand.hbm [shape: f32[16,32,64], index: 1, kind: input, shape index: {}]   ;;  %s6322_s2 = inlined_call_operand.vmem [shape: f32[81,128], index: 2, kind: input, shape index: {}]   ;;  %s6323_s3 = inlined_call_operand.vmem [shape: f32[8,16,4], index: 3, kind: input, shape index: {}]   ;;  %s6324_s4 = inlined_call_operand.vmem [shape: f32[73,8], index: 4, kind: input, shape index: {}]   ;;  %s6325_s5 = inlined_call_operand.vmem [shape: f32[8,4], index: 5, kind: output, shape index: {}]  }
   0x1   :  { %s18_s19 = sshll.u32 %s4221_s18, 4  ;;  %s19_s19 = int_to_ptr.vmem [resolvable:$true] %s18_s19 }
   0x2   :  { %s4207_s20 = scalar_lea.vmem %s19_s19, 8192  ;;  %p4212_p1 = scmp.lt.s32.totalorder %s19_s19, %s19_s19 }
   0x3   :  { %p4208_p0 = scmp.ne.s32.totalorder %s19_s19, %s4207_s20  ;;  %p4213_p2 = scmp.lt.s32.totalorder %s4207_s20, %s4207_s20 }
   0x5   :  { %p4214_p3 = por %p4213_p2, %p4212_p1 }
   0x7   :  { %p4215_p4 = pnand %p4214_p3, %p4208_p0 }
   0x9   :  { %4218 = shalt.err (!%p4215_p4)
}
   0xa   :  { %s4222_s21 = smov 128   ;;  %s4223_s22 = smov 8  }
   0xb   :  { %24 = dma.hbm_to_vmem [thread:$0]  %s6321_s1, 8192, %s19_s19, [#allocation3], %s4222_s21, %s4222_s21, %s4223_s22  }
   0xc   :  { %4219 = dma.done.wait [#allocation3], 8192  }
   0xd   :  { %4220 = vsyncadd [#allocation3], 4294959104  ;;  %vm113_vm0 = vcmask 130048   ;;  %v103_v0 = vld [vmem:[%s6322_s2 + $0x8] sm:$0xff]  ;;  %v102_v1 = vld [vmem:[%s6322_s2] sm:$0xff]  ;;  %s4224_s11 = smov 64   ;;  %v217_v12 = vlaneseq }
   0xe   :  { %v34_v2 = vld [vmem:[%s6320_s0] sm:$0xff]  ;;  %3769 = vmatprep.subr.mxu0 %v103_v0  ;;  %v35_v3 = vld [vmem:[%s6320_s0 + $0x8] sm:$0xff]  ;;  %v36_v4 = vld [vmem:[%s6320_s0 + $0x10] sm:$0xff]  ;;  %v4225_v10 = vmov 1966171168   ;;  %s4227_s20 = smov 124  }
   0xf   :  { %3773 = vmatprep.mubr.msk.f32.mxu0 %vm113_vm0, %v34_v2  ;;  %3770 = vmatpush3.msra.mxu0 %v103_v0  ;;  %v37_v5 = vld [vmem:[%s6320_s0 + $0x18] sm:$0xff]  ;;  %v215_v11 = vunpack.c.l.s4 %v4225_v10  ;;  %v218_v14 = vshrl.u32 %v217_v12, 7  ;;  %v111_v24 = vld [vmem:[%s6322_s2 + $0x48] sm:$0xff]  ;;  %v110_v28 = vld [vmem:[%s6322_s2 + $0x40] sm:$0xff] }
  0x10   :  { %3771 = vmatprep.subr.mxu0 %v102_v1  ;;  %3936 = vmatprep.subr.mxu1 %v111_v24  ;;  %v109_v32 = vld [vmem:[%s6322_s2 + $0x38] sm:$0xff]  ;;  %v108_v38 = vld [vmem:[%s6322_s2 + $0x30] sm:$0xff]  ;;  %v107_v46 = vld [vmem:[%s6322_s2 + $0x28] sm:$0xff] }
  0x11   :  { %3772 = vmatpush3.msra.mxu0 %v102_v1  ;;  %v216_v13 = vunpack.c.0.s8 %v215_v11  ;;  %v4315_v25 = vsub.s32 0, %v218_v14  ;;  %3944 = vmatpush3.msra.mxu1 %v111_v24  ;;  %v106_v49 = vld [vmem:[%s6322_s2 + $0x20] sm:$0xff]  ;;  %v105_v58 = vld [vmem:[%s6322_s2 + $0x18] sm:$0xff]  ;;  %v104_v0 = vld [vmem:[%s6322_s2 + $0x10] sm:$0xff] }
  0x12   :  { %3774 = vmatmul.mubr.msk.f32.vlgmr.msra.gmra.mxu0 %vm113_vm0, %v35_v3  ;;  %3779 = vmatprep.subr.mxu0 %v111_v24 }
  0x13   :  { %3776 = vmatprep.mubr.msk.f32.mxu0 %vm113_vm0, %v36_v4  ;;  %v4297_v16 = vsub.s32 %v216_v13, %v218_v14  ;;  %6351 = vst [vmem:[#allocation6_spill] sm:$0xff] %v4315_v25  ;;  %3780 = vmatpush3.msra.mxu0 %v111_v24 }
  0x14   :  { %3781 = vmatprep.subr.mxu0 %v110_v28  ;;  %3937 = vmatprep.subr.mxu1 %v110_v28 }
  0x15   :  { %6350 = vst [vmem:[#allocation5_spill] sm:$0xff] %v4297_v16  ;;  %3782 = vmatpush3.msra.mxu0 %v110_v28  ;;  %3945 = vmatpush3.msra.mxu1 %v110_v28 }
  0x16   :  { %3777 = vmatmul.mubr.msk.f32.gmra.mxu0 %vm113_vm0, %v37_v5  ;;  %3783 = vmatprep.subr.mxu0 %v109_v32 }
  0x17   :  { %3784 = vmatpush3.msra.mxu0 %v109_v32  ;;  %3938 = vmatprep.subr.mxu1 %v109_v32 }
  0x18   :  { %3785 = vmatprep.subr.mxu0 %v108_v38  ;;  %3946 = vmatpush3.msra.mxu1 %v109_v32 }
  0x19   :  { %3786 = vmatpush3.msra.mxu0 %v108_v38  ;;  %3939 = vmatprep.subr.mxu1 %v108_v38 }
  0x1a   :  { %3787 = vmatprep.subr.mxu0 %v107_v46  ;;  %3947 = vmatpush3.msra.mxu1 %v108_v38 }
  0x1b   :  { %3788 = vmatpush3.msra.mxu0 %v107_v46  ;;  %3940 = vmatprep.subr.mxu1 %v107_v46 }
  0x1c   :  { %3789 = vmatprep.subr.mxu0 %v106_v49  ;;  %3948 = vmatpush3.msra.mxu1 %v107_v46 }
  0x1d   :  { %3790 = vmatpush3.msra.mxu0 %v106_v49  ;;  %3941 = vmatprep.subr.mxu1 %v106_v49 }
  0x1e   :  { %3791 = vmatprep.subr.mxu0 %v105_v58  ;;  %3949 = vmatpush3.msra.mxu1 %v106_v49 }
  0x1f   :  { %3792 = vmatpush3.msra.mxu0 %v105_v58  ;;  %3942 = vmatprep.subr.mxu1 %v105_v58 }
  0x20   :  { %3793 = vmatprep.subr.mxu0 %v104_v0  ;;  %3950 = vmatpush3.msra.mxu1 %v105_v58 }
  0x21   :  { %3794 = vmatpush3.msra.mxu0 %v104_v0  ;;  %3943 = vmatprep.subr.mxu1 %v104_v0 }
  0x22   :  { %3951 = vmatpush3.msra.mxu1 %v104_v0 }
  0xd2   :  { %v4279_v6 = vpop.f32.mrf.mxu0 }
  0xd3   :  { %v269_v21 = vrot.slane %v4279_v6, %v4297_v16 }
  0xd4   :  { %v4281_v7 = vpop.f32.mrf.mxu0 }
  0xd5   :  { %393 = vrot.lane.b32.xlu1 %v4281_v7, %s4224_s11  ;;  %v213_v15 = vcombine.high %v4281_v7, %v4281_v7  ;;  %v4318_v26 = vrot.slane %v269_v21, %v4297_v16  ;;  %v277_v27 = vcombine.high %v269_v21, %v269_v21  ;;  %v4347_v37 = vrot.slane %v4281_v7, %v4297_v16 }
  0xd6   :  { %v4285_v8 = vpop.f32.mrf.mxu0  ;;  %v262_v21 = vcombine.high %v4279_v6, %v4279_v6 }
  0xd7   :  { %v227_v17 = vrot.slane %v213_v15, %v4297_v16  ;;  %v4340_v35 = vrot.slane %v4318_v26, %v4315_v25  ;;  %v4343_v36 = vrot.slane %v277_v27, %v4297_v16  ;;  %v4370_v48 = vrot.slane %v4347_v37, %v4297_v16 }
  0xd8   :  { %v4287_v9 = vpop.f32.mrf.mxu0  ;;  %v307_v53 = vcombine.high %v4318_v26, %v4318_v26  ;;  %v228_v60 = vcombine.high %v4347_v37, %v4347_v37 }
  0xd9   :  { %395 = vrot.lane.b32.xlu1 %v4279_v6, %s4224_s11  ;;  %397 = vrot.lane.b32.xlu0 %v4287_v9, %s4224_s11  ;;  %v229_v18 = vcombine.high %v227_v17, %v227_v17  ;;  %v4301_v19 = vrot.slane %v227_v17, %v4297_v16  ;;  %v4366_v47 = vrot.slane %v4343_v36, %v4315_v25 }
  0xda   :  { %v4388_v59 = vrot.slane %v4370_v48, %v4315_v25  ;;  %v4402_v4 = vrot.slane %v307_v53, %v4315_v25  ;;  %v4405_v5 = vrot.slane %v228_v60, %v4297_v16 }
  0xdb   :  { %v4304_v20 = vrot.slane %v229_v18, %v4297_v16  ;;  %v259_v22 = vcombine.high %v4301_v19, %v4301_v19  ;;  %v309_v18 = vcombine.high %v4343_v36, %v4343_v36 }
  0xdc   :  { %v4415_v17 = vrot.slane %v4405_v5, %v4315_v25  ;;  %v260_v53 = vcombine.high %v4405_v5, %v4405_v5 }
  0xdd   :  { %399 = vrot.lane.b32.xlu0 %v4285_v8, %s4224_s11  ;;  %v261_v23 = vcombine.high %v4304_v20, %v4304_v20  ;;  %v4324_v29 = vrot.slane %v259_v22, %v4315_v25  ;;  %v4428_v32 = vrot.slane %v309_v18, %v4315_v25 }
  0xdf   :  { %v4327_v30 = vrot.slane %v261_v23, %v4315_v25 }
 0x147   :  { %v4329_v31 = vpop.permute.xlu1 %393 }
 0x148   :  { %v429_v33 = vadd.f32 %v4329_v31, %v4324_v29  ;;  %v433_v34 = vadd.f32 %v4329_v31, %v4327_v30  ;;  %v437_v41 = vadd.f32 %v4329_v31, %v4340_v35  ;;  %v441_v52 = vadd.f32 %v4329_v31, %v4366_v47 }
 0x149   :  { %v405_v63 = vadd.f32 %v4329_v31, %v4388_v59  ;;  %v445_v12 = vadd.f32 %v4329_v31, %v4402_v4  ;;  %v409_v23 = vadd.f32 %v4329_v31, %v4415_v17  ;;  %v449_v38 = vadd.f32 %v4329_v31, %v4428_v32 }
 0x14a   :  { %vm493_vm1 = vcmp.gt.f32.partialorder %v429_v33, 0.0  ;;  %v557_v39 = vmul.f32 0.2, %v429_v33  ;;  %v561_v44 = vmul.f32 0.2, %v433_v34  ;;  %vm497_vm2 = vcmp.gt.f32.partialorder %v433_v34, 0.0 }
 0x14b   :  { %v4352_v40 = vpop.permute.xlu1 %395  ;;  %v565_v51 = vmul.f32 0.2, %v437_v41  ;;  %vm501_vm5 = vcmp.gt.f32.partialorder %v437_v41, 0.0  ;;  %v569_v61 = vmul.f32 0.2, %v441_v52  ;;  %vm505_vm6 = vcmp.gt.f32.partialorder %v441_v52, 0.0 }
 0x14c   :  { %v621_v42 = vsel %vm493_vm1, %v429_v33, %v557_v39  ;;  %v430_v43 = vadd.f32 %v4352_v40, %v4324_v29  ;;  %v434_v45 = vadd.f32 %v4352_v40, %v4327_v30  ;;  %v625_v55 = vsel %vm497_vm2, %v433_v34, %v561_v44 }
 0x14d   :  { %773 = vrot.lane.b32.xlu0 %v621_v42, %s4224_s11  ;;  %v438_v57 = vadd.f32 %v4352_v40, %v4340_v35  ;;  %v442_v62 = vadd.f32 %v4352_v40, %v4366_v47  ;;  %v629_v2 = vsel %vm501_vm5, %v437_v41, %v565_v51  ;;  %v633_v10 = vsel %vm505_vm6, %v441_v52, %v569_v61 }
 0x14e   :  { %vm494_vm3 = vcmp.gt.f32.partialorder %v430_v43, 0.0  ;;  %v558_v50 = vmul.f32 0.2, %v430_v43  ;;  %v562_v56 = vmul.f32 0.2, %v434_v45  ;;  %vm498_vm4 = vcmp.gt.f32.partialorder %v434_v45, 0.0 }
 0x14f   :  { %v566_v3 = vmul.f32 0.2, %v438_v57  ;;  %vm502_vm7 = vcmp.gt.f32.partialorder %v438_v57, 0.0  ;;  %v570_v11 = vmul.f32 0.2, %v442_v62  ;;  %vm506_vm8 = vcmp.gt.f32.partialorder %v442_v62, 0.0 }
 0x150   :  { %v622_v54 = vsel %vm494_vm3, %v430_v43, %v558_v50  ;;  %v626_v1 = vsel %vm498_vm4, %v434_v45, %v562_v56  ;;  %v533_v14 = vmul.f32 0.2, %v405_v63  ;;  %v406_v15 = vadd.f32 %v4352_v40, %v4388_v59 }
 0x151   :  { %775 = vrot.lane.b32.xlu1 %v622_v54, %s4224_s11  ;;  %781 = vrot.lane.b32.xlu0 %v625_v55, %s4224_s11  ;;  %v630_v13 = vsel %vm502_vm7, %v438_v57, %v566_v3  ;;  %vm469_vm9 = vcmp.gt.f32.partialorder %v405_v63, 0.0  ;;  %v634_v22 = vsel %vm506_vm8, %v442_v62, %v570_v11  ;;  %v573_v27 = vmul.f32 0.2, %v445_v12 }
 0x152   :  { %v597_v24 = vsel %vm469_vm9, %v405_v63, %v533_v14  ;;  %v534_v26 = vmul.f32 0.2, %v406_v15  ;;  %v446_v28 = vadd.f32 %v4352_v40, %v4402_v4  ;;  %vm470_vm10 = vcmp.gt.f32.partialorder %v406_v15, 0.0  ;;  %v4466_v63 = vpop.permute.xlu0 %397 }
 0x153   :  { %vm509_vm11 = vcmp.gt.f32.partialorder %v445_v12, 0.0  ;;  %v258_v33 = vcombine.high %v4370_v48, %v4370_v48  ;;  %v276_v34 = vrot.slane %v262_v21, %v4297_v16  ;;  %v537_v36 = vmul.f32 0.2, %v409_v23 }
 0x154   :  { %v410_v37 = vadd.f32 %v4352_v40, %v4415_v17  ;;  %v598_v39 = vsel %vm470_vm10, %v406_v15, %v534_v26  ;;  %v637_v41 = vsel %vm509_vm11, %v445_v12, %v573_v27  ;;  %v574_v42 = vmul.f32 0.2, %v446_v28 }
 0x155   :  { %783 = vrot.lane.b32.xlu1 %v626_v1, %s4224_s11  ;;  %789 = vrot.lane.b32.xlu0 %v629_v2, %s4224_s11  ;;  %vm473_vm12 = vcmp.gt.f32.partialorder %v409_v23, 0.0  ;;  %vm510_vm13 = vcmp.gt.f32.partialorder %v446_v28, 0.0  ;;  %v4440_v43 = vrot.slane %v258_v33, %v4315_v25  ;;  %v4443_v44 = vrot.slane %v276_v34, %v4297_v16 }
 0x156   :  { %v601_v45 = vsel %vm473_vm12, %v409_v23, %v537_v36  ;;  %vm474_vm14 = vcmp.gt.f32.partialorder %v410_v37, 0.0  ;;  %v538_v46 = vmul.f32 0.2, %v410_v37  ;;  %v638_v48 = vsel %vm510_vm13, %v446_v28, %v574_v42  ;;  %v4483_v23 = vpop.permute.xlu0 %399 }
 0x157   :  { %v577_v49 = vmul.f32 0.2, %v449_v38  ;;  %v450_v50 = vadd.f32 %v4352_v40, %v4428_v32  ;;  %v413_v51 = vadd.f32 %v4329_v31, %v4440_v43  ;;  %vm513_vm15 = vcmp.gt.f32.partialorder %v449_v38, 0.0 }
 0x158   :  { %v4453_v52 = vrot.slane %v4443_v44, %v4315_v25  ;;  %v602_v54 = vsel %vm474_vm14, %v410_v37, %v538_v46  ;;  %v414_v55 = vadd.f32 %v4352_v40, %v4440_v43  ;;  %v278_v61 = vcombine.high %v276_v34, %v276_v34 }
 0x159   :  { %791 = vrot.lane.b32.xlu1 %v630_v13, %s4224_s11  ;;  %797 = vrot.lane.b32.xlu0 %v633_v10, %s4224_s11  ;;  %v641_v56 = vsel %vm513_vm15, %v449_v38, %v577_v49  ;;  %v578_v57 = vmul.f32 0.2, %v450_v50  ;;  %v541_v58 = vmul.f32 0.2, %v413_v51  ;;  %vm514_vm0 = vcmp.gt.f32.partialorder %v450_v50, 0.0 }
 0x15a   :  { %v453_v60 = vadd.f32 %v4329_v31, %v4453_v52  ;;  %vm477_vm1 = vcmp.gt.f32.partialorder %v413_v51, 0.0  ;;  %v4464_v62 = vrot.slane %v260_v53, %v4315_v25  ;;  %vm478_vm2 = vcmp.gt.f32.partialorder %v414_v55, 0.0 }
 0x15b   :  { %v542_v0 = vmul.f32 0.2, %v414_v55  ;;  %v454_v1 = vadd.f32 %v4352_v40, %v4453_v52  ;;  %v642_v2 = vsel %vm514_vm0, %v450_v50, %v578_v57  ;;  %v605_v3 = vsel %vm477_vm1, %v413_v51, %v541_v58 }
 0x15c   :  { %v581_v5 = vmul.f32 0.2, %v453_v60  ;;  %v417_v10 = vadd.f32 %v4329_v31, %v4464_v62  ;;  %vm517_vm3 = vcmp.gt.f32.partialorder %v453_v60, 0.0  ;;  %v306_v11 = vrot.slane %v278_v61, %v4297_v16 }
 0x15d   :  { %799 = vrot.lane.b32.xlu1 %v634_v22, %s4224_s11  ;;  %725 = vrot.lane.b32.xlu0 %v597_v24, %s4224_s11  ;;  %v4477_v12 = vrot.slane %v4304_v20, %v4315_v25  ;;  %v606_v13 = vsel %vm478_vm2, %v414_v55, %v542_v0  ;;  %vm518_vm4 = vcmp.gt.f32.partialorder %v454_v1, 0.0  ;;  %v582_v14 = vmul.f32 0.2, %v454_v1 }
 0x15e   :  { %v645_v15 = vsel %vm517_vm3, %v453_v60, %v581_v5  ;;  %v545_v18 = vmul.f32 0.2, %v417_v10  ;;  %v418_v21 = vadd.f32 %v4352_v40, %v4464_v62  ;;  %vm481_vm5 = vcmp.gt.f32.partialorder %v417_v10, 0.0 }
 0x15f   :  { %v427_v22 = vadd.f32 %v4466_v63, %v4477_v12  ;;  %v4488_v20 = vrot.slane %v306_v11, %v4315_v25  ;;  %v646_v24 = vsel %vm518_vm4, %v454_v1, %v582_v14  ;;  %v428_v34 = vadd.f32 %v4483_v23, %v4477_v12 }
 0x160   :  { %v609_v27 = vsel %vm481_vm5, %v417_v10, %v545_v18  ;;  %v546_v28 = vmul.f32 0.2, %v418_v21  ;;  %vm482_vm6 = vcmp.gt.f32.partialorder %v418_v21, 0.0  ;;  %v431_v37 = vadd.f32 %v4466_v63, %v4324_v29 }
 0x161   :  { %727 = vrot.lane.b32.xlu1 %v598_v39, %s4224_s11  ;;  %805 = vrot.lane.b32.xlu0 %v637_v41, %s4224_s11  ;;  %v457_v26 = vadd.f32 %v4329_v31, %v4488_v20  ;;  %v555_v33 = vmul.f32 0.2, %v427_v22  ;;  %vm491_vm7 = vcmp.gt.f32.partialorder %v427_v22, 0.0  ;;  %v556_v41 = vmul.f32 0.2, %v428_v34 }
 0x162   :  { %v610_v38 = vsel %vm482_vm6, %v418_v21, %v546_v28  ;;  %v432_v42 = vadd.f32 %v4483_v23, %v4324_v29  ;;  %vm492_vm9 = vcmp.gt.f32.partialorder %v428_v34, 0.0  ;;  %v310_v46 = vcombine.high %v306_v11, %v306_v11 }
 0x163   :  { %vm521_vm8 = vcmp.gt.f32.partialorder %v457_v26, 0.0  ;;  %v585_v36 = vmul.f32 0.2, %v457_v26  ;;  %v619_v39 = vsel %vm491_vm7, %v427_v22, %v555_v33  ;;  %v559_v49 = vmul.f32 0.2, %v431_v37 }
 0x164   :  { %v620_v51 = vsel %vm492_vm9, %v428_v34, %v556_v41  ;;  %vm495_vm10 = vcmp.gt.f32.partialorder %v431_v37, 0.0  ;;  %v560_v53 = vmul.f32 0.2, %v432_v42  ;;  %v436_v29 = vadd.f32 %v4483_v23, %v4327_v30 }
 0x165   :  { %807 = vrot.lane.b32.xlu1 %v638_v48, %s4224_s11  ;;  %733 = vrot.lane.b32.xlu0 %v601_v45, %s4224_s11  ;;  %v4504_v45 = vrot.slane %v4301_v19, %v4315_v25  ;;  %v649_v48 = vsel %vm521_vm8, %v457_v26, %v585_v36  ;;  %vm496_vm11 = vcmp.gt.f32.partialorder %v432_v42, 0.0  ;;  %v308_v19 = vcombine.high %v4443_v44, %v4443_v44 }
 0x166   :  { %v623_v55 = vsel %vm495_vm10, %v431_v37, %v559_v49  ;;  %v435_v57 = vadd.f32 %v4466_v63, %v4327_v30  ;;  %v624_v58 = vsel %vm496_vm11, %v432_v42, %v560_v53  ;;  %v564_v60 = vmul.f32 0.2, %v436_v29 }
 0x167   :  { %v421_v50 = vadd.f32 %v4329_v31, %v4504_v45  ;;  %v440_v61 = vadd.f32 %v4483_v23, %v4340_v35  ;;  %vm500_vm13 = vcmp.gt.f32.partialorder %v436_v29, 0.0  ;;  %v4528_v44 = vrot.slane %v308_v19, %v4315_v25 }
 0x168   :  { %v628_v5 = vsel %vm500_vm13, %v436_v29, %v564_v60  ;;  %vm499_vm14 = vcmp.gt.f32.partialorder %v435_v57, 0.0  ;;  %v444_v11 = vadd.f32 %v4483_v23, %v4366_v47  ;;  %v439_v21 = vadd.f32 %v4466_v63, %v4340_v35 }
 0x169   :  { %735 = vrot.lane.b32.xlu1 %v602_v54, %s4224_s11  ;;  %813 = vrot.lane.b32.xlu0 %v641_v56, %s4224_s11  ;;  %v4515_v54 = vrot.slane %v310_v46, %v4315_v25  ;;  %vm485_vm12 = vcmp.gt.f32.partialorder %v421_v50, 0.0  ;;  %v549_v56 = vmul.f32 0.2, %v421_v50  ;;  %v461_v30 = vadd.f32 %v4329_v31, %v4528_v44 }
 0x16a   :  { %v568_v10 = vmul.f32 0.2, %v440_v61  ;;  %vm504_vm15 = vcmp.gt.f32.partialorder %v440_v61, 0.0  ;;  %v572_v18 = vmul.f32 0.2, %v444_v11  ;;  %v408_v22 = vadd.f32 %v4483_v23, %v4388_v59 }
 0x16b   :  { %v4523_v0 = vadd.f32 %v4329_v31, %v4515_v54  ;;  %v613_v1 = vsel %vm485_vm12, %v421_v50, %v549_v56  ;;  %vm525_vm0 = vcmp.gt.f32.partialorder %v461_v30, 0.0  ;;  %v589_v14 = vmul.f32 0.2, %v461_v30 }
 0x16c   :  { %vm508_vm1 = vcmp.gt.f32.partialorder %v444_v11, 0.0  ;;  %v425_v26 = vadd.f32 %v4329_v31, %v4477_v12  ;;  %v567_v28 = vmul.f32 0.2, %v439_v21  ;;  %v536_v33 = vmul.f32 0.2, %v408_v22 }
 0x16d   :  { %815 = vrot.lane.b32.xlu1 %v642_v2, %s4224_s11  ;;  %741 = vrot.lane.b32.xlu0 %v605_v3, %s4224_s11  ;;  %v563_v2 = vmul.f32 0.2, %v435_v57  ;;  %v4534_v3 = vadd.f32 %v4466_v63, %v4515_v54  ;;  %v448_v34 = vadd.f32 %v4483_v23, %v4402_v4  ;;  %vm503_vm2 = vcmp.gt.f32.partialorder %v439_v21, 0.0 }
 0x16e   :  { %vm472_vm3 = vcmp.gt.f32.partialorder %v408_v22, 0.0  ;;  %vm489_vm4 = vcmp.gt.f32.partialorder %v425_v26, 0.0  ;;  %v553_v35 = vmul.f32 0.2, %v425_v26  ;;  %v443_v36 = vadd.f32 %v4466_v63, %v4366_v47 }
 0x16f   :  { %v631_v37 = vsel %vm503_vm2, %v439_v21, %v567_v28  ;;  %v576_v31 = vmul.f32 0.2, %v448_v34  ;;  %vm512_vm5 = vcmp.gt.f32.partialorder %v448_v34, 0.0  ;;  %v407_v46 = vadd.f32 %v4466_v63, %v4388_v59 }
 0x170   :  { %v617_v41 = vsel %vm489_vm4, %v425_v26, %v553_v35  ;;  %v571_v42 = vmul.f32 0.2, %v443_v36  ;;  %vm507_vm6 = vcmp.gt.f32.partialorder %v443_v36, 0.0  ;;  %v452_v47 = vadd.f32 %v4483_v23, %v4428_v32 }
 0x171   :  { %743 = vrot.lane.b32.xlu1 %v606_v13, %s4224_s11  ;;  %821 = vrot.lane.b32.xlu0 %v645_v15, %s4224_s11  ;;  %v627_v13 = vsel %vm499_vm14, %v435_v57, %v563_v2  ;;  %v632_v15 = vsel %vm504_vm15, %v440_v61, %v568_v10  ;;  %vm471_vm8 = vcmp.gt.f32.partialorder %v407_v46, 0.0  ;;  %v447_v19 = vadd.f32 %v4466_v63, %v4402_v4 }
 0x172   :  { %v635_v50 = vsel %vm507_vm6, %v443_v36, %v571_v42  ;;  %v580_v29 = vmul.f32 0.2, %v452_v47  ;;  %v416_v59 = vadd.f32 %v4483_v23, %v4440_v43  ;;  %vm516_vm9 = vcmp.gt.f32.partialorder %v452_v47, 0.0 }
 0x173   :  { %v411_v56 = vadd.f32 %v4466_v63, %v4415_v17  ;;  %v456_v61 = vadd.f32 %v4483_v23, %v4453_v52  ;;  %vm511_vm10 = vcmp.gt.f32.partialorder %v447_v19, 0.0  ;;  %v455_v26 = vadd.f32 %v4466_v63, %v4453_v52 }
 0x174   :  { %v644_v57 = vsel %vm516_vm9, %v452_v47, %v580_v29  ;;  %v544_v60 = vmul.f32 0.2, %v416_v59  ;;  %vm480_vm11 = vcmp.gt.f32.partialorder %v416_v59, 0.0  ;;  %v419_v28 = vadd.f32 %v4466_v63, %v4464_v62 }
 0x175   :  { %823 = vrot.lane.b32.xlu1 %v646_v24, %s4224_s11  ;;  %749 = vrot.lane.b32.xlu0 %v609_v27, %s4224_s11  ;;  %v653_v24 = vsel %vm525_vm0, %v461_v30, %v589_v14  ;;  %v636_v27 = vsel %vm508_vm1, %v444_v11, %v572_v18  ;;  %vm475_vm12 = vcmp.gt.f32.partialorder %v411_v56, 0.0  ;;  %v539_v4 = vmul.f32 0.2, %v411_v56 }
 0x176   :  { %v608_v30 = vsel %vm480_vm11, %v416_v59, %v544_v60  ;;  %vm520_vm13 = vcmp.gt.f32.partialorder %v456_v61, 0.0  ;;  %v422_v36 = vadd.f32 %v4352_v40, %v4504_v45  ;;  %vm519_vm2 = vcmp.gt.f32.partialorder %v455_v26, 0.0 }
 0x177   :  { %v603_v10 = vsel %vm475_vm12, %v411_v56, %v539_v4  ;;  %vm483_vm4 = vcmp.gt.f32.partialorder %v419_v28, 0.0  ;;  %v547_v52 = vmul.f32 0.2, %v419_v28  ;;  %v463_v29 = vadd.f32 %v4466_v63, %v4528_v44 }
 0x178   :  { %vm529_vm12 = vcmp.gt.f32.partialorder %v4523_v0, 0.0  ;;  %v466_v4 = vadd.f32 %v4352_v40, %v4515_v54 }
 0x179   :  { %751 = vrot.lane.b32.xlu1 %v610_v38, %s4224_s11  ;;  %769 = vrot.lane.b32.xlu0 %v619_v39, %s4224_s11  ;;  %v600_v38 = vsel %vm472_vm3, %v408_v22, %v536_v33  ;;  %v412_v39 = vadd.f32 %v4483_v23, %v4415_v17  ;;  %v584_v17 = vmul.f32 0.2, %v456_v61 }
 0x17b   :  { %v540_v49 = vmul.f32 0.2, %v412_v39  ;;  %vm476_vm7 = vcmp.gt.f32.partialorder %v412_v39, 0.0  ;;  %v648_v14 = vsel %vm520_vm13, %v456_v61, %v584_v17  ;;  %v595_v17 = vmul.f32 0.2, %v4534_v3 }
 0x17d   :  { %829 = vrot.lane.b32.xlu0 %v649_v48, %s4224_s11  ;;  %771 = vrot.lane.b32.xlu1 %v620_v51, %s4224_s11  ;;  %v640_v48 = vsel %vm512_vm5, %v448_v34, %v576_v31  ;;  %v535_v51 = vmul.f32 0.2, %v407_v46  ;;  %v604_v53 = vsel %vm476_vm7, %v412_v39, %v540_v49  ;;  %v583_v34 = vmul.f32 0.2, %v455_v26 }
 0x17e   :  { %v462_v39 = vadd.f32 %v4352_v40, %v4528_v44  ;;  %vm486_vm5 = vcmp.gt.f32.partialorder %v422_v36, 0.0 }
 0x180   :  { %v590_v49 = vmul.f32 0.2, %v462_v39  ;;  %vm526_vm7 = vcmp.gt.f32.partialorder %v462_v39, 0.0 }
 0x181   :  { %777 = vrot.lane.b32.xlu0 %v623_v55, %s4224_s11  ;;  %779 = vrot.lane.b32.xlu1 %v624_v58, %s4224_s11  ;;  %v599_v55 = vsel %vm471_vm8, %v407_v46, %v535_v51  ;;  %v575_v58 = vmul.f32 0.2, %v447_v19  ;;  %v423_v46 = vadd.f32 %v4466_v63, %v4504_v45 }
 0x182   :  { %v654_v51 = vsel %vm526_vm7, %v462_v39, %v590_v49 }
 0x183   :  { %v639_v2 = vsel %vm511_vm10, %v447_v19, %v575_v58  ;;  %vm487_vm8 = vcmp.gt.f32.partialorder %v423_v46, 0.0  ;;  %v464_v19 = vadd.f32 %v4483_v23, %v4528_v44  ;;  %vm527_vm10 = vcmp.gt.f32.partialorder %v463_v29, 0.0 }
 0x184   :  { %v593_v44 = vmul.f32 0.2, %v4523_v0 }
 0x185   :  { %757 = vrot.lane.b32.xlu0 %v613_v1, %s4224_s11  ;;  %787 = vrot.lane.b32.xlu1 %v628_v5, %s4224_s11  ;;  %v451_v1 = vadd.f32 %v4466_v63, %v4428_v32  ;;  %v458_v5 = vadd.f32 %v4352_v40, %v4488_v20  ;;  %v420_v32 = vadd.f32 %v4483_v23, %v4464_v62  ;;  %v550_v62 = vmul.f32 0.2, %v422_v36 }
 0x186   :  { %v592_v56 = vmul.f32 0.2, %v464_v19  ;;  %vm528_vm11 = vcmp.gt.f32.partialorder %v464_v19, 0.0 }
 0x187   :  { %v579_v11 = vmul.f32 0.2, %v451_v1  ;;  %vm515_vm14 = vcmp.gt.f32.partialorder %v451_v1, 0.0  ;;  %vm522_vm15 = vcmp.gt.f32.partialorder %v458_v5, 0.0  ;;  %vm484_vm1 = vcmp.gt.f32.partialorder %v420_v32, 0.0 }
 0x188   :  { %v656_v60 = vsel %vm528_vm11, %v464_v19, %v592_v56 }
 0x189   :  { %785 = vrot.lane.b32.xlu0 %v627_v13, %s4224_s11  ;;  %795 = vrot.lane.b32.xlu1 %v632_v15, %s4224_s11  ;;  %v415_v13 = vadd.f32 %v4466_v63, %v4440_v43  ;;  %v586_v15 = vmul.f32 0.2, %v458_v5  ;;  %v643_v18 = vsel %vm515_vm14, %v451_v1, %v579_v11  ;;  %v460_v43 = vadd.f32 %v4483_v23, %v4488_v20 }
 0x18a   :  { %vm531_vm14 = vcmp.gt.f32.partialorder %v4534_v3, 0.0 }
 0x18b   :  { %vm479_vm0 = vcmp.gt.f32.partialorder %v415_v13, 0.0  ;;  %v543_v21 = vmul.f32 0.2, %v415_v13  ;;  %v650_v22 = vsel %vm522_vm15, %v458_v5, %v586_v15  ;;  %v588_v35 = vmul.f32 0.2, %v460_v43 }
 0x18c   :  { %vm524_vm3 = vcmp.gt.f32.partialorder %v460_v43, 0.0  ;;  %v594_v5 = vmul.f32 0.2, %v466_v4  ;;  %vm530_vm15 = vcmp.gt.f32.partialorder %v466_v4, 0.0 }
 0x18d   :  { %837 = vrot.lane.b32.xlu0 %v653_v24, %s4224_s11  ;;  %803 = vrot.lane.b32.xlu1 %v636_v27, %s4224_s11  ;;  %v548_v24 = vmul.f32 0.2, %v420_v32  ;;  %v607_v27 = vsel %vm479_vm0, %v415_v13, %v543_v21  ;;  %v652_v31 = vsel %vm524_vm3, %v460_v43, %v588_v35  ;;  %v659_v13 = vsel %vm531_vm14, %v4534_v3, %v595_v17 }
 0x18f   :  { %v612_v33 = vsel %vm484_vm1, %v420_v32, %v548_v24  ;;  %vm853_vm1 = vcmask 523264  }
 0x191   :  { %793 = vrot.lane.b32.xlu0 %v631_v37, %s4224_s11  ;;  %731 = vrot.lane.b32.xlu1 %v600_v38, %s4224_s11  ;;  %v459_v37 = vadd.f32 %v4466_v63, %v4488_v20  ;;  %v647_v38 = vsel %vm519_vm2, %v455_v26, %v583_v34  ;;  %v424_v20 = vadd.f32 %v4483_v23, %v4504_v45 }
 0x193   :  { %v587_v42 = vmul.f32 0.2, %v459_v37  ;;  %vm523_vm6 = vcmp.gt.f32.partialorder %v459_v37, 0.0  ;;  %vm488_vm9 = vcmp.gt.f32.partialorder %v424_v20, 0.0 }
 0x195   :  { %765 = vrot.lane.b32.xlu0 %v617_v41, %s4224_s11  ;;  %811 = vrot.lane.b32.xlu1 %v640_v48, %s4224_s11  ;;  %v611_v41 = vsel %vm483_vm4, %v419_v28, %v547_v52  ;;  %v614_v48 = vsel %vm486_vm5, %v422_v36, %v550_v62  ;;  %v651_v47 = vsel %vm523_vm6, %v459_v37, %v587_v42 }
 0x199   :  { %801 = vrot.lane.b32.xlu0 %v635_v50, %s4224_s11  ;;  %739 = vrot.lane.b32.xlu1 %v604_v53, %s4224_s11  ;;  %v551_v50 = vmul.f32 0.2, %v423_v46  ;;  %v552_v53 = vmul.f32 0.2, %v424_v20 }
 0x19b   :  { %v615_v45 = vsel %vm487_vm8, %v423_v46, %v551_v50  ;;  %v616_v59 = vsel %vm488_vm9, %v424_v20, %v552_v53 }
 0x19d   :  { %729 = vrot.lane.b32.xlu0 %v599_v55, %s4224_s11  ;;  %819 = vrot.lane.b32.xlu1 %v644_v57, %s4224_s11  ;;  %v591_v55 = vmul.f32 0.2, %v463_v29  ;;  %v426_v57 = vadd.f32 %v4352_v40, %v4477_v12 }
 0x19f   :  { %v655_v58 = vsel %vm527_vm10, %v463_v29, %v591_v55  ;;  %v554_v61 = vmul.f32 0.2, %v426_v57  ;;  %vm490_vm13 = vcmp.gt.f32.partialorder %v426_v57, 0.0 }
 0x1a1   :  { %809 = vrot.lane.b32.xlu0 %v639_v2, %s4224_s11  ;;  %747 = vrot.lane.b32.xlu1 %v608_v30, %s4224_s11  ;;  %v657_v2 = vsel %vm529_vm12, %v4523_v0, %v593_v44  ;;  %v618_v30 = vsel %vm490_vm13, %v426_v57, %v554_v61 }
 0x1a5   :  { %737 = vrot.lane.b32.xlu0 %v603_v10, %s4224_s11  ;;  %827 = vrot.lane.b32.xlu1 %v648_v14, %s4224_s11  ;;  %v468_v10 = vadd.f32 %v4483_v23, %v4515_v54  ;;  %v658_v14 = vsel %vm530_vm15, %v466_v4, %v594_v5 }
 0x1a7   :  { %v596_v0 = vmul.f32 0.2, %v468_v10  ;;  %vm532_vm0 = vcmp.gt.f32.partialorder %v468_v10, 0.0 }
 0x1a9   :  { %817 = vrot.lane.b32.xlu0 %v643_v18, %s4224_s11  ;;  %831 = vrot.lane.b32.xlu1 %v650_v22, %s4224_s11  ;;  %v660_v54 = vsel %vm532_vm0, %v468_v10, %v596_v0 }
 0x1ad   :  { %745 = vrot.lane.b32.xlu0 %v607_v27, %s4224_s11  ;;  %755 = vrot.lane.b32.xlu1 %v612_v33, %s4224_s11 }
 0x1b1   :  { %825 = vrot.lane.b32.xlu0 %v647_v38, %s4224_s11  ;;  %835 = vrot.lane.b32.xlu1 %v652_v31, %s4224_s11 }
 0x1b5   :  { %753 = vrot.lane.b32.xlu0 %v611_v41, %s4224_s11  ;;  %759 = vrot.lane.b32.xlu1 %v614_v48, %s4224_s11 }
 0x1b9   :  { %833 = vrot.lane.b32.xlu0 %v651_v47, %s4224_s11  ;;  %839 = vrot.lane.b32.xlu1 %v654_v51, %s4224_s11 }
 0x1bd   :  { %761 = vrot.lane.b32.xlu0 %v615_v45, %s4224_s11  ;;  %763 = vrot.lane.b32.xlu1 %v616_v59, %s4224_s11 }
 0x1bf   :  { %v774_v63 = vpop.permute.xlu0 %773 }
 0x1c1   :  { %841 = vrot.lane.b32.xlu0 %v655_v58, %s4224_s11  ;;  %843 = vrot.lane.b32.xlu1 %v656_v60, %s4224_s11 }
 0x1c3   :  { %v776_v12 = vpop.permute.xlu1 %775  ;;  %v782_v1 = vpop.permute.xlu0 %781 }
 0x1c5   :  { %845 = vrot.lane.b32.xlu0 %v657_v2, %s4224_s11  ;;  %767 = vrot.lane.b32.xlu1 %v618_v30, %s4224_s11 }
 0x1c7   :  { %v784_v40 = vpop.permute.xlu1 %783  ;;  %v790_v11 = vpop.permute.xlu0 %789 }
 0x1c9   :  { %849 = vrot.lane.b32.xlu0 %v659_v13, %s4224_s11  ;;  %847 = vrot.lane.b32.xlu1 %v658_v14, %s4224_s11 }
 0x1cb   :  { %v792_v15 = vpop.permute.xlu1 %791  ;;  %v798_v23 = vpop.permute.xlu0 %797 }
 0x1cd   :  { %851 = vrot.lane.b32.xlu1 %v660_v54, %s4224_s11 }
 0x1cf   :  { %v800_v32 = vpop.permute.xlu1 %799  ;;  %v726_v18 = vpop.permute.xlu0 %725 }
 0x1d0   :  { %3795 = vmatprep.mubr.msk.f32.mxu0 %vm853_vm1, %v726_v18  ;;  %v63_v18 = vld [vmem:[#allocation2 + $0xc8] sm:$0xff] }
 0x1d3   :  { %v728_v21 = vpop.permute.xlu1 %727  ;;  %v806_v22 = vpop.permute.xlu0 %805 }
 0x1d4   :  { %3796 = vmatmul.mubr.msk.f32.vlgmr.msra.gmra.mxu0 %vm853_vm1, %v728_v21 }
 0x1d7   :  { %v808_v3 = vpop.permute.xlu1 %807  ;;  %v734_v24 = vpop.permute.xlu0 %733 }
 0x1db   :  { %v736_v26 = vpop.permute.xlu1 %735  ;;  %v814_v43 = vpop.permute.xlu0 %813 }
 0x1df   :  { %v816_v27 = vpop.permute.xlu1 %815  ;;  %v742_v28 = vpop.permute.xlu0 %741 }
 0x1e3   :  { %v744_v33 = vpop.permute.xlu1 %743  ;;  %v4641_v34 = vpop.permute.xlu0 %821 }
 0x1e7   :  { %v4643_v35 = vpop.permute.xlu1 %823  ;;  %v4645_v36 = vpop.permute.xlu0 %749 }
 0x1eb   :  { %v4647_v52 = vpop.permute.xlu1 %751  ;;  %v770_v37 = vpop.permute.xlu0 %769 }
 0x1ec   :  { %3828 = vmatprep.mubr.msk.f32.mxu1 %vm853_vm1, %v770_v37 }
 0x1ef   :  { %v772_v38 = vpop.permute.xlu1 %771  ;;  %v4650_v31 = vpop.permute.xlu0 %829 }
 0x1f0   :  { %3829 = vmatmul.mubr.msk.f32.vlgmr.msra.gmra.mxu1 %vm853_vm1, %v772_v38  ;;  %v67_v38 = vld [vmem:[#allocation2 + $0xe8] sm:$0xff] }
 0x1f1   :  { %3831 = vmatprep.mubr.msk.f32.mxu1 %vm853_vm1, %v774_v63 }
 0x1f3   :  { %v780_v62 = vpop.permute.xlu1 %779  ;;  %v778_v39 = vpop.permute.xlu0 %777 }
 0x1f4   :  { %3832 = vmatmul.mubr.msk.f32.gmra.mxu1 %vm853_vm1, %v776_v12 }
 0x1f5   :  { %3834 = vmatprep.mubr.msk.f32.mxu1 %vm853_vm1, %v778_v39 }
 0x1f7   :  { %v788_v41 = vpop.permute.xlu1 %787  ;;  %v4656_v42 = vpop.permute.xlu0 %757 }
 0x1f8   :  { %3835 = vmatmul.mubr.msk.f32.gmra.mxu1 %vm853_vm1, %v780_v62  ;;  %v66_v62 = vld [vmem:[#allocation2 + $0xe0] sm:$0xff] }
 0x1f9   :  { %3837 = vmatprep.mubr.msk.f32.mxu1 %vm853_vm1, %v782_v1 }
 0x1fb   :  { %v796_v46 = vpop.permute.xlu1 %795  ;;  %v786_v48 = vpop.permute.xlu0 %785 }
 0x1fc   :  { %3838 = vmatmul.mubr.msk.f32.gmra.mxu1 %vm853_vm1, %v784_v40 }
 0x1fd   :  { %3840 = vmatprep.mubr.msk.f32.mxu1 %vm853_vm1, %v786_v48 }
 0x1ff   :  { %v804_v49 = vpop.permute.xlu1 %803  ;;  %v4662_v20 = vpop.permute.xlu0 %837 }
 0x200   :  { %3841 = vmatmul.mubr.msk.f32.gmra.mxu1 %vm853_vm1, %v788_v41 }
 0x201   :  { %3843 = vmatprep.mubr.msk.f32.mxu1 %vm853_vm1, %v790_v11 }
 0x203   :  { %v732_v47 = vpop.permute.xlu1 %731  ;;  %v794_v50 = vpop.permute.xlu0 %793 }
 0x204   :  { %3844 = vmatmul.mubr.msk.f32.gmra.mxu1 %vm853_vm1, %v792_v15 }
 0x205   :  { %3846 = vmatprep.mubr.msk.f32.mxu1 %vm853_vm1, %v794_v50 }
 0x207   :  { %v812_v51 = vpop.permute.xlu1 %811  ;;  %v766_v53 = vpop.permute.xlu0 %765 }
 0x208   :  { %3847 = vmatmul.mubr.msk.f32.gmra.mxu1 %vm853_vm1, %v796_v46 }
 0x209   :  { %3849 = vmatprep.mubr.msk.f32.mxu1 %vm853_vm1, %v798_v23 }
 0x20b   :  { %v740_v29 = vpop.permute.xlu1 %739  ;;  %v802_v19 = vpop.permute.xlu0 %801 }
 0x20c   :  { %3850 = vmatmul.mubr.msk.f32.gmra.mxu1 %vm853_vm1, %v800_v32 }
 0x20d   :  { %3852 = vmatprep.mubr.msk.f32.mxu1 %vm853_vm1, %v802_v19 }
 0x20f   :  { %v820_v45 = vpop.permute.xlu1 %819  ;;  %v730_v59 = vpop.permute.xlu0 %729 }
 0x210   :  { %3798 = vmatprep.mubr.msk.f32.mxu0 %vm853_vm1, %v730_v59  ;;  %3853 = vmatmul.mubr.msk.f32.gmra.mxu1 %vm853_vm1, %v804_v49 }
 0x211   :  { %3799 = vmatmul.mubr.msk.f32.gmra.mxu0 %vm853_vm1, %v732_v47  ;;  %3855 = vmatprep.mubr.msk.f32.mxu1 %vm853_vm1, %v806_v22  ;;  %v62_v22 = vld [vmem:[#allocation2 + $0xc0] sm:$0xff]  ;;  %v69_v47 = vld [vmem:[#allocation2 + $0xf8] sm:$0xff] }
 0x212   :  { %3801 = vmatprep.mubr.msk.f32.mxu0 %vm853_vm1, %v734_v24 }
 0x213   :  { %v748_v55 = vpop.permute.xlu1 %747  ;;  %v810_v56 = vpop.permute.xlu0 %809 }
 0x214   :  { %3856 = vmatmul.mubr.msk.f32.gmra.mxu1 %vm853_vm1, %v808_v3 }
 0x215   :  { %3802 = vmatmul.mubr.msk.f32.gmra.mxu0 %vm853_vm1, %v736_v26  ;;  %3858 = vmatprep.mubr.msk.f32.mxu1 %vm853_vm1, %v810_v56 }
 0x217   :  { %v828_v57 = vpop.permute.xlu1 %827  ;;  %v738_v63 = vpop.permute.xlu0 %737 }
 0x218   :  { %3804 = vmatprep.mubr.msk.f32.mxu0 %vm853_vm1, %v738_v63  ;;  %3859 = vmatmul.mubr.msk.f32.gmra.mxu1 %vm853_vm1, %v812_v51  ;;  %v68_v51 = vld [vmem:[#allocation2 + $0xf0] sm:$0xff] }
 0x219   :  { %3805 = vmatmul.mubr.msk.f32.gmra.mxu0 %vm853_vm1, %v740_v29  ;;  %3861 = vmatprep.mubr.msk.f32.mxu1 %vm853_vm1, %v814_v43  ;;  %v65_v43 = vld [vmem:[#allocation2 + $0xd8] sm:$0xff] }
 0x21a   :  { %3807 = vmatprep.mubr.msk.f32.mxu0 %vm853_vm1, %v742_v28  ;;  %v64_v28 = vld [vmem:[#allocation2 + $0xd0] sm:$0xff] }
 0x21b   :  { %v832_v44 = vpop.permute.xlu1 %831  ;;  %v818_v58 = vpop.permute.xlu0 %817 }
 0x21c   :  { %3862 = vmatmul.mubr.msk.f32.gmra.mxu1 %vm853_vm1, %v816_v27 }
 0x21d   :  { %3808 = vmatmul.mubr.msk.f32.gmra.mxu0 %vm853_vm1, %v744_v33  ;;  %3864 = vmatprep.mubr.msk.f32.mxu1 %vm853_vm1, %v818_v58 }
 0x21f   :  { %v756_v60 = vpop.permute.xlu1 %755  ;;  %v746_v61 = vpop.permute.xlu0 %745 }
 0x220   :  { %3810 = vmatprep.mubr.msk.f32.mxu0 %vm853_vm1, %v746_v61  ;;  %3865 = vmatmul.mubr.msk.f32.gmra.mxu1 %vm853_vm1, %v820_v45  ;;  %v38_v61 = vld [vmem:[#allocation2] sm:$0xff] }
 0x221   :  { %3811 = vmatmul.mubr.msk.f32.gmra.mxu0 %vm853_vm1, %v748_v55  ;;  %3867 = vmatprep.mubr.msk.f32.mxu1 %vm853_vm1, %v4641_v34 }
 0x222   :  { %3813 = vmatprep.mubr.msk.f32.mxu0 %vm853_vm1, %v4645_v36 }
 0x223   :  { %v836_v4 = vpop.permute.xlu1 %835  ;;  %v826_v12 = vpop.permute.xlu0 %825 }
 0x224   :  { %3868 = vmatmul.mubr.msk.f32.gmra.mxu1 %vm853_vm1, %v4643_v35 }
 0x225   :  { %3814 = vmatmul.mubr.msk.f32.gmra.mxu0 %vm853_vm1, %v4647_v52  ;;  %3870 = vmatprep.mubr.msk.f32.mxu1 %vm853_vm1, %v826_v12 }
 0x227   :  { %v760_v1 = vpop.permute.xlu1 %759  ;;  %v754_v2 = vpop.permute.xlu0 %753 }
 0x228   :  { %3816 = vmatprep.mubr.msk.f32.mxu0 %vm853_vm1, %v754_v2  ;;  %3871 = vmatmul.mubr.msk.f32.gmra.mxu1 %vm853_vm1, %v828_v57 }
 0x229   :  { %3817 = vmatmul.mubr.msk.f32.gmra.mxu0 %vm853_vm1, %v756_v60  ;;  %3873 = vmatprep.mubr.msk.f32.mxu1 %vm853_vm1, %v4650_v31  ;;  %v70_v60 = vld [vmem:[#allocation2 + $0x100] sm:$0xff] }
 0x22a   :  { %3819 = vmatprep.mubr.msk.f32.mxu0 %vm853_vm1, %v4656_v42 }
 0x22b   :  { %v840_v30 = vpop.permute.xlu1 %839  ;;  %v834_v17 = vpop.permute.xlu0 %833 }
 0x22c   :  { %3874 = vmatmul.mubr.msk.f32.gmra.mxu1 %vm853_vm1, %v832_v44  ;;  %v71_v44 = vld [vmem:[#allocation2 + $0x108] sm:$0xff] }
 0x22d   :  { %3820 = vmatmul.mubr.msk.f32.gmra.mxu0 %vm853_vm1, %v760_v1  ;;  %3876 = vmatprep.mubr.msk.f32.mxu1 %vm853_vm1, %v834_v17  ;;  %v39_v17 = vld [vmem:[#allocation2 + $0x8] sm:$0xff] }
 0x22f   :  { %v764_v5 = vpop.permute.xlu1 %763  ;;  %v762_v10 = vpop.permute.xlu0 %761 }
 0x230   :  { %3822 = vmatprep.mubr.msk.f32.mxu0 %vm853_vm1, %v762_v10  ;;  %3877 = vmatmul.mubr.msk.f32.gmra.mxu1 %vm853_vm1, %v836_v4 }
 0x231   :  { %3823 = vmatmul.mubr.msk.f32.gmra.mxu0 %vm853_vm1, %v764_v5  ;;  %3879 = vmatprep.mubr.msk.f32.mxu1 %vm853_vm1, %v4662_v20 }
 0x232   :  { %3825 = vmatprep.mubr.msk.f32.mxu0 %vm853_vm1, %v766_v53 }
 0x233   :  { %v844_v40 = vpop.permute.xlu1 %843  ;;  %v842_v11 = vpop.permute.xlu0 %841 }
 0x234   :  { %3880 = vmatmul.mubr.msk.f32.gmra.mxu1 %vm853_vm1, %v840_v30 }
 0x235   :  { %3882 = vmatprep.mubr.msk.f32.mxu1 %vm853_vm1, %v842_v11 }
 0x237   :  { %v768_v13 = vpop.permute.xlu1 %767  ;;  %v846_v14 = vpop.permute.xlu0 %845 }
 0x238   :  { %3826 = vmatmul.mubr.msk.f32.gmra.mxu0 %vm853_vm1, %v768_v13  ;;  %3883 = vmatmul.mubr.msk.f32.gmra.mxu1 %vm853_vm1, %v844_v40 }
 0x239   :  { %3885 = vmatprep.mubr.msk.f32.mxu1 %vm853_vm1, %v846_v14 }
 0x23b   :  { %v848_v0 = vpop.permute.xlu1 %847  ;;  %v850_v15 = vpop.permute.xlu0 %849 }
 0x23c   :  { %3886 = vmatmul.mubr.msk.f32.gmra.mxu1 %vm853_vm1, %v848_v0  ;;  %v73_v0 = vld [vmem:[#allocation2 + $0x118] sm:$0xff] }
 0x23d   :  { %3888 = vmatprep.mubr.msk.f32.mxu1 %vm853_vm1, %v850_v15 }
 0x23f   :  { %v852_v23 = vpop.permute.xlu1 %851 }
 0x240   :  { %3889 = vmatmul.mubr.msk.f32.gmra.mxu1 %vm853_vm1, %v852_v23  ;;  %v72_v23 = vld [vmem:[#allocation2 + $0x110] sm:$0xff] }
 0x294   :  { %v3797_v53 = vpop.f32.mrf.mxu0 }
 0x296   :  { %v1048_v4 = vpop.f32.mrf.mxu0 }
 0x297   :  { %v4764_v11 = vadd.f32 %v1048_v4, %v38_v61 }
 0x2b0   :  { %v4724_v54 = vpop.f32.mrf.mxu1 }
 0x2b2   :  { %v4726_v32 = vpop.f32.mrf.mxu1 }
 0x2b4   :  { %v3833_v21 = vpop.f32.mrf.mxu1 }
 0x2b5   :  { %v4728_v24 = vadd.f32 %v3833_v21, %v63_v18  ;;  %v4768_v21 = vadd.f32 %v3797_v53, %v39_v17  ;;  %v40_v17 = vld [vmem:[#allocation2 + $0x10] sm:$0xff] }
 0x2b6   :  { %v1168_v3 = vpop.f32.mrf.mxu1 }
 0x2b7   :  { %v4730_v26 = vadd.f32 %v1168_v3, %v62_v22  ;;  %v1510_v35 = vsel %vm853_vm1, %v4728_v24, -inf }
 0x2b8   :  { %v3836_v27 = vpop.f32.mrf.mxu1 }
 0x2b9   :  { %v1509_v33 = vsel %vm853_vm1, %v4730_v26, -inf  ;;  %v4736_v36 = vadd.f32 %v3836_v27, %v65_v43  ;;  %v75_v27 = vld [vmem:[#allocation2 + $0x128] sm:$0xff] }
 0x2ba   :  { %v1178_v34 = vpop.f32.mrf.mxu1  ;;  %v1511_v37 = vmax.f32 %v1509_v33, %v1510_v35  ;;  %v4778_v35 = vsel %vm853_vm1, %v4764_v11, -inf }
 0x2bb   :  { %v4738_v52 = vadd.f32 %v1178_v34, %v64_v28  ;;  %v1514_v46 = vsel %vm853_vm1, %v4736_v36, -inf }
 0x2bc   :  { %v3839_v31 = vpop.f32.mrf.mxu1 }
 0x2bd   :  { %v1512_v39 = vsel %vm853_vm1, %v4738_v52, -inf  ;;  %v4744_v48 = vadd.f32 %v3839_v31, %v67_v38 }
 0x2be   :  { %v1513_v41 = vmax.f32 %v1511_v37, %v1512_v39  ;;  %v1188_v42 = vpop.f32.mrf.mxu1  ;;  %v74_v39 = vld [vmem:[#allocation2 + $0x120] sm:$0xff] }
 0x2bf   :  { %v4746_v49 = vadd.f32 %v1188_v42, %v66_v62  ;;  %v1523_v59 = vsel %vm853_vm1, %v4744_v48, -inf }
 0x2c0   :  { %v1515_v20 = vmax.f32 %v1513_v41, %v1514_v46  ;;  %v3842_v50 = vpop.f32.mrf.mxu1  ;;  %v1432_v46 = vsel %vm853_vm1, %v4768_v21, -inf }
 0x2c1   :  { %v1522_v29 = vsel %vm853_vm1, %v4746_v49, -inf  ;;  %v4752_v55 = vadd.f32 %v3842_v50, %v69_v47 }
 0x2c2   :  { %v1516_v19 = vrot.slane %v1515_v20, 4  ;;  %v1198_v45 = vpop.f32.mrf.mxu1  ;;  %v1524_v63 = vmax.f32 %v1522_v29, %v1523_v59 }
 0x2c3   :  { %v4754_v56 = vadd.f32 %v1198_v45, %v68_v51  ;;  %v1527_v5 = vsel %vm853_vm1, %v4752_v55, -inf  ;;  %v1433_v51 = vmax.f32 %v4778_v35, %v1432_v46  ;;  %v77_v45 = vld [vmem:[#allocation2 + $0x138] sm:$0xff] }
 0x2c4   :  { %v1517_v57 = vmax.f32 %v1515_v20, %v1516_v19  ;;  %v3845_v58 = vpop.f32.mrf.mxu1 }
 0x2c5   :  { %v1525_v12 = vsel %vm853_vm1, %v4754_v56, -inf  ;;  %v4760_v10 = vadd.f32 %v3845_v58, %v71_v44 }
 0x2c6   :  { %v1518_v1 = vrot.slane %v1517_v57, 2  ;;  %v1526_v2 = vmax.f32 %v1524_v63, %v1525_v12  ;;  %v1208_v30 = vpop.f32.mrf.mxu1 }
 0x2c7   :  { %v4762_v40 = vadd.f32 %v1208_v30, %v70_v60  ;;  %v1536_v28 = vsel %vm853_vm1, %v4760_v10, -inf  ;;  %v41_v60 = vld [vmem:[#allocation2 + $0x18] sm:$0xff]  ;;  %v76_v30 = vld [vmem:[#allocation2 + $0x130] sm:$0xff] }
 0x2c8   :  { %v1519_v13 = vmax.f32 %v1517_v57, %v1518_v1  ;;  %v1528_v14 = vmax.f32 %v1526_v2, %v1527_v5  ;;  %v3848_v15 = vpop.f32.mrf.mxu1 }
 0x2c9   :  { %v1535_v18 = vsel %vm853_vm1, %v4762_v40, -inf  ;;  %v4772_v33 = vadd.f32 %v3848_v15, %v73_v0 }
 0x2ca   :  { %v1520_v22 = vrot.slane %v1519_v13, 1  ;;  %v1529_v3 = vrot.slane %v1528_v14, 4  ;;  %v1218_v43 = vpop.f32.mrf.mxu1  ;;  %v1537_v31 = vmax.f32 %v1535_v18, %v1536_v28 }
 0x2cb   :  { %v4774_v34 = vadd.f32 %v1218_v43, %v72_v23  ;;  %v1540_v29 = vsel %vm853_vm1, %v4772_v33, -inf }
 0x2cc   :  { %v1521_v37 = vmax.f32 %v1519_v13, %v1520_v22  ;;  %v1530_v38 = vmax.f32 %v1528_v14, %v1529_v3  ;;  %v3851_v62 = vpop.f32.mrf.mxu1 }
 0x2cd   :  { %v1538_v41 = vsel %vm853_vm1, %v4774_v34, -inf  ;;  %v4782_v42 = vadd.f32 %v3851_v62, %v75_v27 }
 0x2ce   :  { %vm1645_vm2 = vcmp.gt.f32.partialorder %v1521_v37, -1e+29  ;;  %v1531_v20 = vrot.slane %v1530_v38, 2  ;;  %v1539_v47 = vmax.f32 %v1537_v31, %v1538_v41  ;;  %v1228_v50 = vpop.f32.mrf.mxu1 }
 0x2cf   :  { %v1661_v53 = vsel %vm1645_vm2, %v1521_v37, 0.0  ;;  %v4789_v19 = vadd.f32 %v1228_v50, %v74_v39  ;;  %v1549_v12 = vsel %vm853_vm1, %v4782_v42, -inf }
 0x2d0   :  { %v1695_v59 = vsub.f32 %v4730_v26, %v1661_v53  ;;  %v1696_v57 = vsub.f32 %v4728_v24, %v1661_v53  ;;  %v1697_v63 = vsub.f32 %v4738_v52, %v1661_v53  ;;  %v1698_v44 = vsub.f32 %v4736_v36, %v1661_v53  ;;  %v3854_v58 = vpop.f32.mrf.mxu1  ;;  %v79_v26 = vld [vmem:[#allocation2 + $0x148] sm:$0xff] }
 0x2d1   :  { %v1532_v61 = vmax.f32 %v1530_v38, %v1531_v20  ;;  %v1541_v4 = vmax.f32 %v1539_v47, %v1540_v29  ;;  %v1548_v1 = vsel %vm853_vm1, %v4789_v19, -inf  ;;  %v3800_v2 = vpop.f32.mrf.mxu0  ;;  %v4799_v52 = vadd.f32 %v3854_v58, %v77_v45  ;;  %v43_v47 = vld [vmem:[#allocation2 + $0x28] sm:$0xff] }
 0x2d2   :  { %v1783_v5 = vmul.f32 1.442695, %v1695_v59  ;;  %v1785_v24 = vmul.f32 1.442695, %v1696_v57  ;;  %v1787_v13 = vmul.f32 1.442695, %v1697_v63  ;;  %v1238_v36 = vpop.f32.mrf.mxu1  ;;  %v1550_v23 = vmax.f32 %v1548_v1, %v1549_v12 }
 0x2d3   :  { %v1789_v14 = vmul.f32 1.442695, %v1698_v44  ;;  %v1533_v0 = vrot.slane %v1532_v61, 1  ;;  %v1542_v15 = vrot.slane %v1541_v4, 4  ;;  %v1058_v18 = vpop.f32.mrf.mxu0  ;;  %v4801_v22 = vadd.f32 %v3800_v2, %v41_v60  ;;  %v78_v59 = vld [vmem:[#allocation2 + $0x140] sm:$0xff]  ;;  %v81_v2 = vld [vmem:[#allocation2 + $0x158] sm:$0xff] }
 0x2d4   :  { %3959 = vpow2.f32 %v1783_v5  ;;  %v4803_v3 = vadd.f32 %v1238_v36, %v76_v30  ;;  %v4805_v43 = vadd.f32 %v1058_v18, %v40_v17  ;;  %v3857_v27 = vpop.f32.mrf.mxu1  ;;  %v1553_v38 = vsel %vm853_vm1, %v4799_v52, -inf  ;;  %v42_v1 = vld [vmem:[#allocation2 + $0x20] sm:$0xff]  ;;  %v80_v18 = vld [vmem:[#allocation2 + $0x150] sm:$0xff] }
 0x2d5   :  { %3961 = vpow2.f32 %v1785_v24  ;;  %v1534_v28 = vmax.f32 %v1532_v61, %v1533_v0  ;;  %v1543_v35 = vmax.f32 %v1541_v4, %v1542_v15  ;;  %v4807_v37 = vadd.f32 %v3857_v27, %v79_v26  ;;  %v3803_v39 = vpop.f32.mrf.mxu0 }
 0x2d6   :  { %3963 = vpow2.f32 %v1787_v13  ;;  %v1551_v31 = vsel %vm853_vm1, %v4803_v3, -inf  ;;  %v1434_v62 = vsel %vm853_vm1, %v4805_v43, -inf  ;;  %v1248_v41 = vpop.f32.mrf.mxu1  ;;  %v1436_v53 = vsel %vm853_vm1, %v4801_v22, -inf }
 0x2d7   :  { %3965 = vpow2.f32 %v1789_v14  ;;  %vm1646_vm3 = vcmp.gt.f32.partialorder %v1534_v28, -1e+29  ;;  %v1544_v46 = vrot.slane %v1543_v35, 2  ;;  %v1552_v20 = vmax.f32 %v1550_v23, %v1551_v31 }
 0x2d8   :  { %v1662_v50 = vsel %vm1646_vm3, %v1534_v28, 0.0  ;;  %v1435_v29 = vmax.f32 %v1433_v51, %v1434_v62  ;;  %v4819_v45 = vsel %vm853_vm1, %v4807_v37, -inf  ;;  %v4825_v12 = vadd.f32 %v3803_v39, %v43_v47  ;;  %v1068_v51 = vpop.f32.mrf.mxu0  ;;  %v3860_v30 = vpop.f32.mrf.mxu1 }
 0x2d9   :  { %v1699_v57 = vsub.f32 %v4746_v49, %v1662_v50  ;;  %v1700_v63 = vsub.f32 %v4744_v48, %v1662_v50  ;;  %v1701_v44 = vsub.f32 %v4754_v56, %v1662_v50  ;;  %v1702_v58 = vsub.f32 %v4752_v55, %v1662_v50 }
 0x2da   :  { %v1545_v60 = vmax.f32 %v1543_v35, %v1544_v46  ;;  %v1554_v61 = vmax.f32 %v1552_v20, %v1553_v38  ;;  %v1437_v4 = vmax.f32 %v1435_v29, %v1436_v53  ;;  %v4827_v24 = vadd.f32 %v1248_v41, %v78_v59  ;;  %v1258_v27 = vpop.f32.mrf.mxu1  ;;  %v3806_v62 = vpop.f32.mrf.mxu0 }
 0x2db   :  { %v1791_v17 = vmul.f32 1.442695, %v1699_v57  ;;  %v1793_v26 = vmul.f32 1.442695, %v1700_v63  ;;  %v1795_v5 = vmul.f32 1.442695, %v1701_v44  ;;  %v4831_v36 = vadd.f32 %v1068_v51, %v42_v1 }
 0x2dc   :  { %v1797_v49 = vmul.f32 1.442695, %v1702_v58  ;;  %v1546_v48 = vrot.slane %v1545_v60, 1  ;;  %v1555_v13 = vrot.slane %v1554_v61, 4  ;;  %v1438_v56 = vrot.slane %v1437_v4, 4 }
 0x2dd   :  { %3967 = vpow2.f32 %v1791_v17  ;;  %v1561_v55 = vsel %vm853_vm1, %v4827_v24, -inf  ;;  %v4833_v14 = vadd.f32 %v3860_v30, %v81_v2  ;;  %v4837_v28 = vsel %vm853_vm1, %v4825_v12, -inf  ;;  %v1078_v2 = vpop.f32.mrf.mxu0 }
 0x2de   :  { %3969 = vpow2.f32 %v1793_v26  ;;  %v1547_v0 = vmax.f32 %v1545_v60, %v1546_v48  ;;  %v1556_v15 = vmax.f32 %v1554_v61, %v1555_v13  ;;  %v1439_v23 = vmax.f32 %v1437_v4, %v1438_v56  ;;  %v45_v48 = vld [vmem:[#allocation2 + $0x38] sm:$0xff] }
 0x2df   :  { %3971 = vpow2.f32 %v1795_v5  ;;  %v1563_v35 = vmax.f32 %v1561_v55, %v4819_v45  ;;  %v4844_v46 = vsel %vm853_vm1, %v4831_v36, -inf  ;;  %v1566_v20 = vsel %vm853_vm1, %v4833_v14, -inf }
 0x2e0   :  { %3973 = vpow2.f32 %v1797_v49  ;;  %vm1647_vm4 = vcmp.gt.f32.partialorder %v1547_v0, -1e+29  ;;  %v1557_v38 = vrot.slane %v1556_v15, 2  ;;  %v1440_v31 = vrot.slane %v1439_v23, 2 }
 0x2e1   :  { %v4840_v39 = vpop.eup %3959  ;;  %v1663_v41 = vsel %vm1647_vm4, %v1547_v0, 0.0  ;;  %v4848_v47 = vadd.f32 %v1258_v27, %v80_v18  ;;  %v4874_v18 = vadd.f32 %v3806_v62, %v45_v48 }
 0x2e2   :  { %v4850_v50 = vpop.eup %3961  ;;  %v1941_v53 = vsel %vm853_vm1, %v4840_v39, 0.0  ;;  %v1703_v29 = vsub.f32 %v4762_v40, %v1663_v41  ;;  %v1704_v45 = vsub.f32 %v4760_v10, %v1663_v41  ;;  %v1705_v59 = vsub.f32 %v4774_v34, %v1663_v41  ;;  %v44_v10 = vld [vmem:[#allocation2 + $0x30] sm:$0xff] }
 0x2e3   :  { %v4857_v57 = vpop.eup %3963  ;;  %v1942_v63 = vsel %vm853_vm1, %v4850_v50, 0.0  ;;  %v1706_v44 = vsub.f32 %v4772_v33, %v1663_v41  ;;  %v1558_v58 = vmax.f32 %v1556_v15, %v1557_v38  ;;  %v1441_v60 = vmax.f32 %v1439_v23, %v1440_v31 }
 0x2e4   :  { %v4862_v61 = vpop.eup %3965  ;;  %v1943_v4 = vadd.f32 %v1942_v63, %v1941_v53  ;;  %v1799_v1 = vmul.f32 1.442695, %v1703_v29  ;;  %v1801_v51 = vmul.f32 1.442695, %v1704_v45  ;;  %v1446_v40 = vmax.f32 %v4844_v46, %v4837_v28 }
 0x2e5   :  { %v1944_v34 = vsel %vm853_vm1, %v4857_v57, 0.0  ;;  %v1803_v30 = vmul.f32 1.442695, %v1705_v59  ;;  %v1805_v17 = vmul.f32 1.442695, %v1706_v44  ;;  %v1559_v26 = vrot.slane %v1558_v58, 1 }
 0x2e6   :  { %v1945_v5 = vadd.f32 %v1944_v34, %v1943_v4  ;;  %v1946_v33 = vsel %vm853_vm1, %v4862_v61, 0.0  ;;  %3975 = vpow2.f32 %v1799_v1  ;;  %v1442_v49 = vrot.slane %v1441_v60, 1 }
 0x2e7   :  { %3977 = vpow2.f32 %v1801_v51  ;;  %v1560_v13 = vmax.f32 %v1558_v58, %v1559_v26  ;;  %v1564_v56 = vsel %vm853_vm1, %v4848_v47, -inf  ;;  %v4872_v55 = vadd.f32 %v1078_v2, %v44_v10 }
 0x2e8   :  { %v1947_v0 = vadd.f32 %v1946_v33, %v1945_v5  ;;  %3979 = vpow2.f32 %v1803_v30  ;;  %v1443_v15 = vmax.f32 %v1441_v60, %v1442_v49  ;;  %v1565_v23 = vmax.f32 %v1563_v35, %v1564_v56 }
 0x2e9   :  { %3981 = vpow2.f32 %v1805_v17  ;;  %vm1648_vm5 = vcmp.gt.f32.partialorder %v1560_v13, -1e+29  ;;  %v1447_v27 = vsel %vm853_vm1, %v4872_v55, -inf  ;;  %v1449_v46 = vsel %vm853_vm1, %v4874_v18, -inf }
 0x2ea   :  { %v4878_v38 = vpop.eup %3967  ;;  %v1948_v31 = vrot.slane %v1947_v0, 4  ;;  %v1664_v41 = vsel %vm1648_vm5, %v1560_v13, 0.0  ;;  %vm1639_vm6 = vcmp.gt.f32.partialorder %v1443_v15, -1e+29  ;;  %v1567_v53 = vmax.f32 %v1565_v23, %v1566_v20 }
 0x2eb   :  { %v4880_v29 = vpop.eup %3969  ;;  %v1954_v45 = vsel %vm853_vm1, %v4878_v38, 0.0  ;;  %v1707_v35 = vsub.f32 %v4789_v19, %v1664_v41  ;;  %v1708_v59 = vsub.f32 %v4782_v42, %v1664_v41  ;;  %v1709_v62 = vsub.f32 %v4803_v3, %v1664_v41 }
 0x2ec   :  { %v4887_v63 = vpop.eup %3971  ;;  %v1949_v44 = vadd.f32 %v1948_v31, %v1947_v0  ;;  %v1955_v58 = vsel %vm853_vm1, %v4880_v29, 0.0  ;;  %v1710_v60 = vsub.f32 %v4799_v52, %v1664_v41  ;;  %v1655_v20 = vsel %vm1639_vm6, %v1443_v15, 0.0 }
 0x2ed   :  { %v4892_v4 = vpop.eup %3973  ;;  %v1956_v1 = vadd.f32 %v1955_v58, %v1954_v45  ;;  %v1957_v51 = vsel %vm853_vm1, %v4887_v63, 0.0  ;;  %v1807_v19 = vmul.f32 1.442695, %v1707_v35  ;;  %v1809_v10 = vmul.f32 1.442695, %v1708_v59 }
 0x2ee   :  { %6352 = vst [vmem:[#allocation7_spill] sm:$0xff] %v4892_v4  ;;  %v1950_v42 = vrot.slane %v1949_v44, 2  ;;  %v1959_v3 = vsel %vm853_vm1, %v4892_v4, 0.0  ;;  %v1811_v2 = vmul.f32 1.442695, %v1709_v62  ;;  %v1671_v17 = vsub.f32 %v4764_v11, %v1655_v20 }
 0x2ef   :  { %v1813_v34 = vmul.f32 1.442695, %v1710_v60  ;;  %v1958_v30 = vadd.f32 %v1957_v51, %v1956_v1  ;;  %3983 = vpow2.f32 %v1807_v19  ;;  %v1672_v52 = vsub.f32 %v4768_v21, %v1655_v20  ;;  %v4923_v1 = vpop.f32.mrf.mxu1 }
 0x2f0   :  { %v1951_v26 = vadd.f32 %v1950_v42, %v1949_v44  ;;  %3985 = vpow2.f32 %v1809_v10  ;;  %v1673_v5 = vsub.f32 %v4805_v43, %v1655_v20  ;;  %v1674_v33 = vsub.f32 %v4801_v22, %v1655_v20 }
 0x2f1   :  { %v1960_v49 = vadd.f32 %v1959_v3, %v1958_v30  ;;  %3987 = vpow2.f32 %v1811_v2  ;;  %v1735_v48 = vmul.f32 1.442695, %v1671_v17  ;;  %v1737_v13 = vmul.f32 1.442695, %v1672_v52  ;;  %v82_v52 = vld [vmem:[#allocation2 + $0x160] sm:$0xff] }
 0x2f2   :  { %v1952_v56 = vrot.slane %v1951_v26, 1  ;;  %3989 = vpow2.f32 %v1813_v34  ;;  %v1739_v0 = vmul.f32 1.442695, %v1673_v5  ;;  %v1741_v15 = vmul.f32 1.442695, %v1674_v33 }
 0x2f3   :  { %v4902_v23 = vpop.eup %3975  ;;  %v1961_v31 = vrot.slane %v1960_v49, 4  ;;  %3991 = vpow2.f32 %v1735_v48  ;;  %v1568_v11 = vrot.slane %v1567_v53, 4  ;;  %v1448_v21 = vmax.f32 %v1446_v40, %v1447_v27 }
 0x2f4   :  { %v4907_v43 = vpop.eup %3977  ;;  %v1967_v22 = vsel %vm853_vm1, %v4902_v23, 0.0  ;;  %3993 = vpow2.f32 %v1737_v13  ;;  %v4917_v44 = vadd.f32 %v1952_v56, %v1951_v26  ;;  %v1268_v26 = vpop.f32.mrf.mxu1 }
 0x2f5   :  { %v4911_v41 = vpop.eup %3979  ;;  %v1962_v45 = vadd.f32 %v1961_v31, %v1960_v49  ;;  %v1968_v35 = vsel %vm853_vm1, %v4907_v43, 0.0  ;;  %3995 = vpow2.f32 %v1739_v0  ;;  %v1569_v59 = vmax.f32 %v1567_v53, %v1568_v11 }
 0x2f6   :  { %v4915_v62 = vpop.eup %3981  ;;  %v1969_v28 = vadd.f32 %v1968_v35, %v1967_v22  ;;  %3997 = vpow2.f32 %v1741_v15  ;;  %v1970_v27 = vsel %vm853_vm1, %v4911_v41, 0.0  ;;  %v1450_v60 = vmax.f32 %v1448_v21, %v1449_v46 }
 0x2f7   :  { %v1963_v40 = vrot.slane %v1962_v45, 2  ;;  %v1570_v58 = vrot.slane %v1569_v59, 2  ;;  %v1972_v53 = vsel %vm853_vm1, %v4915_v62, 0.0  ;;  %v2077_v10 = vmax.f32 %v4917_v44, 1e-30 }
 0x2f8   :  { %v1971_v20 = vadd.f32 %v1970_v27, %v1969_v28  ;;  %v1451_v19 = vrot.slane %v1450_v60, 4  ;;  %v4942_v21 = vadd.f32 %v1268_v26, %v82_v52 }
 0x2f9   :  { %v1571_v51 = vmax.f32 %v1569_v59, %v1570_v58  ;;  %v1964_v3 = vadd.f32 %v1963_v40, %v1962_v45  ;;  %3999 = vrcp.f32 %v2077_v10 }
 0x2fa   :  { %v1973_v42 = vadd.f32 %v1972_v53, %v1971_v20  ;;  %v1452_v34 = vmax.f32 %v1450_v60, %v1451_v19 }
 0x2fb   :  { %v1572_v2 = vrot.slane %v1571_v51, 1  ;;  %v1965_v31 = vrot.slane %v1964_v3, 1 }
 0x2fc   :  { %v4928_v30 = vpop.eup %3983  ;;  %v1974_v17 = vrot.slane %v1973_v42, 4  ;;  %v1453_v48 = vrot.slane %v1452_v34, 2 }
 0x2fd   :  { %v4930_v5 = vpop.eup %3985  ;;  %v1980_v33 = vsel %vm853_vm1, %v4928_v30, 0.0  ;;  %v1573_v49 = vmax.f32 %v1571_v51, %v1572_v2  ;;  %v3866_v2 = vpop.f32.mrf.mxu1  ;;  %v4963_v52 = vadd.f32 %v1965_v31, %v1964_v3 }
 0x2fe   :  { %v4934_v13 = vpop.eup %3987  ;;  %v1975_v56 = vadd.f32 %v1974_v17, %v1973_v42  ;;  %v1981_v0 = vsel %vm853_vm1, %v4930_v5, 0.0  ;;  %v1454_v60 = vmax.f32 %v1452_v34, %v1453_v48 }
 0x2ff   :  { %v4940_v15 = vpop.eup %3989  ;;  %v1982_v11 = vadd.f32 %v1981_v0, %v1980_v33  ;;  %vm1649_vm7 = vcmp.gt.f32.partialorder %v1573_v49, -1e+29  ;;  %v1983_v35 = vsel %vm853_vm1, %v4934_v13, 0.0 }
 0x300   :  { %v4944_v22 = vpop.eup %3991  ;;  %v1976_v45 = vrot.slane %v1975_v56, 2  ;;  %v1985_v59 = vsel %vm853_vm1, %v4940_v15, 0.0  ;;  %v1665_v28 = vsel %vm1649_vm7, %v1573_v49, 0.0  ;;  %v1455_v31 = vrot.slane %v1454_v60, 1 }
 0x301   :  { %v4950_v46 = vpop.eup %3993  ;;  %v1984_v40 = vadd.f32 %v1983_v35, %v1982_v11  ;;  %v1863_v27 = vsel %vm853_vm1, %v4944_v22, 0.0  ;;  %v1711_v58 = vsub.f32 %v4827_v24, %v1665_v28  ;;  %v1712_v19 = vsub.f32 %v4807_v37, %v1665_v28 }
 0x302   :  { %v4955_v20 = vpop.eup %3995  ;;  %v1977_v53 = vadd.f32 %v1976_v45, %v1975_v56  ;;  %v1864_v51 = vsel %vm853_vm1, %v4950_v46, 0.0  ;;  %v1713_v42 = vsub.f32 %v4848_v47, %v1665_v28  ;;  %v1714_v24 = vsub.f32 %v4833_v14, %v1665_v28  ;;  %v83_v47 = vld [vmem:[#allocation2 + $0x168] sm:$0xff]  ;;  %v1278_v14 = vpop.f32.mrf.mxu1 }
 0x303   :  { %v4961_v17 = vpop.eup %3997  ;;  %v1986_v26 = vadd.f32 %v1985_v59, %v1984_v40  ;;  %v1865_v33 = vadd.f32 %v1864_v51, %v1863_v27  ;;  %v1866_v49 = vsel %vm853_vm1, %v4955_v20, 0.0  ;;  %v1815_v48 = vmul.f32 1.442695, %v1711_v58  ;;  %v84_v59 = vld [vmem:[#allocation2 + $0x170] sm:$0xff] }
 0x304   :  { %v1978_v34 = vrot.slane %v1977_v53, 1  ;;  %v1817_v56 = vmul.f32 1.442695, %v1712_v19  ;;  %v1819_v37 = vmul.f32 1.442695, %v1713_v42  ;;  %v1868_v3 = vsel %vm853_vm1, %v4961_v17, 0.0 }
 0x305   :  { %v1987_v0 = vrot.slane %v1986_v26, 4  ;;  %v1867_v11 = vadd.f32 %v1866_v49, %v1865_v33  ;;  %v1821_v45 = vmul.f32 1.442695, %v1714_v24  ;;  %4001 = vpow2.f32 %v1815_v48  ;;  %v3809_v33 = vpop.f32.mrf.mxu0 }
 0x306   :  { %v4968_v35 = vadd.f32 %v1978_v34, %v1977_v53  ;;  %v6326_v28 = vmax.f32 %v4963_v52, 1e-30  ;;  %4003 = vpow2.f32 %v1817_v56  ;;  %v1456_v51 = vmax.f32 %v1454_v60, %v1455_v31  ;;  %v4000_v34 = vpop.eup %3999  ;;  %v85_v56 = vld [vmem:[#allocation2 + $0x178] sm:$0xff] }
 0x307   :  { %v1988_v40 = vadd.f32 %v1987_v0, %v1986_v26  ;;  %v1869_v27 = vadd.f32 %v1868_v3, %v1867_v11  ;;  %4005 = vpow2.f32 %v1819_v37  ;;  %v4975_v19 = vadd.f32 %v4923_v1, %v83_v47 }
 0x308   :  { %v6327_v58 = vmax.f32 %v4968_v35, 1e-30  ;;  %4007 = vpow2.f32 %v1821_v45  ;;  %v4977_v24 = vadd.f32 %v1278_v14, %v84_v59  ;;  %vm1640_vm8 = vcmp.gt.f32.partialorder %v1456_v51, -1e+29  ;;  %v1088_v45 = vpop.f32.mrf.mxu0 }
 0x309   :  { %v1989_v53 = vrot.slane %v1988_v40, 2  ;;  %v1870_v42 = vrot.slane %v1869_v27, 4  ;;  %v1574_v26 = vsel %vm853_vm1, %v4942_v21, -inf  ;;  %v1656_v49 = vsel %vm1640_vm8, %v1456_v51, 0.0 }
 0x30a   :  { %4009 = vrcp.f32 %v6327_v58  ;;  %v1575_v48 = vsel %vm853_vm1, %v4975_v19, -inf  ;;  %v1675_v37 = vsub.f32 %v4831_v36, %v1656_v49  ;;  %v1577_v47 = vsel %vm853_vm1, %v4977_v24, -inf }
 0x30b   :  { %4011 = vrcp.f32 %v6326_v28  ;;  %v1990_v60 = vadd.f32 %v1989_v53, %v1988_v40  ;;  %v1871_v1 = vadd.f32 %v1870_v42, %v1869_v27  ;;  %v1676_v3 = vsub.f32 %v4825_v12, %v1656_v49  ;;  %v3812_v28 = vpop.f32.mrf.mxu0 }
 0x30c   :  { %v1677_v31 = vsub.f32 %v4872_v55, %v1656_v49  ;;  %v1576_v59 = vmax.f32 %v1574_v26, %v1575_v48  ;;  %v4994_v40 = vadd.f32 %v3866_v2, %v85_v56  ;;  %v1743_v51 = vmul.f32 1.442695, %v1675_v37  ;;  %v46_v55 = vld [vmem:[#allocation2 + $0x40] sm:$0xff] }
 0x30d   :  { %v1991_v0 = vrot.slane %v1990_v60, 1  ;;  %v1872_v11 = vrot.slane %v1871_v1, 2  ;;  %v2109_v42 = vmul.f32 %v4000_v34, %v2077_v10  ;;  %v1678_v58 = vsub.f32 %v4874_v18, %v1656_v49  ;;  %v47_v10 = vld [vmem:[#allocation2 + $0x48] sm:$0xff]  ;;  %v48_v49 = vld [vmem:[#allocation2 + $0x50] sm:$0xff] }
 0x30e   :  { %v1578_v53 = vmax.f32 %v1576_v59, %v1577_v47  ;;  %4013 = vpow2.f32 %v1743_v51  ;;  %v1745_v12 = vmul.f32 1.442695, %v1676_v3  ;;  %v1747_v25 = vmul.f32 1.442695, %v1677_v31 }
 0x30f   :  { %v4992_v14 = vadd.f32 %v1991_v0, %v1990_v60  ;;  %v1873_v27 = vadd.f32 %v1872_v11, %v1871_v1  ;;  %v1579_v2 = vsel %vm853_vm1, %v4994_v40, -inf  ;;  %v5012_v18 = vadd.f32 %v1088_v45, %v46_v55  ;;  %v1098_v0 = vpop.f32.mrf.mxu0 }
 0x310   :  { %4015 = vpow2.f32 %v1745_v12  ;;  %v1580_v48 = vmax.f32 %v1578_v53, %v1579_v2  ;;  %v2125_v37 = vsub.f32 2.0, %v2109_v42  ;;  %v1749_v3 = vmul.f32 1.442695, %v1678_v58 }
 0x311   :  { %v6330_v36 = vmax.f32 %v4992_v14, 1e-30  ;;  %v1874_v1 = vrot.slane %v1873_v27, 1  ;;  %v5018_v51 = vadd.f32 %v3809_v33, %v47_v10  ;;  %v5024_v2 = vadd.f32 %v1098_v0, %v48_v49 }
 0x312   :  { %v5000_v26 = vpop.eup %4001  ;;  %v1581_v55 = vrot.slane %v1580_v48, 4  ;;  %v6354_v42 = vmax.f32 %v4968_v35, 1e-30  ;;  %v2141_v58 = vmul.f32 %v4000_v34, %v2125_v37 }
 0x313   :  { %v5004_v60 = vpop.eup %4003  ;;  %v1993_v44 = vsel %vm853_vm1, %v5000_v26, 0.0  ;;  %4017 = vrcp.f32 %v6330_v36  ;;  %v5020_v12 = vadd.f32 %v1874_v1, %v1873_v27  ;;  %v6355_v1 = vmax.f32 %v4963_v52, 1e-30 }
 0x314   :  { %v5008_v56 = vpop.eup %4005  ;;  %v1994_v47 = vsel %vm853_vm1, %v5004_v60, 0.0  ;;  %4019 = vpow2.f32 %v1747_v25  ;;  %v1457_v25 = vsel %vm853_vm1, %v5012_v18, -inf  ;;  %v1582_v27 = vmax.f32 %v1580_v48, %v1581_v55  ;;  %v60_v55 = vld [vmem:[#allocation2 + $0xb0] sm:$0xff] }
 0x315   :  { %v5014_v11 = vpop.eup %4007  ;;  %v1995_v59 = vadd.f32 %v1994_v47, %v1993_v44  ;;  %v1996_v45 = vsel %vm853_vm1, %v5008_v56, 0.0  ;;  %4021 = vpow2.f32 %v1749_v3  ;;  %v49_v47 = vld [vmem:[#allocation2 + $0x58] sm:$0xff]  ;;  %v1458_v35 = vsel %vm853_vm1, %v5018_v51, -inf }
 0x316   :  { %6353 = vst [vmem:[#allocation8_spill] sm:$0xff] %v5014_v11  ;;  %v1998_v33 = vsel %vm853_vm1, %v5014_v11, 0.0  ;;  %v1583_v0 = vrot.slane %v1582_v27, 2  ;;  %v2175_v3 = vmul.f32 %v4840_v39, %v2141_v58  ;;  %v5040_v48 = vadd.f32 %v3812_v28, %v49_v47 }
 0x317   :  { %v4010_v31 = vpop.eup %4009  ;;  %v1997_v16 = vadd.f32 %v1996_v45, %v1995_v59  ;;  %v1460_v59 = vsel %vm853_vm1, %v5024_v2, -inf  ;;  %v1459_v45 = vmax.f32 %v1457_v25, %v1458_v35  ;;  %v2176_v49 = vmul.f32 %v4850_v50, %v2141_v58 }
 0x318   :  { %v4012_v53 = vpop.eup %4011  ;;  %v2111_v36 = vmul.f32 %v4010_v31, %v6354_v42  ;;  %v2177_v4 = vmul.f32 %v4857_v57, %v2141_v58  ;;  %v6356_v11 = vmax.f32 %v5020_v12, 1e-30  ;;  %v2239_v50 = vmul.f32 %v2175_v3, %v4281_v7 }
 0x319   :  { %v2110_v44 = vmul.f32 %v4012_v53, %v6355_v1  ;;  %v1999_v10 = vadd.f32 %v1998_v33, %v1997_v16  ;;  %v61_v16 = vld [vmem:[#allocation2 + $0xb8] sm:$0xff]  ;;  %v1461_v1 = vmax.f32 %v1459_v45, %v1460_v59  ;;  %v1462_v57 = vsel %vm853_vm1, %v5040_v48, -inf }
 0x31a   :  { %v2127_v34 = vsub.f32 2.0, %v2111_v36  ;;  %4023 = vrcp.f32 %v6356_v11  ;;  %v1584_v36 = vmax.f32 %v1582_v27, %v1583_v0 }
 0x31b   :  { %v2000_v37 = vrot.slane %v1999_v10, 4  ;;  %v5042_v52 = vpop.eup %4013  ;;  %v2126_v42 = vsub.f32 2.0, %v2110_v44  ;;  %v5053_v44 = vadd.f32 %v4724_v54, %v61_v16  ;;  %v1463_v59 = vmax.f32 %v1461_v1, %v1462_v57 }
 0x31c   :  { %v2143_v39 = vmul.f32 %v4010_v31, %v2127_v34  ;;  %v1876_v47 = vsel %vm853_vm1, %v5042_v52, 0.0  ;;  %v2240_v54 = vmul.f32 %v4279_v6, %v2176_v49  ;;  %v2241_v34 = vmul.f32 %v2177_v4, %v4287_v9 }
 0x31d   :  { %v2001_v33 = vadd.f32 %v2000_v37, %v1999_v10  ;;  %v5048_v25 = vpop.eup %4015  ;;  %6357 = vst [vmem:[#allocation9_spill] sm:$0xff] %v5053_v44  ;;  %v5056_v10 = vadd.f32 %v4726_v32, %v60_v55  ;;  %v5063_v27 = vmul.f32 %v4012_v53, %v2126_v42  ;;  %v1585_v37 = vrot.slane %v1584_v36, 1  ;;  %v3869_v55 = vpop.f32.mrf.mxu1 }
 0x31e   :  { %v1877_v0 = vsel %vm853_vm1, %v5048_v25, 0.0  ;;  %v2183_v45 = vmul.f32 %v4902_v23, %v2143_v39  ;;  %v2184_v3 = vmul.f32 %v4907_v43, %v2143_v39  ;;  %v5075_v42 = vsel %vm853_vm1, %v5053_v44, -inf }
 0x31f   :  { %v2002_v28 = vrot.slane %v2001_v33, 2  ;;  %6358 = vst [vmem:[#allocation10_spill] sm:$0xff] %v5056_v10  ;;  %v1878_v32 = vadd.f32 %v1877_v0, %v1876_v47  ;;  %6360 = vst [vmem:[#allocation12_spill] sm:$0xff] %v5075_v42  ;;  %v5079_v49 = vsel %vm853_vm1, %v5056_v10, -inf  ;;  %v6362_v4 = vmax.f32 %v4992_v14, 1e-30 }
 0x320   :  { %v4018_v35 = vpop.eup %4017  ;;  %6361 = vst [vmem:[#allocation13_spill] sm:$0xff] %v5079_v49  ;;  %v5086_v43 = vmul.f32 %v4862_v61, %v2141_v58  ;;  %v2179_v47 = vmul.f32 %v4878_v38, %v5063_v27  ;;  %v1464_v57 = vrot.slane %v1463_v59, 4  ;;  %v2358_v0 = vsel %vm853_vm1, %v2240_v54, 0.0  ;;  %v51_v38 = vld [vmem:[#allocation2 + $0x68] sm:$0xff]  ;;  %v1288_v54 = vpop.f32.mrf.mxu1 }
 0x321   :  { %v5061_v11 = vpop.eup %4019  ;;  %v2003_v31 = vadd.f32 %v2002_v28, %v2001_v33  ;;  %v2112_v33 = vmul.f32 %v4018_v35, %v6362_v4  ;;  %v2357_v28 = vsel %vm853_vm1, %v2239_v50, 0.0  ;;  %v5093_v44 = vsel %vm853_vm1, %v2241_v34, 0.0  ;;  %v3815_v4 = vpop.f32.mrf.mxu0 }
 0x322   :  { %6359 = vst [vmem:[#allocation11_spill] sm:$0xff] %v5061_v11  ;;  %v1879_v53 = vsel %vm853_vm1, %v5061_v11, 0.0  ;;  %v5083_v23 = vpop.eup %4021  ;;  %6364 = vst [vmem:[#allocation15_spill] sm:$0xff] %v5086_v43  ;;  %v1586_v14 = vmax.f32 %v1584_v36, %v1585_v37  ;;  %v2247_v61 = vmul.f32 %v2183_v45, %v4281_v7  ;;  %v2248_v58 = vmul.f32 %v4279_v6, %v2184_v3  ;;  %v86_v43 = vld [vmem:[#allocation2 + $0x180] sm:$0xff] }
 0x323   :  { %v2004_v16 = vrot.slane %v2003_v31, 1  ;;  %v1880_v1 = vadd.f32 %v1879_v53, %v1878_v32  ;;  %6363 = vst [vmem:[#allocation14_spill] sm:$0xff] %v5083_v23  ;;  %v87_v32 = vld [vmem:[#allocation2 + $0x188] sm:$0xff]  ;;  %v2185_v53 = vmul.f32 %v4911_v41, %v2143_v39  ;;  %v1881_v50 = vsel %vm853_vm1, %v5083_v23, 0.0  ;;  %v50_v11 = vld [vmem:[#allocation2 + $0x60] sm:$0xff] }
 0x324   :  { %v2180_v34 = vmul.f32 %v4880_v29, %v5063_v27  ;;  %v2181_v41 = vmul.f32 %v4887_v63, %v5063_v27  ;;  %v2243_v45 = vmul.f32 %v2179_v47, %v4281_v7  ;;  %v1465_v3 = vmax.f32 %v1463_v59, %v1464_v57 }
 0x325   :  { %v5095_v10 = vadd.f32 %v2004_v16, %v2003_v31  ;;  %v2128_v31 = vsub.f32 2.0, %v2112_v33  ;;  %v1882_v37 = vadd.f32 %v1881_v50, %v1880_v1  ;;  %v5108_v16 = vadd.f32 %v3869_v55, %v87_v32 }
 0x326   :  { %v2186_v42 = vmul.f32 %v4915_v62, %v2143_v39  ;;  %vm1650_vm9 = vcmp.gt.f32.partialorder %v1586_v14, -1e+29  ;;  %v5111_v49 = vadd.f32 %v3815_v4, %v51_v38  ;;  %v5113_v23 = vadd.f32 %v1288_v54, %v86_v43 }
 0x327   :  { %v6338_v36 = vmax.f32 %v5095_v10, 1e-30  ;;  %v4024_v29 = vpop.eup %4023  ;;  %v2249_v33 = vmul.f32 %v2185_v53, %v4287_v9  ;;  %v2383_v1 = vsel %vm853_vm1, %v2247_v61, 0.0  ;;  %v2384_v50 = vsel %vm853_vm1, %v2248_v58, 0.0 }
 0x328   :  { %v5120_v63 = vadd.f32 %v2358_v0, %v2357_v28  ;;  %v5123_v59 = vmul.f32 %v4279_v6, %v2180_v34  ;;  %v2144_v62 = vmul.f32 %v4018_v35, %v2128_v31  ;;  %v1883_v39 = vrot.slane %v1882_v37, 4 }
 0x329   :  { %4025 = vrcp.f32 %v6338_v36  ;;  %v5126_v55 = vmul.f32 %v2181_v41, %v4287_v9  ;;  %v5129_v43 = vsel %vm853_vm1, %v2243_v45, 0.0  ;;  %v1666_v47 = vsel %vm1650_vm9, %v1586_v14, 0.0  ;;  %v1108_v45 = vpop.f32.mrf.mxu0 }
 0x32a   :  { %v1466_v57 = vrot.slane %v1465_v3, 2  ;;  %v2385_v32 = vadd.f32 %v2384_v50, %v2383_v1  ;;  %v6365_v53 = vmax.f32 %v5020_v12, 1e-30  ;;  %v1884_v58 = vadd.f32 %v1883_v39, %v1882_v37 }
 0x32b   :  { %v5135_v28 = vsel %vm853_vm1, %v5108_v16, -inf  ;;  %v2250_v35 = vmul.f32 %v4285_v8, %v2186_v42  ;;  %v2386_v0 = vsel %vm853_vm1, %v2249_v33, 0.0  ;;  %v5141_v38 = vsel %vm853_vm1, %v5111_v49, -inf }
 0x32c   :  { %v2103_v61 = vmul.f32 %v4024_v29, %v6365_v53  ;;  %v5145_v14 = vsel %vm853_vm1, %v5113_v23, -inf  ;;  %v2187_v12 = vmul.f32 %v4928_v30, %v2144_v62  ;;  %v1885_v4 = vrot.slane %v1884_v58, 2 }
 0x32d   :  { %v1715_v54 = vsub.f32 %v4942_v21, %v1666_v47  ;;  %v1716_v34 = vsub.f32 %v4975_v19, %v1666_v47  ;;  %v2188_v31 = vmul.f32 %v4930_v5, %v2144_v62  ;;  %v1717_v42 = vsub.f32 %v4977_v24, %v1666_v47 }
 0x32e   :  { %v1718_v37 = vsub.f32 %v4994_v40, %v1666_v47  ;;  %v1467_v41 = vmax.f32 %v1465_v3, %v1466_v57  ;;  %v2387_v33 = vadd.f32 %v2386_v0, %v2385_v32  ;;  %v2119_v1 = vsub.f32 2.0, %v2103_v61  ;;  %v3872_v57 = vpop.f32.mrf.mxu1  ;;  %v3818_v32 = vpop.f32.mrf.mxu0 }
 0x32f   :  { %v1823_v50 = vmul.f32 1.442695, %v1715_v54  ;;  %v1825_v39 = vmul.f32 1.442695, %v1716_v34  ;;  %v2189_v53 = vmul.f32 %v4934_v13, %v2144_v62  ;;  %v2190_v30 = vmul.f32 %v4940_v15, %v2144_v62  ;;  %v88_v34 = vld [vmem:[#allocation2 + $0x190] sm:$0xff] }
 0x330   :  { %v1827_v36 = vmul.f32 1.442695, %v1717_v42  ;;  %v1468_v21 = vrot.slane %v1467_v41, 1  ;;  %v2251_v19 = vmul.f32 %v2187_v12, %v4281_v7  ;;  %v1886_v5 = vadd.f32 %v1885_v4, %v1884_v58  ;;  %v52_v42 = vld [vmem:[#allocation2 + $0x70] sm:$0xff] }
 0x331   :  { %4027 = vpow2.f32 %v1823_v50  ;;  %v1829_v24 = vmul.f32 1.442695, %v1718_v37  ;;  %v2388_v40 = vsel %vm853_vm1, %v2250_v35, 0.0  ;;  %v2252_v3 = vmul.f32 %v4279_v6, %v2188_v31  ;;  %v1298_v31 = vpop.f32.mrf.mxu1  ;;  %v1118_v37 = vpop.f32.mrf.mxu0  ;;  %v53_v50 = vld [vmem:[#allocation2 + $0x78] sm:$0xff] }
 0x332   :  { %4029 = vpow2.f32 %v1825_v39  ;;  %v1469_v47 = vmax.f32 %v1467_v41, %v1468_v21  ;;  %v5158_v61 = vmul.f32 %v4024_v29, %v2119_v1  ;;  %v1589_v13 = vmax.f32 %v5145_v14, %v5135_v28 }
 0x333   :  { %4031 = vpow2.f32 %v1827_v36  ;;  %v5162_v15 = vadd.f32 %v1108_v45, %v50_v11  ;;  %v5164_v62 = vadd.f32 %v2388_v40, %v2387_v33  ;;  %v2253_v58 = vmul.f32 %v2189_v53, %v4287_v9 }
 0x334   :  { %v2254_v35 = vmul.f32 %v4285_v8, %v2190_v30  ;;  %vm1641_vm10 = vcmp.gt.f32.partialorder %v1469_v47, -1e+29  ;;  %v2396_v12 = vsel %vm853_vm1, %v2251_v19, 0.0  ;;  %v1887_v4 = vrot.slane %v1886_v5, 1 }
 0x335   :  { %4033 = vpow2.f32 %v1829_v24  ;;  %v1657_v29 = vsel %vm1641_vm10, %v1469_v47, 0.0  ;;  %v2397_v36 = vsel %vm853_vm1, %v2252_v3, 0.0  ;;  %v6366_v54 = vmax.f32 %v5095_v10, 1e-30  ;;  %v89_v10 = vld [vmem:[#allocation2 + $0x198] sm:$0xff] }
 0x336   :  { %v4026_v0 = vpop.eup %4025  ;;  %v1679_v11 = vsub.f32 %v5012_v18, %v1657_v29  ;;  %v1680_v14 = vsub.f32 %v5018_v51, %v1657_v29  ;;  %v2151_v41 = vmul.f32 %v4944_v22, %v5158_v61  ;;  %v1681_v45 = vsub.f32 %v5024_v2, %v1657_v29 }
 0x337   :  { %v2113_v28 = vmul.f32 %v4026_v0, %v6366_v54  ;;  %v1682_v33 = vsub.f32 %v5040_v48, %v1657_v29  ;;  %v1470_v1 = vsel %vm853_vm1, %v5162_v15, -inf  ;;  %v2152_v18 = vmul.f32 %v4950_v46, %v5158_v61 }
 0x338   :  { %v1751_v39 = vmul.f32 1.442695, %v1679_v11  ;;  %v1753_v53 = vmul.f32 1.442695, %v1680_v14  ;;  %v5182_v30 = vadd.f32 %v1887_v4, %v1886_v5  ;;  %v1755_v21 = vmul.f32 1.442695, %v1681_v45 }
 0x339   :  { %v2129_v51 = vsub.f32 2.0, %v2113_v28  ;;  %v5184_v19 = vadd.f32 %v1298_v31, %v88_v34  ;;  %v5186_v22 = vadd.f32 %v1118_v37, %v52_v42  ;;  %v1472_v2 = vmax.f32 %v1470_v1, %v5141_v38 }
 0x33a   :  { %4035 = vpow2.f32 %v1751_v39  ;;  %v5189_v48 = vadd.f32 %v3872_v57, %v89_v10  ;;  %v5191_v24 = vadd.f32 %v3818_v32, %v53_v50  ;;  %v1757_v40 = vmul.f32 1.442695, %v1682_v33 }
 0x33b   :  { %4037 = vpow2.f32 %v1753_v53  ;;  %v1590_v46 = vsel %vm853_vm1, %v5184_v19, -inf  ;;  %v1473_v5 = vsel %vm853_vm1, %v5186_v22, -inf  ;;  %v2398_v3 = vadd.f32 %v2397_v36, %v2396_v12 }
 0x33c   :  { %v2399_v47 = vsel %vm853_vm1, %v2253_v58, 0.0  ;;  %v2153_v4 = vmul.f32 %v4955_v20, %v5158_v61  ;;  %v5200_v29 = vmul.f32 %v4026_v0, %v2129_v51  ;;  %v6340_v38 = vmax.f32 %v5182_v30, 1e-30 }
 0x33d   :  { %4039 = vpow2.f32 %v1755_v21  ;;  %v1591_v57 = vmax.f32 %v1589_v13, %v1590_v46  ;;  %v1474_v32 = vmax.f32 %v1472_v2, %v1473_v5  ;;  %v2215_v28 = vmul.f32 %v2151_v41, %v4281_v7 }
 0x33e   :  { %v5203_v54 = vpop.eup %4027  ;;  %v2216_v11 = vmul.f32 %v4279_v6, %v2152_v18  ;;  %v1592_v12 = vsel %vm853_vm1, %v5189_v48, -inf  ;;  %v1475_v58 = vsel %vm853_vm1, %v5191_v24, -inf  ;;  %4041 = vpow2.f32 %v1757_v40 }
 0x33f   :  { %v5211_v20 = vpop.eup %4029  ;;  %v2006_v0 = vsel %vm853_vm1, %v5203_v54, 0.0  ;;  %v1593_v13 = vmax.f32 %v1591_v57, %v1592_v12  ;;  %v1476_v36 = vmax.f32 %v1474_v32, %v1475_v58  ;;  %v2390_v34 = vrot.slane %v5164_v62, 4 }
 0x340   :  { %v5215_v14 = vpop.eup %4031  ;;  %v2400_v31 = vadd.f32 %v2399_v47, %v2398_v3  ;;  %v2401_v42 = vsel %vm853_vm1, %v2254_v35, 0.0  ;;  %v2191_v37 = vmul.f32 %v5000_v26, %v5200_v29  ;;  %v2192_v41 = vmul.f32 %v5004_v60, %v5200_v29  ;;  %v3875_v3 = vpop.f32.mrf.mxu1 }
 0x341   :  { %4043 = vrcp.f32 %v6340_v38  ;;  %v2007_v45 = vsel %vm853_vm1, %v5211_v20, 0.0  ;;  %v1594_v33 = vrot.slane %v1593_v13, 4  ;;  %v2154_v10 = vmul.f32 %v4961_v17, %v5158_v61  ;;  %v3821_v47 = vpop.f32.mrf.mxu0 }
 0x342   :  { %v5227_v1 = vpop.eup %4033  ;;  %v2217_v35 = vmul.f32 %v2153_v4, %v4287_v9  ;;  %v2008_v50 = vadd.f32 %v2007_v45, %v2006_v0  ;;  %v1477_v18 = vrot.slane %v1476_v36, 4  ;;  %v2279_v26 = vsel %vm853_vm1, %v2215_v28, 0.0 }
 0x343   :  { %v2280_v60 = vsel %vm853_vm1, %v2216_v11, 0.0  ;;  %v2009_v51 = vsel %vm853_vm1, %v5215_v14, 0.0  ;;  %v1595_v39 = vmax.f32 %v1593_v13, %v1594_v33  ;;  %v2402_v53 = vadd.f32 %v2401_v42, %v2400_v31  ;;  %v91_v42 = vld [vmem:[#allocation2 + $0x1a8] sm:$0xff] }
 0x344   :  { %v2255_v21 = vmul.f32 %v2191_v37, %v4281_v7  ;;  %v2010_v2 = vadd.f32 %v2009_v51, %v2008_v50  ;;  %v1478_v40 = vmax.f32 %v1476_v36, %v1477_v18  ;;  %v2371_v17 = vsel %vm853_vm1, %v5123_v59, 0.0 }
 0x345   :  { %v2256_v61 = vmul.f32 %v4279_v6, %v2192_v41  ;;  %v2011_v46 = vsel %vm853_vm1, %v5227_v1, 0.0  ;;  %v1596_v5 = vrot.slane %v1595_v39, 2  ;;  %v5243_v4 = vadd.f32 %v2390_v34, %v5164_v62 }
 0x346   :  { %v2281_v57 = vadd.f32 %v2280_v60, %v2279_v26  ;;  %v2012_v32 = vadd.f32 %v2011_v46, %v2010_v2  ;;  %v1479_v28 = vrot.slane %v1478_v40, 2  ;;  %v2218_v12 = vmul.f32 %v4285_v8, %v2154_v10  ;;  %v55_v10 = vld [vmem:[#allocation2 + $0x88] sm:$0xff] }
 0x347   :  { %v5245_v11 = vpop.eup %4035  ;;  %v2282_v59 = vsel %vm853_vm1, %v2217_v35, 0.0  ;;  %v2193_v58 = vmul.f32 %v5008_v56, %v5200_v29  ;;  %v1597_v0 = vmax.f32 %v1595_v39, %v1596_v5  ;;  %v2403_v36 = vrot.slane %v2402_v53, 4  ;;  %v1308_v56 = vpop.f32.mrf.mxu1 }
 0x348   :  { %6367 = vst [vmem:[#allocation16_spill] sm:$0xff] %v5245_v11  ;;  %v5251_v13 = vpop.eup %4037  ;;  %v2409_v31 = vsel %vm853_vm1, %v2255_v21, 0.0  ;;  %v2013_v62 = vrot.slane %v2012_v32, 4  ;;  %v1889_v34 = vsel %vm853_vm1, %v5245_v11, 0.0  ;;  %v2410_v37 = vsel %vm853_vm1, %v2256_v61, 0.0  ;;  %v1128_v35 = vpop.f32.mrf.mxu0  ;;  %v6370_v21 = vld [vmem:[#allocation8_spill] sm:$0xff] }
 0x349   :  { %6368 = vst [vmem:[#allocation17_spill] sm:$0xff] %v5251_v13  ;;  %v1890_v41 = vsel %vm853_vm1, %v5251_v13, 0.0  ;;  %v1598_v45 = vrot.slane %v1597_v0, 1  ;;  %v1480_v33 = vmax.f32 %v1478_v40, %v1479_v28  ;;  %v5262_v18 = vadd.f32 %v2371_v17, %v5129_v43  ;;  %v90_v40 = vld [vmem:[#allocation2 + $0x1a0] sm:$0xff] }
 0x34a   :  { %v5259_v50 = vpop.eup %4039  ;;  %v2283_v26 = vadd.f32 %v2282_v59, %v2281_v57  ;;  %v2014_v60 = vadd.f32 %v2013_v62, %v2012_v32  ;;  %v1891_v51 = vadd.f32 %v1890_v41, %v1889_v34  ;;  %v2194_v2 = vmul.f32 %v6370_v21, %v5200_v29  ;;  %v54_v62 = vld [vmem:[#allocation2 + $0x80] sm:$0xff] }
 0x34b   :  { %6369 = vst [vmem:[#allocation18_spill] sm:$0xff] %v5259_v50  ;;  %v2257_v61 = vmul.f32 %v2193_v58, %v4287_v9  ;;  %v5268_v46 = vadd.f32 %v3875_v3, %v91_v42  ;;  %v5270_v5 = vpop.eup %4041  ;;  %v2284_v28 = vsel %vm853_vm1, %v2218_v12, 0.0  ;;  %v2411_v38 = vadd.f32 %v2410_v37, %v2409_v31  ;;  %v3878_v58 = vpop.f32.mrf.mxu1 }
 0x34c   :  { %6371 = vst [vmem:[#allocation8_spill] sm:$0xff] %v5270_v5  ;;  %v2015_v43 = vrot.slane %v2014_v60, 2  ;;  %v5273_v17 = vadd.f32 %v3821_v47, %v55_v10  ;;  %v5275_v57 = vadd.f32 %v2403_v36, %v2402_v53  ;;  %v1892_v32 = vsel %vm853_vm1, %v5259_v50, 0.0  ;;  %v3824_v3 = vpop.f32.mrf.mxu0  ;;  %v93_v47 = vld [vmem:[#allocation2 + $0x1b8] sm:$0xff] }
 0x34d   :  { %v1599_v59 = vmax.f32 %v1597_v0, %v1598_v45  ;;  %v1481_v29 = vrot.slane %v1480_v33, 1  ;;  %v5281_v42 = vadd.f32 %v2284_v28, %v2283_v26  ;;  %v1893_v12 = vadd.f32 %v1892_v32, %v1891_v51  ;;  %v56_v28 = vld [vmem:[#allocation2 + $0x90] sm:$0xff] }
 0x34e   :  { %v5279_v34 = vpop.eup %4043  ;;  %v2016_v41 = vadd.f32 %v2015_v43, %v2014_v60  ;;  %v5283_v31 = vadd.f32 %v1308_v56, %v90_v40  ;;  %v5286_v53 = vmul.f32 %v4285_v8, %v2194_v2  ;;  %v2412_v36 = vsel %vm853_vm1, %v2257_v61, 0.0  ;;  %v92_v61 = vld [vmem:[#allocation2 + $0x1b0] sm:$0xff]  ;;  %v1318_v40 = vpop.f32.mrf.mxu1 }
 0x34f   :  { %v1894_v0 = vsel %vm853_vm1, %v5270_v5, 0.0  ;;  %v1601_v37 = vsel %vm853_vm1, %v5268_v46, -inf  ;;  %v5293_v45 = vadd.f32 %v2412_v36, %v2411_v38  ;;  %v1484_v26 = vsel %vm853_vm1, %v5273_v17, -inf  ;;  %v1138_v43 = vpop.f32.mrf.mxu0 }
 0x350   :  { %v1895_v10 = vadd.f32 %v1894_v0, %v1893_v12  ;;  %v5297_v56 = vadd.f32 %v1128_v35, %v54_v62  ;;  %v6372_v60 = vmax.f32 %v5182_v30, 1e-30  ;;  %vm1651_vm11 = vcmp.gt.f32.partialorder %v1599_v59, -1e+29  ;;  %v57_v35 = vld [vmem:[#allocation2 + $0x98] sm:$0xff] }
 0x351   :  { %v1482_v21 = vmax.f32 %v1480_v33, %v1481_v29  ;;  %v5302_v2 = vadd.f32 %v3878_v58, %v93_v47  ;;  %v2017_v38 = vrot.slane %v2016_v41, 1  ;;  %v1667_v12 = vsel %vm1651_vm11, %v1599_v59, 0.0 }
 0x352   :  { %v2104_v51 = vmul.f32 %v5279_v34, %v6372_v60  ;;  %v1896_v32 = vrot.slane %v1895_v10, 4  ;;  %v1600_v36 = vsel %vm853_vm1, %v5283_v31, -inf  ;;  %v1719_v62 = vsub.f32 %v5113_v23, %v1667_v12 }
 0x353   :  { %v1720_v30 = vsub.f32 %v5108_v16, %v1667_v12  ;;  %v1721_v0 = vsub.f32 %v5184_v19, %v1667_v12  ;;  %v1722_v33 = vsub.f32 %v5189_v48, %v1667_v12  ;;  %vm1642_vm12 = vcmp.gt.f32.partialorder %v1482_v21, -1e+29 }
 0x354   :  { %v1897_v29 = vadd.f32 %v1896_v32, %v1895_v10  ;;  %v5310_v58 = vadd.f32 %v1318_v40, %v92_v61  ;;  %v5312_v47 = vadd.f32 %v1138_v43, %v56_v28  ;;  %v1831_v60 = vmul.f32 1.442695, %v1719_v62  ;;  %v5328_v43 = vpop.f32.mrf.mxu1 }
 0x355   :  { %v1833_v59 = vmul.f32 1.442695, %v1720_v30  ;;  %v1835_v39 = vmul.f32 1.442695, %v1721_v0  ;;  %v5314_v5 = vadd.f32 %v3824_v3, %v57_v35  ;;  %v1837_v13 = vmul.f32 1.442695, %v1722_v33 }
 0x356   :  { %v1898_v50 = vrot.slane %v1897_v29, 2  ;;  %v1602_v23 = vmax.f32 %v1600_v36, %v1601_v37  ;;  %v1483_v16 = vsel %vm853_vm1, %v5297_v56, -inf  ;;  %v2120_v19 = vsub.f32 2.0, %v2104_v51  ;;  %v1328_v30 = vpop.f32.mrf.mxu1 }
 0x357   :  { %v5318_v11 = vadd.f32 %v2017_v38, %v2016_v41  ;;  %4045 = vpow2.f32 %v1831_v60  ;;  %v1658_v48 = vsel %vm1642_vm12, %v1482_v21, 0.0  ;;  %v1603_v61 = vsel %vm853_vm1, %v5310_v58, -inf }
 0x358   :  { %4047 = vpow2.f32 %v1833_v59  ;;  %v1683_v10 = vsub.f32 %v5162_v15, %v1658_v48  ;;  %v1486_v3 = vsel %vm853_vm1, %v5312_v47, -inf  ;;  %v1684_v37 = vsub.f32 %v5111_v49, %v1658_v48 }
 0x359   :  { %4049 = vpow2.f32 %v1835_v39  ;;  %v1685_v40 = vsub.f32 %v5186_v22, %v1658_v48  ;;  %v1686_v51 = vsub.f32 %v5191_v24, %v1658_v48  ;;  %v1899_v41 = vadd.f32 %v1898_v50, %v1897_v29  ;;  %v3827_v22 = vpop.f32.mrf.mxu0 }
 0x35a   :  { %4051 = vpow2.f32 %v1837_v13  ;;  %v1759_v28 = vmul.f32 1.442695, %v1683_v10  ;;  %v1485_v21 = vmax.f32 %v1483_v16, %v1484_v26  ;;  %v1761_v15 = vmul.f32 1.442695, %v1684_v37  ;;  %v58_v16 = vld [vmem:[#allocation2 + $0xa0] sm:$0xff] }
 0x35b   :  { %v1763_v38 = vmul.f32 1.442695, %v1685_v40  ;;  %v1605_v32 = vsel %vm853_vm1, %v5302_v2, -inf  ;;  %v1604_v12 = vmax.f32 %v1602_v23, %v1603_v61  ;;  %v2136_v39 = vmul.f32 %v5279_v34, %v2120_v19  ;;  %v1148_v19 = vpop.f32.mrf.mxu0 }
 0x35c   :  { %4053 = vpow2.f32 %v1759_v28  ;;  %v1765_v49 = vmul.f32 1.442695, %v1686_v51  ;;  %v1487_v36 = vmax.f32 %v1485_v21, %v1486_v3  ;;  %v6373_v24 = vrot.slane %v5243_v4, 2  ;;  %v94_v51 = vld [vmem:[#allocation2 + $0x1c0] sm:$0xff] }
 0x35d   :  { %v6346_v50 = vmax.f32 %v5318_v11, 1e-30  ;;  %4055 = vpow2.f32 %v1761_v15  ;;  %v1606_v26 = vmax.f32 %v1604_v12, %v1605_v32  ;;  %v2405_v35 = vrot.slane %v5275_v57, 2 }
 0x35e   :  { %v5336_v13 = vadd.f32 %v6373_v24, %v5243_v4  ;;  %v1900_v62 = vrot.slane %v1899_v41, 1  ;;  %4057 = vpow2.f32 %v1763_v38  ;;  %v1488_v34 = vsel %vm853_vm1, %v5314_v5, -inf }
 0x35f   :  { %v2286_v0 = vrot.slane %v5281_v42, 4  ;;  %v2414_v33 = vsel %vm853_vm1, %v5286_v53, 0.0  ;;  %v1607_v29 = vrot.slane %v1606_v26, 4  ;;  %v1489_v4 = vmax.f32 %v1487_v36, %v1488_v34  ;;  %v95_v36 = vld [vmem:[#allocation2 + $0x1c8] sm:$0xff] }
 0x360   :  { %6374 = vst [vmem:[#allocation19_spill] sm:$0xff] %v5336_v13  ;;  %v5346_v60 = vadd.f32 %v2414_v33, %v5293_v45  ;;  %v2155_v59 = vmul.f32 %v5042_v52, %v2136_v39  ;;  %v2156_v23 = vmul.f32 %v5048_v25, %v2136_v39  ;;  %4059 = vpow2.f32 %v1765_v49  ;;  %v6376_v45 = vld [vmem:[#allocation7_spill] sm:$0xff]  ;;  %v2626_v25 = vld [vmem:[%s6324_s4 + $0x38] sm:$0xff] }
 0x361   :  { %v5352_v48 = vadd.f32 %v5093_v44, %v5120_v63  ;;  %v2373_v10 = vsel %vm853_vm1, %v5126_v55, 0.0  ;;  %4061 = vrcp.f32 %v6346_v50  ;;  %v1608_v53 = vmax.f32 %v1606_v26, %v1607_v29  ;;  %v59_v44 = vld [vmem:[#allocation2 + $0xa8] sm:$0xff]  ;;  %v5368_v63 = vpop.f32.mrf.mxu1  ;;  %v96_v33 = vld [vmem:[#allocation2 + $0x1d0] sm:$0xff]  ;;  %3891 = vmatprep.subr.mxu0 %v2626_v25 }
 0x362   :  { %v5360_v61 = vmul.f32 %v6376_v45, %v5063_v27  ;;  %v5363_v52 = vadd.f32 %v2373_v10, %v5262_v18  ;;  %v5366_v3 = vadd.f32 %v1900_v62, %v1899_v41  ;;  %v5371_v55 = vadd.f32 %v2405_v35, %v5275_v57  ;;  %v6379_v57 = vld [vmem:[#allocation11_spill] sm:$0xff]  ;;  %3892 = vmatpush3.msra.mxu0 %v2626_v25 }
 0x363   :  { %6375 = vst [vmem:[#allocation20_spill] sm:$0xff] %v5352_v48  ;;  %v1609_v37 = vrot.slane %v1608_v53, 2  ;;  %v1490_v40 = vrot.slane %v1489_v4, 4  ;;  %v5373_v28 = vadd.f32 %v1148_v19, %v58_v16  ;;  %v5378_v18 = vadd.f32 %v2286_v0, %v5281_v42  ;;  %v6380_v42 = vld [vmem:[#allocation14_spill] sm:$0xff]  ;;  %v1338_v29 = vpop.f32.mrf.mxu1 }
 0x364   :  { %6377 = vst [vmem:[#allocation7_spill] sm:$0xff] %v5360_v61  ;;  %6378 = vst [vmem:[#allocation21_spill] sm:$0xff] %v5363_v52  ;;  %v5375_v27 = vpop.eup %4045  ;;  %v2416_v21 = vrot.slane %v5346_v60, 4  ;;  %v2219_v41 = vmul.f32 %v2155_v59, %v4281_v7  ;;  %v2220_v15 = vmul.f32 %v4279_v6, %v2156_v23  ;;  %v2157_v32 = vmul.f32 %v6379_v57, %v2136_v39  ;;  %v2624_v61 = vld [vmem:[%s6324_s4 + $0x28] sm:$0xff] }
 0x365   :  { %v5383_v38 = vpop.eup %4047  ;;  %v2019_v12 = vsel %vm853_vm1, %v5375_v27, 0.0  ;;  %v1610_v49 = vmax.f32 %v1608_v53, %v1609_v37  ;;  %v5388_v24 = vadd.f32 %v3827_v22, %v59_v44  ;;  %v2158_v35 = vmul.f32 %v6380_v42, %v2136_v39 }
 0x366   :  { %v5390_v26 = vpop.eup %4049  ;;  %v6345_v62 = vmax.f32 %v5366_v3, 1e-30  ;;  %v2020_v34 = vsel %vm853_vm1, %v5383_v38, 0.0  ;;  %v5396_v0 = vadd.f32 %v1328_v30, %v94_v51  ;;  %v1491_v19 = vmax.f32 %v1489_v4, %v1490_v40 }
 0x367   :  { %v5398_v59 = vpop.eup %4051  ;;  %v2021_v23 = vadd.f32 %v2020_v34, %v2019_v12  ;;  %v1611_v16 = vrot.slane %v1610_v49, 1  ;;  %v1496_v22 = vsel %vm853_vm1, %v5373_v28, -inf  ;;  %v2292_v10 = vsel %vm853_vm1, %v2219_v41, 0.0  ;;  %v97_v34 = vld [vmem:[#allocation2 + $0x1d8] sm:$0xff] }
 0x368   :  { %6381 = vst [vmem:[#allocation11_spill] sm:$0xff] %v5398_v59  ;;  %v2293_v39 = vsel %vm853_vm1, %v2220_v15, 0.0  ;;  %v2022_v53 = vsel %vm853_vm1, %v5390_v26, 0.0  ;;  %v5407_v30 = vadd.f32 %v5328_v43, %v95_v36  ;;  %v1497_v4 = vsel %vm853_vm1, %v5388_v24, -inf }
 0x369   :  { %v5409_v45 = vpop.eup %4053  ;;  %v2023_v44 = vadd.f32 %v2022_v53, %v2021_v23  ;;  %v1612_v37 = vmax.f32 %v1610_v49, %v1611_v16  ;;  %v5413_v40 = vadd.f32 %v1338_v29, %v96_v33  ;;  %4063 = vrcp.f32 %v6345_v62  ;;  %v5429_v33 = vpop.f32.mrf.mxu1 }
 0x36a   :  { %v5415_v51 = vpop.eup %4055  ;;  %v2024_v41 = vsel %vm853_vm1, %v5398_v59, 0.0  ;;  %v1613_v43 = vsel %vm853_vm1, %v5396_v0, -inf  ;;  %v1498_v15 = vmax.f32 %v1496_v22, %v1497_v4  ;;  %v1902_v49 = vsel %vm853_vm1, %v5409_v45, 0.0 }
 0x36b   :  { %v5423_v57 = vpop.eup %4057  ;;  %v2025_v12 = vadd.f32 %v2024_v41, %v2023_v44  ;;  %v1903_v36 = vsel %vm853_vm1, %v5415_v51, 0.0  ;;  %v1492_v42 = vrot.slane %v1491_v19, 2  ;;  %v5432_v29 = vadd.f32 %v2416_v21, %v5346_v60  ;;  %v2625_v60 = vld [vmem:[%s6324_s4 + $0x30] sm:$0xff]  ;;  %v1348_v48 = vpop.f32.mrf.mxu1 }
 0x36c   :  { %v2221_v23 = vmul.f32 %v2157_v32, %v4287_v9  ;;  %v2294_v16 = vadd.f32 %v2293_v39, %v2292_v10  ;;  %v1614_v22 = vsel %vm853_vm1, %v5407_v30, -inf  ;;  %v1904_v4 = vadd.f32 %v1903_v36, %v1902_v49  ;;  %v6382_v49 = vld [vmem:[#allocation13_spill] sm:$0xff]  ;;  %3893 = vmatprep.subr.mxu0 %v2625_v60 }
 0x36d   :  { %v5437_v53 = vpop.eup %4059  ;;  %v2026_v44 = vrot.slane %v2025_v12, 4  ;;  %vm1652_vm13 = vcmp.gt.f32.partialorder %v1612_v37, -1e+29  ;;  %v1616_v41 = vsel %vm853_vm1, %v5413_v40, -inf  ;;  %v1905_v32 = vsel %vm853_vm1, %v5423_v57, 0.0  ;;  %3894 = vmatpush3.msra.mxu0 %v2625_v60 }
 0x36e   :  { %v5447_v21 = vpop.eup %4061  ;;  %v1615_v10 = vmax.f32 %v1613_v43, %v1614_v22  ;;  %v5452_v39 = vadd.f32 %v5368_v63, %v97_v34  ;;  %v1500_v36 = vmax.f32 %v1498_v15, %v6382_v49  ;;  %v2222_v62 = vmul.f32 %v4285_v8, %v2158_v35  ;;  %v2623_v34 = vld [vmem:[%s6324_s4 + $0x20] sm:$0xff]  ;;  %3895 = vmatprep.subr.mxu0 %v2624_v61 }
 0x36f   :  { %v2027_v50 = vadd.f32 %v2026_v44, %v2025_v12  ;;  %v1906_v13 = vadd.f32 %v1905_v32, %v1904_v4  ;;  %v1493_v52 = vmax.f32 %v1491_v19, %v1492_v42  ;;  %v2295_v59 = vsel %vm853_vm1, %v2221_v23, 0.0  ;;  %3896 = vmatpush3.msra.mxu0 %v2624_v61  ;;  %v2621_v61 = vld [vmem:[%s6324_s4 + $0x10] sm:$0xff] }
 0x370   :  { %v1907_v63 = vsel %vm853_vm1, %v5437_v53, 0.0  ;;  %v5463_v43 = vsel %vm1652_vm13, %v1612_v37, 0.0  ;;  %v1617_v15 = vmax.f32 %v1615_v10, %v1616_v41  ;;  %v2296_v35 = vadd.f32 %v2295_v59, %v2294_v16  ;;  %v6384_v16 = vld [vmem:[#allocation12_spill] sm:$0xff]  ;;  %v3890_v41 = vpop.f32.mrf.mxu1  ;;  %3897 = vmatprep.subr.mxu0 %v2623_v34 }
 0x371   :  { %v6383_v12 = vmax.f32 %v5318_v11, 1e-30  ;;  %v2028_v25 = vrot.slane %v2027_v50, 2  ;;  %v1908_v42 = vadd.f32 %v1907_v63, %v1906_v13  ;;  %v1723_v23 = vsub.f32 %v5283_v31, %v5463_v43  ;;  %v2622_v31 = vld [vmem:[%s6324_s4 + $0x18] sm:$0xff]  ;;  %3898 = vmatpush3.msra.mxu0 %v2623_v34 }
 0x372   :  { %v1724_v37 = vsub.f32 %v5268_v46, %v5463_v43  ;;  %v1618_v59 = vsel %vm853_vm1, %v5452_v39, -inf  ;;  %v1502_v11 = vmax.f32 %v1500_v36, %v6384_v16  ;;  %v1725_v13 = vsub.f32 %v5310_v58, %v5463_v43  ;;  %3899 = vmatprep.subr.mxu0 %v2622_v31  ;;  %v100_v16 = vld [vmem:[#allocation2 + $0x1f0] sm:$0xff] }
 0x373   :  { %v2114_v19 = vmul.f32 %v5447_v21, %v6383_v12  ;;  %v2029_v22 = vadd.f32 %v2028_v25, %v2027_v50  ;;  %v1909_v44 = vrot.slane %v1908_v42, 4  ;;  %v1494_v4 = vrot.slane %v1493_v52, 1  ;;  %v99_v25 = vld [vmem:[#allocation2 + $0x1e8] sm:$0xff]  ;;  %3900 = vmatpush3.msra.mxu0 %v2622_v31 }
 0x374   :  { %v2297_v46 = vsel %vm853_vm1, %v2222_v62, 0.0  ;;  %v1839_v60 = vmul.f32 1.442695, %v1723_v23  ;;  %v1841_v32 = vmul.f32 1.442695, %v1724_v37  ;;  %v1619_v10 = vmax.f32 %v1617_v15, %v1618_v59  ;;  %v98_v23 = vld [vmem:[#allocation2 + $0x1e0] sm:$0xff]  ;;  %3901 = vmatprep.subr.mxu0 %v2621_v61 }
 0x375   :  { %v5486_v36 = vadd.f32 %v2297_v46, %v2296_v35  ;;  %v2130_v58 = vsub.f32 2.0, %v2114_v19  ;;  %v2030_v63 = vrot.slane %v2029_v22, 1  ;;  %v1910_v12 = vadd.f32 %v1909_v44, %v1908_v42  ;;  %v101_v15 = vld [vmem:[#allocation2 + $0x1f8] sm:$0xff]  ;;  %v1358_v46 = vpop.f32.mrf.mxu1  ;;  %v2620_v42 = vld [vmem:[%s6324_s4 + $0x8] sm:$0xff]  ;;  %3902 = vmatpush3.msra.mxu0 %v2621_v61 }
 0x376   :  { %4065 = vpow2.f32 %v1839_v60  ;;  %v1503_v62 = vrot.slane %v1502_v11, 4  ;;  %v5491_v37 = vpop.eup %4063  ;;  %v1726_v35 = vsub.f32 %v5302_v2, %v5463_v43  ;;  %v1843_v19 = vmul.f32 1.442695, %v1725_v13  ;;  %v2619_v43 = vld [vmem:[%s6324_s4] sm:$0xff]  ;;  %3903 = vmatprep.subr.mxu0 %v2620_v42 }
 0x377   :  { %v1495_v34 = vmax.f32 %v1493_v52, %v1494_v4  ;;  %v5499_v44 = vadd.f32 %v2030_v63, %v2029_v22  ;;  %v1911_v60 = vrot.slane %v1910_v12, 2  ;;  %4067 = vpow2.f32 %v1841_v32  ;;  %3904 = vmatpush3.msra.mxu0 %v2620_v42 }
 0x378   :  { %v1620_v49 = vrot.slane %v1619_v10, 4  ;;  %v2299_v50 = vrot.slane %v5486_v36, 4  ;;  %v5503_v59 = vadd.f32 %v5429_v33, %v99_v25  ;;  %v5505_v2 = vadd.f32 %v1348_v48, %v98_v23  ;;  %3905 = vmatprep.subr.mxu0 %v2619_v43 }
 0x379   :  { %v5507_v52 = vadd.f32 %v3890_v41, %v101_v15  ;;  %v2146_v22 = vmul.f32 %v5447_v21, %v2130_v58  ;;  %v1912_v13 = vadd.f32 %v1911_v60, %v1910_v12  ;;  %v1504_v4 = vmax.f32 %v1502_v11, %v1503_v62  ;;  %3906 = vmatpush3.msra.mxu0 %v2619_v43 }
 0x37a   :  { %v5513_v31 = vadd.f32 %v1358_v46, %v100_v16  ;;  %v6385_v32 = vmax.f32 %v5366_v3, 1e-30  ;;  %4069 = vpow2.f32 %v1843_v19  ;;  %v1845_v48 = vmul.f32 1.442695, %v1726_v35 }
 0x37b   :  { %vm1643_vm14 = vcmp.gt.f32.partialorder %v1495_v34, -1e+29  ;;  %v2083_v41 = vmax.f32 %v5499_v44, 1e-30  ;;  %v1913_v61 = vrot.slane %v1912_v13, 1  ;;  %v1621_v25 = vmax.f32 %v1619_v10, %v1620_v49 }
 0x37c   :  { %v2105_v33 = vmul.f32 %v5491_v37, %v6385_v32  ;;  %v1659_v63 = vsel %vm1643_vm14, %v1495_v34, 0.0  ;;  %4071 = vpow2.f32 %v1845_v48  ;;  %v2195_v3 = vmul.f32 %v5203_v54, %v2146_v22 }
 0x37d   :  { %v1687_v21 = vsub.f32 %v5297_v56, %v1659_v63  ;;  %v1688_v11 = vsub.f32 %v5273_v17, %v1659_v63  ;;  %v1689_v58 = vsub.f32 %v5312_v47, %v1659_v63  ;;  %v5523_v12 = vadd.f32 %v1913_v61, %v1912_v13 }
 0x37e   :  { %v1505_v62 = vrot.slane %v1504_v4, 2  ;;  %v1626_v23 = vsel %vm853_vm1, %v5505_v2, -inf  ;;  %v2121_v15 = vsub.f32 2.0, %v2105_v33  ;;  %v1690_v10 = vsub.f32 %v5314_v5, %v1659_v63 }
 0x37f   :  { %v1767_v49 = vmul.f32 1.442695, %v1687_v21  ;;  %v1769_v35 = vmul.f32 1.442695, %v1688_v11  ;;  %4073 = vrcp.f32 %v2083_v41  ;;  %v2074_v17 = vmax.f32 %v5523_v12, 1e-30 }
 0x380   :  { %v1771_v56 = vmul.f32 1.442695, %v1689_v58  ;;  %v1506_v47 = vmax.f32 %v1504_v4, %v1505_v62  ;;  %v2196_v54 = vmul.f32 %v5211_v20, %v2146_v22  ;;  %v2197_v19 = vmul.f32 %v5215_v14, %v2146_v22 }
 0x381   :  { %4075 = vpow2.f32 %v1767_v49  ;;  %v1622_v34 = vrot.slane %v1621_v25, 2  ;;  %v2198_v16 = vmul.f32 %v5227_v1, %v2146_v22  ;;  %v1627_v46 = vsel %vm853_vm1, %v5503_v59, -inf }
 0x382   :  { %4077 = vrcp.f32 %v2074_v17  ;;  %v1507_v5 = vrot.slane %v1506_v47, 1  ;;  %v1773_v60 = vmul.f32 1.442695, %v1690_v10  ;;  %v1628_v13 = vmax.f32 %v1626_v23, %v1627_v46  ;;  %v6387_v10 = vld [vmem:[#allocation10_spill] sm:$0xff] }
 0x383   :  { %v5538_v42 = vpop.eup %4065  ;;  %4079 = vpow2.f32 %v1769_v35  ;;  %v1623_v43 = vmax.f32 %v1621_v25, %v1622_v34  ;;  %v2137_v20 = vmul.f32 %v5491_v37, %v2121_v15  ;;  %v2259_v4 = vmul.f32 %v2195_v3, %v4281_v7  ;;  %v6386_v3 = vld [vmem:[#allocation16_spill] sm:$0xff]  ;;  %v6388_v35 = vld [vmem:[#allocation17_spill] sm:$0xff] }
 0x384   :  { %v2032_v14 = vsel %vm853_vm1, %v5538_v42, 0.0  ;;  %4081 = vpow2.f32 %v1771_v56  ;;  %v1508_v1 = vmax.f32 %v1506_v47, %v1507_v5  ;;  %v5543_v22 = vpop.eup %4067  ;;  %v2260_v32 = vmul.f32 %v4279_v6, %v2196_v54  ;;  %v6389_v54 = vld [vmem:[#allocation9_spill] sm:$0xff] }
 0x385   :  { %v5548_v33 = vmul.f32 %v2197_v19, %v4287_v9  ;;  %v1624_v48 = vrot.slane %v1623_v43, 1  ;;  %v5551_v61 = vmul.f32 %v4285_v8, %v2198_v16  ;;  %v2033_v37 = vsel %vm853_vm1, %v5543_v22, 0.0 }
 0x386   :  { %vm1644_vm15 = vcmp.gt.f32.partialorder %v1508_v1, -1e+29  ;;  %v1629_v63 = vsel %vm853_vm1, %v5513_v31, -inf  ;;  %v2034_v25 = vadd.f32 %v2033_v37, %v2032_v14  ;;  %4083 = vpow2.f32 %v1773_v60 }
 0x387   :  { %v1660_v21 = vsel %vm1644_vm15, %v1508_v1, 0.0  ;;  %v1625_v11 = vmax.f32 %v1623_v43, %v1624_v48  ;;  %v5557_v58 = vpop.eup %4069  ;;  %v2159_v62 = vmul.f32 %v6386_v3, %v2137_v20  ;;  %v2160_v56 = vmul.f32 %v6388_v35, %v2137_v20  ;;  %v6390_v43 = vld [vmem:[#allocation18_spill] sm:$0xff]  ;;  %v6391_v35 = vld [vmem:[#allocation8_spill] sm:$0xff] }
 0x388   :  { %v1691_v23 = vsub.f32 %v5373_v28, %v1660_v21  ;;  %v1692_v15 = vsub.f32 %v5388_v24, %v1660_v21  ;;  %v1693_v49 = vsub.f32 %v6387_v10, %v1660_v21  ;;  %v2035_v47 = vsel %vm853_vm1, %v5557_v58, 0.0 }
 0x389   :  { %v1694_v19 = vsub.f32 %v6389_v54, %v1660_v21  ;;  %vm1653_vm0 = vcmp.gt.f32.partialorder %v1625_v11, -1e+29  ;;  %v5567_v34 = vpop.eup %4071  ;;  %v2036_v16 = vadd.f32 %v2035_v47, %v2034_v25  ;;  %v1630_v60 = vmax.f32 %v1628_v13, %v1629_v63 }
 0x38a   :  { %v1775_v5 = vmul.f32 1.442695, %v1691_v23  ;;  %v1777_v46 = vmul.f32 1.442695, %v1692_v15  ;;  %v2161_v28 = vmul.f32 %v6390_v43, %v2137_v20  ;;  %v2037_v24 = vsel %vm853_vm1, %v5567_v34, 0.0 }
 0x38b   :  { %v1779_v14 = vmul.f32 1.442695, %v1693_v49  ;;  %v5572_v1 = vsel %vm1653_vm0, %v1625_v11, 0.0  ;;  %v2223_v48 = vmul.f32 %v2159_v62, %v4281_v7  ;;  %v2038_v37 = vadd.f32 %v2037_v24, %v2036_v16 }
 0x38c   :  { %4085 = vpow2.f32 %v1775_v5  ;;  %v1727_v21 = vsub.f32 %v5396_v0, %v5572_v1  ;;  %v4074_v3 = vpop.eup %4073  ;;  %v2422_v25 = vsel %vm853_vm1, %v2259_v4, 0.0  ;;  %v1781_v13 = vmul.f32 1.442695, %v1694_v19 }
 0x38d   :  { %4087 = vpow2.f32 %v1777_v46  ;;  %v1631_v63 = vsel %vm853_vm1, %v5507_v52, -inf  ;;  %v2224_v11 = vmul.f32 %v4279_v6, %v2160_v56  ;;  %v2039_v15 = vrot.slane %v2038_v37, 4 }
 0x38e   :  { %v5580_v23 = vpop.eup %4075  ;;  %v1728_v62 = vsub.f32 %v5407_v30, %v5572_v1  ;;  %v1632_v10 = vmax.f32 %v1630_v60, %v1631_v63  ;;  %v2423_v0 = vsel %vm853_vm1, %v2260_v32, 0.0  ;;  %v2162_v47 = vmul.f32 %v6391_v35, %v2137_v20 }
 0x38f   :  { %v4078_v49 = vpop.eup %4077  ;;  %4089 = vpow2.f32 %v1779_v14  ;;  %v1847_v4 = vmul.f32 1.442695, %v1727_v21  ;;  %v2225_v19 = vmul.f32 %v2161_v28, %v4287_v9  ;;  %v2305_v16 = vsel %vm853_vm1, %v2223_v48, 0.0 }
 0x390   :  { %v5587_v54 = vpop.eup %4079  ;;  %v1915_v56 = vsel %vm853_vm1, %v5580_v23, 0.0  ;;  %v1729_v30 = vsub.f32 %v5413_v40, %v5572_v1  ;;  %v2106_v32 = vmul.f32 %v4078_v49, %v2074_v17  ;;  %v2040_v20 = vadd.f32 %v2039_v15, %v2038_v37 }
 0x391   :  { %v5595_v5 = vpop.eup %4081  ;;  %v1916_v46 = vsel %vm853_vm1, %v5587_v54, 0.0  ;;  %4091 = vpow2.f32 %v1781_v13  ;;  %v2306_v60 = vsel %vm853_vm1, %v2224_v11, 0.0  ;;  %v2115_v43 = vmul.f32 %v4074_v3, %v2083_v41 }
 0x392   :  { %v1849_v28 = vmul.f32 1.442695, %v1728_v62  ;;  %v1633_v24 = vrot.slane %v1632_v10, 4  ;;  %v2122_v14 = vsub.f32 2.0, %v2106_v32  ;;  %v2041_v48 = vrot.slane %v2040_v20, 2 }
 0x393   :  { %v1917_v40 = vadd.f32 %v1916_v46, %v1915_v56  ;;  %4093 = vpow2.f32 %v1847_v4  ;;  %v5604_v21 = vpop.eup %4083  ;;  %v2424_v12 = vadd.f32 %v2423_v0, %v2422_v25  ;;  %v2425_v17 = vsel %vm853_vm1, %v5548_v33, 0.0 }
 0x394   :  { %v1918_v37 = vsel %vm853_vm1, %v5595_v5, 0.0  ;;  %v1851_v13 = vmul.f32 1.442695, %v1729_v30  ;;  %v2307_v63 = vadd.f32 %v2306_v60, %v2305_v16  ;;  %v2138_v11 = vmul.f32 %v4078_v49, %v2122_v14 }
 0x395   :  { %v2042_v44 = vadd.f32 %v2041_v48, %v2040_v20  ;;  %v1919_v41 = vadd.f32 %v1918_v37, %v1917_v40  ;;  %v2226_v15 = vmul.f32 %v4285_v8, %v2162_v47  ;;  %v2308_v62 = vsel %vm853_vm1, %v2225_v19, 0.0 }
 0x396   :  { %v2131_v35 = vsub.f32 2.0, %v2115_v43  ;;  %4095 = vpow2.f32 %v1849_v28  ;;  %v2163_v4 = vmul.f32 %v5409_v45, %v2138_v11  ;;  %v1920_v25 = vsel %vm853_vm1, %v5604_v21, 0.0 }
 0x397   :  { %v1730_v33 = vsub.f32 %v5452_v39, %v5572_v1  ;;  %v1634_v0 = vmax.f32 %v1632_v10, %v1633_v24  ;;  %v2164_v16 = vmul.f32 %v5415_v51, %v2138_v11  ;;  %v2043_v49 = vrot.slane %v2042_v44, 1 }
 0x398   :  { %v1921_v56 = vadd.f32 %v1920_v25, %v1919_v41  ;;  %4097 = vpow2.f32 %v1851_v13  ;;  %v6392_v47 = vrot.slane %v5432_v29, 2  ;;  %v5628_v45 = vadd.f32 %v2299_v50, %v5486_v36 }
 0x399   :  { %v5618_v30 = vpop.eup %4085  ;;  %v2426_v32 = vadd.f32 %v2425_v17, %v2424_v12  ;;  %v2309_v39 = vadd.f32 %v2308_v62, %v2307_v63  ;;  %v2427_v51 = vsel %vm853_vm1, %v5551_v61, 0.0  ;;  %v5634_v10 = vmul.f32 %v4074_v3, %v2131_v35 }
 0x39a   :  { %v5623_v19 = vadd.f32 %v6392_v47, %v5432_v29  ;;  %v5630_v1 = vpop.eup %4087  ;;  %v5636_v20 = vadd.f32 %v2043_v49, %v2042_v44  ;;  %v1922_v46 = vrot.slane %v1921_v56, 4  ;;  %v2310_v29 = vsel %vm853_vm1, %v2226_v15, 0.0 }
 0x39b   :  { %v1928_v60 = vsel %vm853_vm1, %v5618_v30, 0.0  ;;  %v1853_v43 = vmul.f32 1.442695, %v1730_v33  ;;  %v1635_v50 = vrot.slane %v1634_v0, 2  ;;  %v2227_v28 = vmul.f32 %v2163_v4, %v4281_v7 }
 0x39c   :  { %v5641_v36 = vpop.eup %4089  ;;  %v2228_v24 = vmul.f32 %v4279_v6, %v2164_v16  ;;  %v2084_v61 = vmax.f32 %v5636_v20, 1e-30  ;;  %v1923_v3 = vadd.f32 %v1922_v46, %v1921_v56  ;;  %v5646_v14 = vadd.f32 %v2427_v51, %v2426_v32 }
 0x39d   :  { %v5648_v48 = vadd.f32 %v2310_v29, %v2309_v39  ;;  %v2165_v40 = vmul.f32 %v5423_v57, %v2138_v11  ;;  %v1929_v12 = vsel %vm853_vm1, %v5630_v1, 0.0  ;;  %v2199_v37 = vmul.f32 %v5375_v27, %v5634_v10 }
 0x39e   :  { %v5653_v17 = vpop.eup %4091  ;;  %4099 = vrcp.f32 %v2084_v61  ;;  %v1924_v13 = vrot.slane %v1923_v3, 2  ;;  %v1930_v63 = vadd.f32 %v1929_v12, %v1928_v60  ;;  %v2200_v44 = vmul.f32 %v5383_v38, %v5634_v10 }
 0x39f   :  { %v1931_v41 = vsel %vm853_vm1, %v5641_v36, 0.0  ;;  %4101 = vpow2.f32 %v1853_v43  ;;  %v1636_v57 = vmax.f32 %v1634_v0, %v1635_v50  ;;  %v2318_v62 = vsel %vm853_vm1, %v2227_v28, 0.0 }
 0x3a0   :  { %v5663_v15 = vpop.eup %4093  ;;  %v2319_v35 = vsel %vm853_vm1, %v2228_v24, 0.0  ;;  %v1925_v27 = vadd.f32 %v1924_v13, %v1923_v3  ;;  %v1932_v4 = vadd.f32 %v1931_v41, %v1930_v63  ;;  %v2166_v25 = vmul.f32 %v5437_v53, %v2138_v11 }
 0x3a1   :  { %v2229_v33 = vmul.f32 %v2165_v40, %v4287_v9  ;;  %v1933_v38 = vsel %vm853_vm1, %v5653_v17, 0.0  ;;  %v1637_v16 = vrot.slane %v1636_v57, 1  ;;  %v2429_v49 = vrot.slane %v5646_v14, 4 }
 0x3a2   :  { %v2312_v0 = vrot.slane %v5648_v48, 4  ;;  %v1926_v56 = vrot.slane %v1925_v27, 1  ;;  %v1934_v47 = vadd.f32 %v1933_v38, %v1932_v4  ;;  %v2201_v39 = vmul.f32 %v5390_v26, %v5634_v10 }
 0x3a3   :  { %v5673_v32 = vpop.eup %4095  ;;  %v2320_v51 = vadd.f32 %v2319_v35, %v2318_v62  ;;  %v2045_v53 = vsel %vm853_vm1, %v5663_v15, 0.0  ;;  %v1638_v11 = vmax.f32 %v1636_v57, %v1637_v16  ;;  %v2263_v46 = vmul.f32 %v2199_v37, %v4281_v7 }
 0x3a4   :  { %v5680_v29 = vadd.f32 %v1926_v56, %v1925_v27  ;;  %v1935_v60 = vrot.slane %v1934_v47, 4  ;;  %v2046_v43 = vsel %vm853_vm1, %v5673_v32, 0.0  ;;  %v2264_v28 = vmul.f32 %v4279_v6, %v2200_v44 }
 0x3a5   :  { %v5684_v50 = vpop.eup %4097  ;;  %v2230_v24 = vmul.f32 %v4285_v8, %v2166_v25  ;;  %v2321_v26 = vsel %vm853_vm1, %v2229_v33, 0.0  ;;  %vm1654_vm2 = vcmp.gt.f32.partialorder %v1638_v11, -1e+29  ;;  %v2047_v12 = vadd.f32 %v2046_v43, %v2045_v53  ;;  %v6393_v33 = vld [vmem:[#allocation15_spill] sm:$0xff] }
 0x3a6   :  { %v2075_v3 = vmax.f32 %v5680_v29, 1e-30  ;;  %v1936_v40 = vadd.f32 %v1935_v60, %v1934_v47  ;;  %v1670_v37 = vsel %vm1654_vm2, %v1638_v11, 0.0  ;;  %v2322_v13 = vadd.f32 %v2321_v26, %v2320_v51 }
 0x3a7   :  { %v1731_v63 = vsub.f32 %v5505_v2, %v1670_v37  ;;  %v1732_v41 = vsub.f32 %v5503_v59, %v1670_v37  ;;  %v1733_v57 = vsub.f32 %v5513_v31, %v1670_v37  ;;  %v2048_v62 = vsel %vm853_vm1, %v5684_v50, 0.0 }
 0x3a8   :  { %4103 = vrcp.f32 %v2075_v3  ;;  %v1937_v44 = vrot.slane %v1936_v40, 2  ;;  %v1734_v35 = vsub.f32 %v5507_v52, %v1670_v37  ;;  %v2242_v38 = vmul.f32 %v4285_v8, %v6393_v33  ;;  %v6395_v37 = vld [vmem:[#allocation7_spill] sm:$0xff] }
 0x3a9   :  { %v1855_v27 = vmul.f32 1.442695, %v1731_v63  ;;  %v1857_v4 = vmul.f32 1.442695, %v1732_v41  ;;  %v1859_v25 = vmul.f32 1.442695, %v1733_v57  ;;  %v2049_v16 = vadd.f32 %v2048_v62, %v2047_v12 }
 0x3aa   :  { %v2435_v2 = vsel %vm853_vm1, %v2263_v46, 0.0  ;;  %v2436_v59 = vsel %vm853_vm1, %v2264_v28, 0.0  ;;  %v1938_v31 = vadd.f32 %v1937_v44, %v1936_v40  ;;  %v2265_v47 = vmul.f32 %v2201_v39, %v4287_v9  ;;  %v6394_v46 = vld [vmem:[#allocation11_spill] sm:$0xff] }
 0x3ab   :  { %v4100_v56 = vpop.eup %4099  ;;  %v2323_v51 = vsel %vm853_vm1, %v2230_v24, 0.0  ;;  %4105 = vpow2.f32 %v1855_v27  ;;  %v1861_v53 = vmul.f32 1.442695, %v1734_v35  ;;  %v2202_v28 = vmul.f32 %v6394_v46, %v5634_v10 }
 0x3ac   :  { %v5704_v52 = vpop.eup %4101  ;;  %v2324_v11 = vadd.f32 %v2323_v51, %v2322_v13  ;;  %v2116_v60 = vmul.f32 %v4100_v56, %v2084_v61  ;;  %v1939_v43 = vrot.slane %v1938_v31, 1  ;;  %4107 = vpow2.f32 %v1857_v4 }
 0x3ad   :  { %v2437_v26 = vadd.f32 %v2436_v59, %v2435_v2  ;;  %v2050_v40 = vsel %vm853_vm1, %v5704_v52, 0.0  ;;  %4109 = vpow2.f32 %v1859_v25  ;;  %v2246_v13 = vmul.f32 %v4285_v8, %v6395_v37  ;;  %v6396_v25 = vld [vmem:[#allocation20_spill] sm:$0xff] }
 0x3ae   :  { %v2132_v39 = vsub.f32 2.0, %v2116_v60  ;;  %v5712_v24 = vadd.f32 %v1939_v43, %v1938_v31  ;;  %v2051_v12 = vadd.f32 %v2050_v40, %v2049_v16  ;;  %v2301_v20 = vrot.slane %v5628_v45, 2 }
 0x3af   :  { %v5718_v61 = vadd.f32 %v2429_v49, %v5646_v14  ;;  %v2438_v63 = vsel %vm853_vm1, %v2265_v47, 0.0  ;;  %4111 = vpow2.f32 %v1861_v53  ;;  %v2325_v10 = vrot.slane %v2324_v11, 4 }
 0x3b0   :  { %v2148_v41 = vmul.f32 %v4100_v56, %v2132_v39  ;;  %v2076_v57 = vmax.f32 %v5712_v24, 1e-30  ;;  %v2052_v44 = vrot.slane %v2051_v12, 4  ;;  %v2313_v62 = vadd.f32 %v2312_v0, %v5648_v48  ;;  %v6397_v48 = vld [vmem:[#allocation21_spill] sm:$0xff] }
 0x3b1   :  { %v2266_v35 = vmul.f32 %v4285_v8, %v2202_v28  ;;  %v2439_v27 = vadd.f32 %v2438_v63, %v2437_v26  ;;  %v2362_v4 = vsel %vm853_vm1, %v2242_v38, 0.0  ;;  %v2375_v2 = vsel %vm853_vm1, %v2246_v13, 0.0 }
 0x3b2   :  { %v2203_v14 = vmul.f32 %v5538_v42, %v2148_v41  ;;  %v2204_v49 = vmul.f32 %v5543_v22, %v2148_v41  ;;  %v2363_v33 = vadd.f32 %v2362_v4, %v6396_v25  ;;  %v2420_v59 = vrot.slane %v5623_v19, 1 }
 0x3b3   :  { %4113 = vrcp.f32 %v2076_v57  ;;  %v2053_v31 = vadd.f32 %v2052_v44, %v2051_v12  ;;  %v2376_v0 = vadd.f32 %v2375_v2, %v6397_v48  ;;  %v2326_v16 = vadd.f32 %v2325_v10, %v2324_v11 }
 0x3b4   :  { %v2205_v56 = vmul.f32 %v5557_v58, %v2148_v41  ;;  %v2267_v38 = vmul.f32 %v2203_v14, %v4281_v7  ;;  %v2268_v42 = vmul.f32 %v4279_v6, %v2204_v49  ;;  %v5739_v47 = vadd.f32 %v2301_v20, %v5628_v45 }
 0x3b5   :  { %v4104_v22 = vpop.eup %4103  ;;  %v2440_v51 = vsel %vm853_vm1, %v2266_v35, 0.0  ;;  %v2054_v53 = vrot.slane %v2053_v31, 2  ;;  %v6398_v60 = vrot.slane %v5378_v18, 2  ;;  %v2431_v46 = vrot.slane %v5718_v61, 2 }
 0x3b6   :  { %v2314_v11 = vrot.slane %v2313_v62, 2  ;;  %v2441_v28 = vadd.f32 %v2440_v51, %v2439_v27  ;;  %v2364_v58 = vrot.slane %v2363_v33, 4  ;;  %v2448_v26 = vsel %vm853_vm1, %v2267_v38, 0.0 }
 0x3b7   :  { %v2289_v43 = vadd.f32 %v6398_v60, %v5378_v18  ;;  %v2449_v40 = vsel %vm853_vm1, %v2268_v42, 0.0  ;;  %v2107_v45 = vmul.f32 %v4104_v22, %v2075_v3  ;;  %v2055_v39 = vadd.f32 %v2054_v53, %v2053_v31 }
 0x3b8   :  { %v5750_v12 = vpop.eup %4105  ;;  %v2206_v37 = vmul.f32 %v5567_v34, %v2148_v41  ;;  %v2269_v13 = vmul.f32 %v2205_v56, %v4287_v9  ;;  %v2327_v18 = vrot.slane %v2326_v16, 2  ;;  %v2377_v20 = vrot.slane %v2376_v0, 4 }
 0x3b9   :  { %v5754_v63 = vpop.eup %4107  ;;  %v2123_v10 = vsub.f32 2.0, %v2107_v45  ;;  %v2056_v44 = vrot.slane %v2055_v39, 1  ;;  %v2058_v35 = vsel %vm853_vm1, %v5750_v12, 0.0  ;;  %v2290_v27 = vrot.slane %v2289_v43, 1 }
 0x3ba   :  { %v5758_v4 = vpop.eup %4109  ;;  %v2442_v29 = vrot.slane %v2441_v28, 4  ;;  %v2450_v3 = vadd.f32 %v2449_v40, %v2448_v26  ;;  %v2059_v14 = vsel %vm853_vm1, %v5754_v63, 0.0  ;;  %v2315_v34 = vadd.f32 %v2314_v11, %v2313_v62 }
 0x3bb   :  { %v2139_v41 = vmul.f32 %v4104_v22, %v2123_v10  ;;  %v5762_v49 = vadd.f32 %v2056_v44, %v2055_v39  ;;  %v2060_v25 = vadd.f32 %v2059_v14, %v2058_v35  ;;  %v2365_v2 = vadd.f32 %v2364_v58, %v2363_v33 }
 0x3bc   :  { %v5764_v31 = vpop.eup %4111  ;;  %v2270_v48 = vmul.f32 %v4285_v8, %v2206_v37  ;;  %v2451_v56 = vsel %vm853_vm1, %v2269_v13, 0.0  ;;  %v2328_v38 = vadd.f32 %v2327_v18, %v2326_v16  ;;  %v2378_v42 = vadd.f32 %v2377_v20, %v2376_v0 }
 0x3bd   :  { %v2167_v51 = vmul.f32 %v5580_v23, %v2139_v41  ;;  %v2168_v53 = vmul.f32 %v5587_v54, %v2139_v41  ;;  %v2169_v60 = vmul.f32 %v5595_v5, %v2139_v41  ;;  %v2061_v62 = vsel %vm853_vm1, %v5758_v4, 0.0 }
 0x3be   :  { %v2452_v22 = vadd.f32 %v2451_v56, %v2450_v3  ;;  %v2170_v33 = vmul.f32 %v5604_v21, %v2139_v41  ;;  %v2085_v11 = vmax.f32 %v5762_v49, 1e-30  ;;  %v2062_v58 = vadd.f32 %v2061_v62, %v2060_v25 }
 0x3bf   :  { %v2231_v26 = vmul.f32 %v2167_v51, %v4281_v7  ;;  %v2232_v16 = vmul.f32 %v4279_v6, %v2168_v53  ;;  %v2233_v0 = vmul.f32 %v2169_v60, %v4287_v9  ;;  %v2063_v23 = vsel %vm853_vm1, %v5764_v31, 0.0 }
 0x3c0   :  { %v4114_v54 = vpop.eup %4113  ;;  %v2453_v5 = vsel %vm853_vm1, %v2270_v48, 0.0  ;;  %4115 = vrcp.f32 %v2085_v11  ;;  %v2064_v40 = vadd.f32 %v2063_v23, %v2062_v58  ;;  %v2366_v21 = vrot.slane %v2365_v2, 2 }
 0x3c1   :  { %v2234_v45 = vmul.f32 %v4285_v8, %v2170_v33  ;;  %v2331_v39 = vsel %vm853_vm1, %v2231_v26, 0.0  ;;  %v2332_v37 = vsel %vm853_vm1, %v2232_v16, 0.0  ;;  %v2108_v13 = vmul.f32 %v4114_v54, %v2076_v57 }
 0x3c2   :  { %v2454_v18 = vadd.f32 %v2453_v5, %v2452_v22  ;;  %v2333_v20 = vadd.f32 %v2332_v37, %v2331_v39  ;;  %v2065_v10 = vrot.slane %v2064_v40, 4  ;;  %v2379_v44 = vrot.slane %v2378_v42, 2 }
 0x3c3   :  { %v2334_v35 = vsel %vm853_vm1, %v2233_v0, 0.0  ;;  %v2124_v3 = vsub.f32 2.0, %v2108_v13  ;;  %v2291_v14 = vadd.f32 %v2290_v27, %v2289_v43  ;;  %v2303_v41 = vrot.slane %v5739_v47, 1  ;;  %v5807_v13 = vld [vmem:[%s6322_s2 + $0x50] ss:$0 sm:$0xff]  ;;  %s4226_s2 = smov 4  }
 0x3c4   :  { %v2443_v25 = vadd.f32 %v2442_v29, %v2441_v28  ;;  %v2335_v48 = vadd.f32 %v2334_v35, %v2333_v20  ;;  %v2066_v56 = vadd.f32 %v2065_v10, %v2064_v40  ;;  %v2316_v51 = vrot.slane %v2315_v34, 1 }
 0x3c5   :  { %v2336_v53 = vsel %vm853_vm1, %v2234_v45, 0.0  ;;  %v2140_v60 = vmul.f32 %v4114_v54, %v2124_v3  ;;  %v2329_v62 = vrot.slane %v2328_v38, 1  ;;  %v2367_v24 = vadd.f32 %v2366_v21, %v2365_v2 }
 0x3c6   :  { %v2455_v57 = vrot.slane %v2454_v18, 4  ;;  %v2337_v22 = vadd.f32 %v2336_v53, %v2335_v48  ;;  %v2067_v33 = vrot.slane %v2066_v56, 2  ;;  %v2380_v58 = vadd.f32 %v2379_v44, %v2378_v42 }
 0x3c7   :  { %v2171_v26 = vmul.f32 %v5618_v30, %v2140_v60  ;;  %v2172_v16 = vmul.f32 %v5630_v1, %v2140_v60  ;;  %v2173_v43 = vmul.f32 %v5641_v36, %v2140_v60  ;;  %v2174_v28 = vmul.f32 %v5653_v17, %v2140_v60 }
 0x3c8   :  { %v2338_v27 = vrot.slane %v2337_v22, 4  ;;  %v2068_v29 = vadd.f32 %v2067_v33, %v2066_v56  ;;  %v2304_v0 = vadd.f32 %v2303_v41, %v5739_v47  ;;  %v2317_v23 = vadd.f32 %v2316_v51, %v2315_v34 }
 0x3c9   :  { %v2235_v54 = vmul.f32 %v2171_v26, %v4281_v7  ;;  %v2236_v2 = vmul.f32 %v4279_v6, %v2172_v16  ;;  %v2237_v5 = vmul.f32 %v2173_v43, %v4287_v9  ;;  %v2368_v42 = vrot.slane %v2367_v24, 1 }
 0x3ca   :  { %v2069_v40 = vrot.slane %v2068_v29, 1  ;;  %v2330_v30 = vadd.f32 %v2329_v62, %v2328_v38  ;;  %v2339_v21 = vadd.f32 %v2338_v27, %v2337_v22  ;;  %v2381_v1 = vrot.slane %v2380_v58, 1 }
 0x3cb   :  { %v2456_v45 = vadd.f32 %v2455_v57, %v2454_v18  ;;  %v2238_v36 = vmul.f32 %v4285_v8, %v2174_v28  ;;  %v2344_v17 = vsel %vm853_vm1, %v2235_v54, 0.0  ;;  %v2345_v39 = vsel %vm853_vm1, %v2236_v2, 0.0 }
 0x3cc   :  { %v2444_v47 = vrot.slane %v2443_v25, 2  ;;  %v2346_v34 = vadd.f32 %v2345_v39, %v2344_v17  ;;  %v5802_v37 = vadd.f32 %v2069_v40, %v2068_v29  ;;  %v2340_v20 = vrot.slane %v2339_v21, 2 }
 0x3cd   :  { %v4116_v38 = vpop.eup %4115  ;;  %v2347_v10 = vsel %vm853_vm1, %v2237_v5, 0.0  ;;  %v2369_v18 = vadd.f32 %v2368_v42, %v2367_v24  ;;  %v5811_v44 = vadd.f32 %v5807_v13, %v2304_v0  ;;  %v5814_v35 = vadd.f32 %v5807_v13, %v2317_v23 }
 0x3ce   :  { %v2348_v3 = vadd.f32 %v2347_v10, %v2346_v34  ;;  %v2117_v41 = vmul.f32 %v4116_v38, %v2085_v11  ;;  %v2086_v48 = vmax.f32 %v5802_v37, 1e-30  ;;  %v2341_v56 = vadd.f32 %v2340_v20, %v2339_v21 }
 0x3cf   :  { %v2349_v51 = vsel %vm853_vm1, %v2238_v36, 0.0  ;;  %v2382_v53 = vadd.f32 %v2381_v1, %v2380_v58  ;;  %v2457_v60 = vrot.slane %v2456_v45, 2  ;;  %v5821_v62 = vadd.f32 %v5807_v13, %v2330_v30 }
 0x3d0   :  { %v2133_v24 = vsub.f32 2.0, %v2117_v41  ;;  %4117 = vrcp.f32 %v2086_v48  ;;  %v2342_v57 = vrot.slane %v2341_v56, 1  ;;  %v2350_v22 = vadd.f32 %v2349_v51, %v2348_v3 }
 0x3d1   :  { %v2432_v49 = vadd.f32 %v2431_v46, %v5718_v61  ;;  %v2445_v11 = vadd.f32 %v2444_v47, %v2443_v25  ;;  %v5829_v33 = vadd.f32 %v5807_v13, %v2291_v14  ;;  %v2524_v58 = vmin.f32 %v5811_v44, 0.0 }
 0x3d2   :  { %v2149_v26 = vmul.f32 %v4116_v38, %v2133_v24  ;;  %v2343_v16 = vadd.f32 %v2342_v57, %v2341_v56  ;;  %v2351_v43 = vrot.slane %v2350_v22, 4  ;;  %v2525_v28 = vmin.f32 %v5814_v35, 0.0 }
 0x3d3   :  { %v2458_v27 = vadd.f32 %v2457_v60, %v2456_v45  ;;  %v5834_v29 = vadd.f32 %v5807_v13, %v2369_v18  ;;  %v5837_v0 = vadd.f32 %v5807_v13, %v2382_v53  ;;  %v2526_v61 = vmin.f32 %v5821_v62, 0.0  ;;  %v6399_v53 = vld [vmem:[#allocation19_spill] sm:$0xff] }
 0x3d4   :  { %v2207_v46 = vmul.f32 %v5663_v15, %v2149_v26  ;;  %v2208_v14 = vmul.f32 %v5673_v32, %v2149_v26  ;;  %v2209_v25 = vmul.f32 %v5684_v50, %v2149_v26  ;;  %v2210_v23 = vmul.f32 %v5704_v52, %v2149_v26 }
 0x3d5   :  { %v2352_v54 = vadd.f32 %v2351_v43, %v2350_v22  ;;  %v5845_v2 = vadd.f32 %v5807_v13, %v2343_v16  ;;  %v2523_v5 = vmin.f32 %v5829_v33, 0.0  ;;  %v2541_v42 = vmul.f32 1.442695, %v2524_v58 }
 0x3d6   :  { %v2271_v40 = vmul.f32 %v2207_v46, %v4281_v7  ;;  %v2272_v30 = vmul.f32 %v4279_v6, %v2208_v14  ;;  %v2273_v21 = vmul.f32 %v2209_v25, %v4287_v9  ;;  %v2543_v15 = vmul.f32 1.442695, %v2525_v28 }
 0x3d7   :  { %v2353_v1 = vrot.slane %v2352_v54, 2  ;;  %v2527_v32 = vmin.f32 %v5845_v2, 0.0  ;;  %v2529_v50 = vmin.f32 %v5834_v29, 0.0  ;;  %v2545_v52 = vmul.f32 1.442695, %v2526_v61 }
 0x3d8   :  { %v2274_v45 = vmul.f32 %v4285_v8, %v2210_v23  ;;  %v2461_v36 = vsel %vm853_vm1, %v2271_v40, 0.0  ;;  %v2462_v17 = vsel %vm853_vm1, %v2272_v30, 0.0  ;;  %v2530_v39 = vmin.f32 %v5837_v0, 0.0 }
 0x3d9   :  { %v2463_v47 = vadd.f32 %v2462_v17, %v2461_v36  ;;  %v2354_v34 = vadd.f32 %v2353_v1, %v2352_v54  ;;  %4119 = vpow2.f32 %v2541_v42  ;;  %v2547_v20 = vmul.f32 1.442695, %v2527_v32 }
 0x3da   :  { %v2464_v38 = vsel %vm853_vm1, %v2273_v21, 0.0  ;;  %v2433_v10 = vrot.slane %v2432_v49, 1  ;;  %v2446_v18 = vrot.slane %v2445_v11, 1  ;;  %4121 = vpow2.f32 %v2543_v15 }
 0x3db   :  { %v2465_v3 = vadd.f32 %v2464_v38, %v2463_v47  ;;  %v2355_v41 = vrot.slane %v2354_v34, 1  ;;  %v2539_v56 = vmul.f32 1.442695, %v2523_v5  ;;  %4123 = vpow2.f32 %v2545_v52 }
 0x3dc   :  { %v2466_v51 = vsel %vm853_vm1, %v2274_v45, 0.0  ;;  %v6400_v60 = vrot.slane %v6399_v53, 1  ;;  %4125 = vpow2.f32 %v2547_v20  ;;  %v2551_v57 = vmul.f32 1.442695, %v2529_v50 }
 0x3dd   :  { %v4118_v22 = vpop.eup %4117  ;;  %v2467_v58 = vadd.f32 %v2466_v51, %v2465_v3  ;;  %v2356_v26 = vadd.f32 %v2355_v41, %v2354_v34  ;;  %v2459_v16 = vrot.slane %v2458_v27, 1  ;;  %v2553_v43 = vmul.f32 1.442695, %v2530_v39 }
 0x3de   :  { %v2395_v24 = vadd.f32 %v6400_v60, %v6399_v53  ;;  %v6401_v28 = vrot.slane %v5371_v55, 1  ;;  %v2118_v46 = vmul.f32 %v4118_v22, %v2086_v48  ;;  %v2421_v14 = vadd.f32 %v2420_v59, %v5623_v19 }
 0x3df   :  { %v2434_v25 = vadd.f32 %v2433_v10, %v2432_v49  ;;  %v2468_v23 = vrot.slane %v2467_v58, 4  ;;  %v2447_v54 = vadd.f32 %v2446_v18, %v2445_v11  ;;  %v5871_v5 = vadd.f32 %v5807_v13, %v2356_v26 }
 0x3e0   :  { %v2408_v61 = vadd.f32 %v6401_v28, %v5371_v55  ;;  %4127 = vpow2.f32 %v2539_v56  ;;  %v2134_v42 = vsub.f32 2.0, %v2118_v46  ;;  %v5874_v40 = vadd.f32 %v5807_v13, %v2395_v24 }
 0x3e1   :  { %4129 = vpow2.f32 %v2551_v57  ;;  %v2460_v55 = vadd.f32 %v2459_v16, %v2458_v27  ;;  %v2469_v30 = vadd.f32 %v2468_v23, %v2467_v58  ;;  %v2528_v37 = vmin.f32 %v5871_v5, 0.0 }
 0x3e2   :  { %4131 = vpow2.f32 %v2553_v43  ;;  %v2150_v48 = vmul.f32 %v4118_v22, %v2134_v42  ;;  %v5878_v19 = vadd.f32 %v5807_v13, %v2408_v61  ;;  %v5881_v59 = vadd.f32 %v5807_v13, %v2421_v14 }
 0x3e3   :  { %v2470_v49 = vrot.slane %v2469_v30, 2  ;;  %v5884_v11 = vadd.f32 %v5807_v13, %v2434_v25  ;;  %v5887_v21 = vadd.f32 %v5807_v13, %v2447_v54  ;;  %v2549_v15 = vmul.f32 1.442695, %v2528_v37 }
 0x3e4   :  { %v2211_v27 = vmul.f32 %v5750_v12, %v2150_v48  ;;  %v2212_v1 = vmul.f32 %v5754_v63, %v2150_v48  ;;  %v2213_v32 = vmul.f32 %v5758_v4, %v2150_v48  ;;  %v2214_v50 = vmul.f32 %v5764_v31, %v2150_v48 }
 0x3e5   :  { %vm2508_vm3 = vcmp.gt.f32.partialorder %v5811_v44, 0.0  ;;  %v2471_v52 = vadd.f32 %v2470_v49, %v2469_v30  ;;  %v5895_v45 = vadd.f32 %v5807_v13, %v2460_v55  ;;  %vm2509_vm4 = vcmp.gt.f32.partialorder %v5814_v35, 0.0 }
 0x3e6   :  { %v2531_v36 = vmin.f32 %v5874_v40, 0.0  ;;  %4133 = vpow2.f32 %v2549_v15  ;;  %v4120_v17 = vpop.eup %4119  ;;  %v2275_v12 = vmul.f32 %v2211_v27, %v4281_v7  ;;  %v2276_v63 = vmul.f32 %v4279_v6, %v2212_v1 }
 0x3e7   :  { %v2277_v4 = vmul.f32 %v2213_v32, %v4287_v9  ;;  %v2532_v31 = vmin.f32 %v5878_v19, 0.0  ;;  %v4122_v39 = vpop.eup %4121  ;;  %v2472_v47 = vrot.slane %v2471_v52, 1  ;;  %vm2510_vm5 = vcmp.gt.f32.partialorder %v5821_v62, 0.0 }
 0x3e8   :  { %v2533_v34 = vmin.f32 %v5881_v59, 0.0  ;;  %v2534_v20 = vmin.f32 %v5884_v11, 0.0  ;;  %v4124_v38 = vpop.eup %4123  ;;  %v2278_v10 = vmul.f32 %v4285_v8, %v2214_v50  ;;  %v2474_v18 = vsel %vm853_vm1, %v2275_v12, 0.0 }
 0x3e9   :  { %v2475_v7 = vsel %vm853_vm1, %v2276_v63, 0.0  ;;  %v2535_v6 = vmin.f32 %v5887_v21, 0.0  ;;  %v4126_v9 = vpop.eup %4125  ;;  %v2473_v41 = vadd.f32 %v2472_v47, %v2471_v52  ;;  %v2536_v56 = vmin.f32 %v5895_v45, 0.0 }
 0x3ea   :  { %v2476_v3 = vadd.f32 %v2475_v7, %v2474_v18  ;;  %v3629_v51 = vadd.f32 -1.0, %v4120_v17  ;;  %v2477_v53 = vsel %vm853_vm1, %v2277_v4, 0.0  ;;  %vm2507_vm6 = vcmp.gt.f32.partialorder %v5829_v33, 0.0 }
 0x3eb   :  { %v5913_v60 = vmul.f32 1.442695, %v2531_v36  ;;  %v2557_v24 = vmul.f32 1.442695, %v2532_v31  ;;  %v3630_v8 = vadd.f32 -1.0, %v4122_v39  ;;  %vm2511_vm7 = vcmp.gt.f32.partialorder %v5845_v2, 0.0 }
 0x3ec   :  { %v2478_v57 = vadd.f32 %v2477_v53, %v2476_v3  ;;  %vm2513_vm8 = vcmp.gt.f32.partialorder %v5834_v29, 0.0  ;;  %v2559_v22 = vmul.f32 1.442695, %v2533_v34  ;;  %v3631_v58 = vadd.f32 -1.0, %v4124_v38 }
 0x3ed   :  { %v4128_v26 = vpop.eup %4127  ;;  %v2479_v16 = vsel %vm853_vm1, %v2278_v10, 0.0  ;;  %v5919_v43 = vadd.f32 %v5807_v13, %v2473_v41  ;;  %vm2514_vm9 = vcmp.gt.f32.partialorder %v5837_v0, 0.0  ;;  %v2561_v28 = vmul.f32 1.442695, %v2534_v20 }
 0x3ee   :  { %v3632_v61 = vadd.f32 -1.0, %v4126_v9  ;;  %v4130_v46 = vpop.eup %4129  ;;  %v2480_v14 = vadd.f32 %v2479_v16, %v2478_v57  ;;  %v2563_v25 = vmul.f32 1.442695, %v2535_v6  ;;  %v2565_v23 = vmul.f32 1.442695, %v2536_v56 }
 0x3ef   :  { %v2588_v54 = vsel %vm2508_vm3, %v5811_v44, %v3629_v51  ;;  %v4132_v42 = vpop.eup %4131  ;;  %v2589_v55 = vsel %vm2509_vm4, %v5814_v35, %v3630_v8  ;;  %vm2646_vm10 = vcmask 1041409   ;;  %vm2649_vm11 = vcmask 1042434  }
 0x3f0   :  { %vm2652_vm12 = vcmask 1043459   ;;  %v2481_v30 = vrot.slane %v2480_v14, 4  ;;  %4135 = vpow2.f32 %v2557_v24  ;;  %v3628_v37 = vadd.f32 -1.0, %v4128_v26 }
 0x3f1   :  { %v2590_v48 = vsel %vm2510_vm5, %v5821_v62, %v3631_v58  ;;  %v2537_v49 = vmin.f32 %v5919_v43, 0.0  ;;  %v3634_v15 = vadd.f32 -1.0, %v4130_v46  ;;  %v2591_v44 = vsel %vm2511_vm7, %v5845_v2, %v3632_v61 }
 0x3f2   :  { %v2645_v27 = vrot.slane %v2588_v54, 7  ;;  %v2482_v1 = vadd.f32 %v2481_v30, %v2480_v14  ;;  %4137 = vpow2.f32 %v2559_v22  ;;  %v3635_v35 = vadd.f32 -1.0, %v4132_v42 }
 0x3f3   :  { %v2648_v32 = vrot.slane %v2589_v55, 6  ;;  %v4134_v50 = vpop.eup %4133  ;;  %4139 = vpow2.f32 %v2561_v28  ;;  %v2651_v52 = vrot.slane %v2590_v48, 5  ;;  %vm2655_vm13 = vcmask 1044484  }
 0x3f4   :  { %vm2658_vm14 = vcmask 1045509   ;;  %v2483_v36 = vrot.slane %v2482_v1, 2  ;;  %v3633_v17 = vadd.f32 -1.0, %v4134_v50  ;;  %v2587_v62 = vsel %vm2507_vm6, %v5829_v33, %v3628_v37 }
 0x3f5   :  { %v2654_v12 = vrot.slane %v2591_v44, 4  ;;  %vm2512_vm15 = vcmp.gt.f32.partialorder %v5871_v5, 0.0  ;;  %v2567_v2 = vmul.f32 1.442695, %v2537_v49  ;;  %v2593_v63 = vsel %vm2513_vm8, %v5834_v29, %v3634_v15 }
 0x3f6   :  { %v2647_v4 = vsel %vm2646_vm10, %v2645_v27, %v2587_v62  ;;  %v2484_v31 = vadd.f32 %v2483_v36, %v2482_v1  ;;  %v2592_v39 = vsel %vm2512_vm15, %v5871_v5, %v3633_v17  ;;  %v2594_v47 = vsel %vm2514_vm9, %v5837_v0, %v3635_v35  ;;  %v2627_v36 = vld [vmem:[%s6324_s4 + $0x40] sm:$0xff] }
 0x3f7   :  { %v2650_v34 = vsel %vm2649_vm11, %v2648_v32, %v2647_v4  ;;  %4141 = vpow2.f32 %v2563_v25  ;;  %v2657_v20 = vrot.slane %v2592_v39, 3  ;;  %vm2664_vm0 = vcmask 1047559   ;;  %v6402_v17 = vld [vmem:[#allocation5_spill] sm:$0xff]  ;;  %v6403_v39 = vld [vmem:[#allocation6_spill] sm:$0xff] }
 0x3f8   :  { %v2653_v33 = vsel %vm2652_vm12, %v2651_v52, %v2650_v34  ;;  %v2485_v38 = vrot.slane %v2484_v31, 1  ;;  %4143 = vpow2.f32 %v2565_v23  ;;  %v2660_v10 = vrot.slane %v2593_v63, 2 }
 0x3f9   :  { %v2656_v29 = vsel %vm2655_vm13, %v2654_v12, %v2653_v33  ;;  %4145 = vpow2.f32 %v2567_v2  ;;  %vm2661_vm2 = vcmask 1046534   ;;  %v2663_v5 = vrot.slane %v2594_v47, 1 }
 0x3fa   :  { %v2659_v18 = vsel %vm2658_vm14, %v2657_v20, %v2656_v29  ;;  %v2486_v7 = vadd.f32 %v2485_v38, %v2484_v31  ;;  %4147 = vpow2.f32 %v5913_v60  ;;  %vm2516_vm3 = vcmp.gt.f32.partialorder %v5878_v19, 0.0 }
 0x3fb   :  { %v2662_v0 = vsel %vm2661_vm2, %v2660_v10, %v2659_v18  ;;  %vm2517_vm4 = vcmp.gt.f32.partialorder %v5881_v59, 0.0  ;;  %vm2518_vm5 = vcmp.gt.f32.partialorder %v5884_v11, 0.0  ;;  %vm2519_vm6 = vcmp.gt.f32.partialorder %v5887_v21, 0.0 }
 0x3fc   :  { %v2665_v6 = vsel %vm2664_vm0, %v2663_v5, %v2662_v0  ;;  %v2506_v9 = vadd.f32 %v5807_v13, %v2486_v7  ;;  %vm2520_vm7 = vcmp.gt.f32.partialorder %v5895_v45, 0.0  ;;  %vm2521_vm8 = vcmp.gt.f32.partialorder %v5919_v43, 0.0 }
 0x3fd   :  { %3907 = vmatprep.mubr.msk.f32.mxu0 %vm853_vm1, %v2665_v6  ;;  %v4136_v3 = vpop.eup %4135  ;;  %vm2515_vm9 = vcmp.gt.f32.partialorder %v5874_v40, 0.0 }
 0x3fe   :  { %v2538_v41 = vmin.f32 %v2506_v9, 0.0  ;;  %v3637_v8 = vadd.f32 -1.0, %v4136_v3  ;;  %vm2522_vm15 = vcmp.gt.f32.partialorder %v2506_v9, 0.0 }
 0x3ff   :  { %v4138_v56 = vpop.eup %4137 }
 0x400   :  { %v4140_v51 = vpop.eup %4139  ;;  %v2569_v53 = vmul.f32 1.442695, %v2538_v41  ;;  %v3638_v22 = vadd.f32 -1.0, %v4138_v56  ;;  %v2596_v28 = vsel %vm2516_vm3, %v5878_v19, %v3637_v8  ;;  %vm3001_vm3 = vcmask 1043456  }
 0x401   :  { %v3639_v60 = vadd.f32 -1.0, %v4140_v51  ;;  %v2666_v54 = vrot.slane %v2596_v28, 7  ;;  %3910 = vmatprep.subr.msk.mxu0 %vm3001_vm3, %v2627_v36 }
 0x402   :  { %4149 = vpow2.f32 %v2569_v53  ;;  %v2597_v46 = vsel %vm2517_vm4, %v5881_v59, %v3638_v22 }
 0x403   :  { %v2598_v25 = vsel %vm2518_vm5, %v5884_v11, %v3639_v60  ;;  %v2668_v19 = vrot.slane %v2597_v46, 6 }
 0x404   :  { %v4142_v24 = vpop.eup %4141  ;;  %v2670_v59 = vrot.slane %v2598_v25, 5 }
 0x405   :  { %v4144_v57 = vpop.eup %4143  ;;  %v3640_v16 = vadd.f32 -1.0, %v4142_v24 }
 0x406   :  { %v4146_v58 = vpop.eup %4145  ;;  %v3641_v13 = vadd.f32 -1.0, %v4144_v57 }
 0x407   :  { %v4148_v26 = vpop.eup %4147  ;;  %v3642_v61 = vadd.f32 -1.0, %v4146_v58  ;;  %v2599_v23 = vsel %vm2519_vm6, %v5887_v21, %v3640_v16 }
 0x408   :  { %v3636_v14 = vadd.f32 -1.0, %v4148_v26  ;;  %v2600_v42 = vsel %vm2520_vm7, %v5895_v45, %v3641_v13  ;;  %v2672_v37 = vrot.slane %v2599_v23, 4 }
 0x409   :  { %v2601_v55 = vsel %vm2521_vm8, %v5919_v43, %v3642_v61  ;;  %v2674_v49 = vrot.slane %v2600_v42, 3 }
 0x40a   :  { %v2595_v30 = vsel %vm2515_vm9, %v5874_v40, %v3636_v14  ;;  %v2676_v44 = vrot.slane %v2601_v55, 2 }
 0x40b   :  { %v2667_v11 = vsel %vm2646_vm10, %v2666_v54, %v2595_v30 }
 0x40c   :  { %v2669_v21 = vsel %vm2649_vm11, %v2668_v19, %v2667_v11 }
 0x40d   :  { %v2671_v45 = vsel %vm2652_vm12, %v2670_v59, %v2669_v21 }
 0x40e   :  { %v2673_v1 = vsel %vm2655_vm13, %v2672_v37, %v2671_v45 }
 0x40f   :  { %v4150_v48 = vpop.eup %4149  ;;  %v2675_v43 = vsel %vm2658_vm14, %v2674_v49, %v2673_v1 }
 0x410   :  { %v3643_v15 = vadd.f32 -1.0, %v4150_v48  ;;  %v2677_v40 = vsel %vm2661_vm2, %v2676_v44, %v2675_v43 }
 0x412   :  { %v2602_v27 = vsel %vm2522_vm15, %v2506_v9, %v3643_v15 }
 0x413   :  { %v2678_v35 = vrot.slane %v2602_v27, 1 }
 0x415   :  { %v2679_v32 = vsel %vm2664_vm0, %v2678_v35, %v2677_v40 }
 0x416   :  { %3908 = vmatmul.mubr.msk.f32.vlgmr.msra.gmra.mxu0 %vm853_vm1, %v2679_v32 }
 0x417   :  { %3911 = vmatpush3.msk.msra.mxu0 %vm3001_vm3, %v2627_v36 }
 0x4d6   :  { %v5978_v50 = vpop.f32.mrf.mxu0 }
 0x4d7   :  { %2852 = vrot.lane.b32.xlu1 %v5978_v50, %s4226_s2 }
 0x4d8   :  { %v5981_v52 = vpop.f32.mrf.mxu0 }
 0x4d9   :  { %2850 = vrot.lane.b32.xlu0 %v5981_v52, %s4226_s2  ;;  %v2767_v62 = vrot.slane %v5981_v52, %v6402_v17  ;;  %v2760_v31 = vcombine.high %v5981_v52, %v5981_v52 }
 0x4db   :  { %v2775_v12 = vcombine.high %v2767_v62, %v2767_v62  ;;  %v2783_v2 = vrot.slane %v2767_v62, %v6402_v17  ;;  %v2774_v18 = vrot.slane %v2760_v31, %v6402_v17 }
 0x4dd   :  { %v2797_v63 = vrot.slane %v2775_v12, %v6402_v17  ;;  %v2805_v4 = vcombine.high %v2783_v2, %v2783_v2  ;;  %v2812_v47 = vrot.slane %v2783_v2, %v6403_v39  ;;  %v2790_v51 = vrot.slane %v2774_v18, %v6402_v17 }
 0x4de   :  { %v2776_v53 = vcombine.high %v2774_v18, %v2774_v18 }
 0x4df   :  { %v2816_v34 = vrot.slane %v2797_v63, %v6403_v39  ;;  %v2820_v10 = vrot.slane %v2805_v4, %v6403_v39  ;;  %v2807_v0 = vcombine.high %v2797_v63, %v2797_v63  ;;  %v2828_v16 = vrot.slane %v2790_v51, %v6403_v39 }
 0x4e0   :  { %v2804_v46 = vrot.slane %v2776_v53, %v6402_v17  ;;  %v2806_v54 = vcombine.high %v2790_v51, %v2790_v51 }
 0x4e1   :  { %v2824_v22 = vrot.slane %v2807_v0, %v6403_v39 }
 0x4e2   :  { %v2832_v59 = vrot.slane %v2804_v46, %v6403_v39  ;;  %v2836_v11 = vrot.slane %v2806_v54, %v6403_v39  ;;  %v2808_v44 = vcombine.high %v2804_v46, %v2804_v46  ;;  %v2608_v54 = vld [vmem:[%s6323_s3 + $0x28] sm:$0xff] }
 0x4e4   :  { %v2840_v32 = vrot.slane %v2808_v44, %v6403_v39 }
 0x549   :  { %v5995_v33 = vpop.permute.xlu1 %2852 }
 0x54a   :  { %v2857_v20 = vadd.f32 %v5995_v33, %v2812_v47  ;;  %v2859_v38 = vadd.f32 %v5995_v33, %v2816_v34  ;;  %v2861_v9 = vadd.f32 %v5995_v33, %v2820_v10  ;;  %v2863_v26 = vadd.f32 %v5995_v33, %v2824_v22 }
 0x54b   :  { %v5999_v29 = vpop.permute.xlu0 %2850  ;;  %v2865_v23 = vadd.f32 %v5995_v33, %v2828_v16  ;;  %v2867_v48 = vadd.f32 %v5995_v33, %v2832_v59  ;;  %v2869_v1 = vadd.f32 %v5995_v33, %v2836_v11  ;;  %v2871_v62 = vadd.f32 %v5995_v33, %v2840_v32 }
 0x54c   :  { %vm2873_vm1 = vcmp.gt.f32.partialorder %v2857_v20, 0.0  ;;  %v2889_v5 = vmul.f32 0.2, %v2857_v20  ;;  %v2856_v7 = vadd.f32 %v5999_v29, %v2812_v47  ;;  %v2858_v6 = vadd.f32 %v5999_v29, %v2816_v34 }
 0x54d   :  { %v2891_v56 = vmul.f32 0.2, %v2859_v38  ;;  %vm2875_vm5 = vcmp.gt.f32.partialorder %v2859_v38, 0.0  ;;  %v2860_v57 = vadd.f32 %v5999_v29, %v2820_v10  ;;  %v2893_v60 = vmul.f32 0.2, %v2861_v9 }
 0x54e   :  { %v2905_v3 = vsel %vm2873_vm1, %v2857_v20, %v2889_v5  ;;  %vm2872_vm4 = vcmp.gt.f32.partialorder %v2856_v7, 0.0  ;;  %v2888_v41 = vmul.f32 0.2, %v2856_v7  ;;  %v2890_v8 = vmul.f32 0.2, %v2858_v6 }
 0x54f   :  { %2938 = vrot.lane.b32.xlu1 %v2905_v3, %s4227_s20  ;;  %vm2874_vm6 = vcmp.gt.f32.partialorder %v2858_v6, 0.0  ;;  %v2907_v58 = vsel %vm2875_vm5, %v2859_v38, %v2891_v56  ;;  %vm2877_vm7 = vcmp.gt.f32.partialorder %v2861_v9, 0.0  ;;  %v2892_v28 = vmul.f32 0.2, %v2860_v57 }
 0x550   :  { %v2904_v24 = vsel %vm2872_vm4, %v2856_v7, %v2888_v41  ;;  %v2906_v13 = vsel %vm2874_vm6, %v2858_v6, %v2890_v8  ;;  %v2862_v61 = vadd.f32 %v5999_v29, %v2824_v22  ;;  %vm2876_vm8 = vcmp.gt.f32.partialorder %v2860_v57, 0.0  ;;  %v2604_v8 = vld [vmem:[%s6323_s3 + $0x8] sm:$0xff]  ;;  %v2603_v22 = vld [vmem:[%s6323_s3] sm:$0xff] }
 0x551   :  { %2936 = vrot.lane.b32.xlu0 %v2904_v24, %s4227_s20  ;;  %v2909_v14 = vsel %vm2877_vm7, %v2861_v9, %v2893_v60  ;;  %v2895_v25 = vmul.f32 0.2, %v2863_v26  ;;  %vm2879_vm9 = vcmp.gt.f32.partialorder %v2863_v26, 0.0  ;;  %v2908_v42 = vsel %vm2876_vm8, %v2860_v57, %v2892_v28  ;;  %v2605_v28 = vld [vmem:[%s6323_s3 + $0x10] sm:$0xff] }
 0x552   :  { %v2894_v19 = vmul.f32 0.2, %v2862_v61  ;;  %v2864_v55 = vadd.f32 %v5999_v29, %v2828_v16  ;;  %vm2878_vm15 = vcmp.gt.f32.partialorder %v2862_v61, 0.0  ;;  %v2897_v37 = vmul.f32 0.2, %v2865_v23 }
 0x553   :  { %2942 = vrot.lane.b32.xlu1 %v2907_v58, %s4227_s20  ;;  %v2911_v30 = vsel %vm2879_vm9, %v2863_v26, %v2895_v25  ;;  %vm2881_vm3 = vcmp.gt.f32.partialorder %v2865_v23, 0.0  ;;  %v2866_v21 = vadd.f32 %v5999_v29, %v2832_v59  ;;  %v2899_v27 = vmul.f32 0.2, %v2867_v48  ;;  %v2606_v26 = vld [vmem:[%s6323_s3 + $0x18] sm:$0xff]  ;;  %v2607_v59 = vld [vmem:[%s6323_s3 + $0x20] sm:$0xff] }
 0x554   :  { %v2910_v49 = vsel %vm2878_vm15, %v2862_v61, %v2894_v19  ;;  %v2896_v15 = vmul.f32 0.2, %v2864_v55  ;;  %vm2880_vm1 = vcmp.gt.f32.partialorder %v2864_v55, 0.0  ;;  %v2913_v45 = vsel %vm2881_vm3, %v2865_v23, %v2897_v37 }
 0x555   :  { %2940 = vrot.lane.b32.xlu0 %v2906_v13, %s4227_s20  ;;  %vm2883_vm4 = vcmp.gt.f32.partialorder %v2867_v48, 0.0  ;;  %v2898_v35 = vmul.f32 0.2, %v2866_v21  ;;  %v2868_v40 = vadd.f32 %v5999_v29, %v2836_v11  ;;  %vm2882_vm5 = vcmp.gt.f32.partialorder %v2866_v21, 0.0 }
 0x556   :  { %v2912_v43 = vsel %vm2880_vm1, %v2864_v55, %v2896_v15  ;;  %v2915_v36 = vsel %vm2883_vm4, %v2867_v48, %v2899_v27  ;;  %v2901_v17 = vmul.f32 0.2, %v2869_v1  ;;  %vm2885_vm6 = vcmp.gt.f32.partialorder %v2869_v1, 0.0 }
 0x557   :  { %2946 = vrot.lane.b32.xlu1 %v2909_v14, %s4227_s20  ;;  %v2914_v12 = vsel %vm2882_vm5, %v2866_v21, %v2898_v35  ;;  %v2900_v2 = vmul.f32 0.2, %v2868_v40  ;;  %v2870_v63 = vadd.f32 %v5999_v29, %v2840_v32  ;;  %vm2884_vm7 = vcmp.gt.f32.partialorder %v2868_v40, 0.0  ;;  %v2610_v21 = vld [vmem:[%s6323_s3 + $0x38] sm:$0xff] }
 0x558   :  { %v2917_v4 = vsel %vm2885_vm6, %v2869_v1, %v2901_v17  ;;  %v2903_v31 = vmul.f32 0.2, %v2871_v62  ;;  %vm2887_vm8 = vcmp.gt.f32.partialorder %v2871_v62, 0.0  ;;  %vm2968_vm15 = vcmask 31744  }
 0x559   :  { %2944 = vrot.lane.b32.xlu0 %v2908_v42, %s4227_s20  ;;  %v2916_v39 = vsel %vm2884_vm7, %v2868_v40, %v2900_v2  ;;  %v2902_v47 = vmul.f32 0.2, %v2870_v63  ;;  %vm2886_vm9 = vcmp.gt.f32.partialorder %v2870_v63, 0.0  ;;  %v2612_v2 = vld [vmem:[%s6323_s3 + $0x48] sm:$0xff] }
 0x55a   :  { %v2919_v34 = vsel %vm2887_vm8, %v2871_v62, %v2903_v31 }
 0x55b   :  { %2950 = vrot.lane.b32.xlu1 %v2911_v30, %s4227_s20  ;;  %v2918_v33 = vsel %vm2886_vm9, %v2870_v63, %v2902_v47 }
 0x55d   :  { %2948 = vrot.lane.b32.xlu0 %v2910_v49, %s4227_s20 }
 0x55f   :  { %2954 = vrot.lane.b32.xlu1 %v2913_v45, %s4227_s20 }
 0x561   :  { %2952 = vrot.lane.b32.xlu0 %v2912_v43, %s4227_s20  ;;  %v2609_v43 = vld [vmem:[%s6323_s3 + $0x30] sm:$0xff] }
 0x563   :  { %2958 = vrot.lane.b32.xlu1 %v2915_v36, %s4227_s20 }
 0x565   :  { %2956 = vrot.lane.b32.xlu0 %v2914_v12, %s4227_s20 }
 0x567   :  { %2962 = vrot.lane.b32.xlu1 %v2917_v4, %s4227_s20 }
 0x569   :  { %2960 = vrot.lane.b32.xlu0 %v2916_v39, %s4227_s20 }
 0x56b   :  { %2966 = vrot.lane.b32.xlu1 %v2919_v34, %s4227_s20  ;;  %v2611_v34 = vld [vmem:[%s6323_s3 + $0x40] sm:$0xff] }
 0x56d   :  { %2964 = vrot.lane.b32.xlu0 %v2918_v33, %s4227_s20 }
 0x5c1   :  { %v2939_v20 = vpop.permute.xlu1 %2938 }
 0x5c3   :  { %v2937_v38 = vpop.permute.xlu0 %2936 }
 0x5c4   :  { %3912 = vmatprep.mubr.msk.f32.mxu0 %vm2968_vm15, %v2937_v38 }
 0x5c5   :  { %3913 = vmatmul.mubr.msk.f32.vlgmr.msra.gmra.mxu0 %vm2968_vm15, %v2939_v20  ;;  %v2943_v29 = vpop.permute.xlu1 %2942 }
 0x5c7   :  { %v2941_v10 = vpop.permute.xlu0 %2940 }
 0x5c8   :  { %3915 = vmatprep.mubr.msk.f32.mxu0 %vm2968_vm15, %v2941_v10 }
 0x5c9   :  { %v2947_v18 = vpop.permute.xlu1 %2946  ;;  %3916 = vmatmul.mubr.msk.f32.gmra.mxu0 %vm2968_vm15, %v2943_v29 }
 0x5cb   :  { %v2945_v5 = vpop.permute.xlu0 %2944 }
 0x5cc   :  { %3918 = vmatprep.mubr.msk.f32.mxu0 %vm2968_vm15, %v2945_v5 }
 0x5cd   :  { %3919 = vmatmul.mubr.msk.f32.gmra.mxu0 %vm2968_vm15, %v2947_v18  ;;  %v2951_v7 = vpop.permute.xlu1 %2950 }
 0x5cf   :  { %v2949_v0 = vpop.permute.xlu0 %2948 }
 0x5d0   :  { %3921 = vmatprep.mubr.msk.f32.mxu0 %vm2968_vm15, %v2949_v0  ;;  %v2614_v0 = vld [vmem:[%s6323_s3 + $0x58] sm:$0xff] }
 0x5d1   :  { %3922 = vmatmul.mubr.msk.f32.gmra.mxu0 %vm2968_vm15, %v2951_v7  ;;  %v2955_v6 = vpop.permute.xlu1 %2954 }
 0x5d3   :  { %v2953_v9 = vpop.permute.xlu0 %2952 }
 0x5d4   :  { %3924 = vmatprep.mubr.msk.f32.mxu0 %vm2968_vm15, %v2953_v9 }
 0x5d5   :  { %3925 = vmatmul.mubr.msk.f32.gmra.mxu0 %vm2968_vm15, %v2955_v6  ;;  %v2959_v3 = vpop.permute.xlu1 %2958 }
 0x5d7   :  { %v2957_v41 = vpop.permute.xlu0 %2956 }
 0x5d8   :  { %3927 = vmatprep.mubr.msk.f32.mxu0 %vm2968_vm15, %v2957_v41 }
 0x5d9   :  { %3928 = vmatmul.mubr.msk.f32.gmra.mxu0 %vm2968_vm15, %v2959_v3  ;;  %v2963_v56 = vpop.permute.xlu1 %2962 }
 0x5db   :  { %v2961_v51 = vpop.permute.xlu0 %2960 }
 0x5dc   :  { %3930 = vmatprep.mubr.msk.f32.mxu0 %vm2968_vm15, %v2961_v51  ;;  %v2613_v51 = vld [vmem:[%s6323_s3 + $0x50] sm:$0xff] }
 0x5dd   :  { %3931 = vmatmul.mubr.msk.f32.gmra.mxu0 %vm2968_vm15, %v2963_v56  ;;  %v2967_v24 = vpop.permute.xlu1 %2966 }
 0x5df   :  { %v2965_v53 = vpop.permute.xlu0 %2964 }
 0x5e0   :  { %3933 = vmatprep.mubr.msk.f32.mxu0 %vm2968_vm15, %v2965_v53 }
 0x5e1   :  { %3934 = vmatmul.mubr.msk.f32.gmra.mxu0 %vm2968_vm15, %v2967_v24 }
 0x685   :  { %v3914_v57 = vpop.f32.mrf.mxu0 }
 0x686   :  { %v6062_v58 = vadd.f32 %v3914_v57, %v2604_v8 }
 0x687   :  { %v3071_v60 = vpop.f32.mrf.mxu0 }
 0x688   :  { %v6067_v16 = vadd.f32 %v3071_v60, %v2603_v22  ;;  %v3167_v61 = vsel %vm2968_vm15, %v6062_v58, -inf }
 0x689   :  { %v3917_v13 = vpop.f32.mrf.mxu0 }
 0x68a   :  { %v3166_v46 = vsel %vm2968_vm15, %v6067_v16, -inf  ;;  %v6076_v14 = vadd.f32 %v3917_v13, %v2606_v26 }
 0x68b   :  { %v3168_v25 = vmax.f32 %v3166_v46, %v3167_v61  ;;  %v3081_v23 = vpop.f32.mrf.mxu0 }
 0x68c   :  { %v6081_v42 = vadd.f32 %v3081_v23, %v2605_v28  ;;  %v3176_v30 = vsel %vm2968_vm15, %v6076_v14, -inf }
 0x68d   :  { %v3169_v19 = vrot.slane %v3168_v25, 4  ;;  %v3920_v55 = vpop.f32.mrf.mxu0 }
 0x68e   :  { %v3175_v37 = vsel %vm2968_vm15, %v6081_v42, -inf  ;;  %v6090_v48 = vadd.f32 %v3920_v55, %v2608_v54 }
 0x68f   :  { %v3170_v11 = vmax.f32 %v3168_v25, %v3169_v19  ;;  %v3177_v49 = vmax.f32 %v3175_v37, %v3176_v30  ;;  %v3091_v15 = vpop.f32.mrf.mxu0 }
 0x690   :  { %v6095_v44 = vadd.f32 %v3091_v15, %v2607_v59  ;;  %v3185_v35 = vsel %vm2968_vm15, %v6090_v48, -inf }
 0x691   :  { %v3171_v45 = vrot.slane %v3170_v11, 2  ;;  %v3178_v27 = vrot.slane %v3177_v49, 4  ;;  %v3923_v1 = vpop.f32.mrf.mxu0 }
 0x692   :  { %v3184_v40 = vsel %vm2968_vm15, %v6095_v44, -inf  ;;  %v6104_v32 = vadd.f32 %v3923_v1, %v2610_v21  ;;  %v2615_v21 = vld [vmem:[%s6323_s3 + $0x60] sm:$0xff] }
 0x693   :  { %v3172_v36 = vmax.f32 %v3170_v11, %v3171_v45  ;;  %v3179_v17 = vmax.f32 %v3177_v49, %v3178_v27  ;;  %v3186_v62 = vmax.f32 %v3184_v40, %v3185_v35  ;;  %v3101_v12 = vpop.f32.mrf.mxu0 }
 0x694   :  { %v6109_v63 = vadd.f32 %v3101_v12, %v2609_v43  ;;  %v3194_v33 = vsel %vm2968_vm15, %v6104_v32, -inf }
 0x695   :  { %v3173_v4 = vrot.slane %v3172_v36, 1  ;;  %v3180_v31 = vrot.slane %v3179_v17, 2  ;;  %v3187_v39 = vrot.slane %v3186_v62, 4  ;;  %v3926_v47 = vpop.f32.mrf.mxu0 }
 0x696   :  { %v3193_v20 = vsel %vm2968_vm15, %v6109_v63, -inf  ;;  %v6118_v38 = vadd.f32 %v3926_v47, %v2612_v2 }
 0x697   :  { %v3174_v29 = vmax.f32 %v3172_v36, %v3173_v4  ;;  %v3181_v10 = vmax.f32 %v3179_v17, %v3180_v31  ;;  %v3188_v18 = vmax.f32 %v3186_v62, %v3187_v39  ;;  %v3195_v5 = vmax.f32 %v3193_v20, %v3194_v33  ;;  %v3111_v7 = vpop.f32.mrf.mxu0 }
 0x698   :  { %v6123_v6 = vadd.f32 %v3111_v7, %v2611_v34  ;;  %v3203_v24 = vsel %vm2968_vm15, %v6118_v38, -inf  ;;  %v2618_v34 = vld [vmem:[%s6323_s3 + $0x78] sm:$0xff] }
 0x699   :  { %vm3238_vm3 = vcmp.gt.f32.partialorder %v3174_v29, -1e+29  ;;  %v3182_v9 = vrot.slane %v3181_v10, 1  ;;  %v3189_v3 = vrot.slane %v3188_v18, 2  ;;  %v3196_v41 = vrot.slane %v3195_v5, 4  ;;  %v3929_v56 = vpop.f32.mrf.mxu0 }
 0x69a   :  { %v3246_v53 = vsel %vm3238_vm3, %v3174_v29, 0.0  ;;  %v3202_v8 = vsel %vm2968_vm15, %v6123_v6, -inf  ;;  %v6132_v57 = vadd.f32 %v3929_v56, %v2614_v0 }
 0x69b   :  { %v3254_v22 = vsub.f32 %v6067_v16, %v3246_v53  ;;  %v3255_v60 = vsub.f32 %v6062_v58, %v3246_v53  ;;  %v3183_v26 = vmax.f32 %v3181_v10, %v3182_v9  ;;  %v3190_v13 = vmax.f32 %v3188_v18, %v3189_v3  ;;  %v3121_v28 = vpop.f32.mrf.mxu0  ;;  %v2616_v58 = vld [vmem:[%s6323_s3 + $0x68] sm:$0xff]  ;;  %v2617_v18 = vld [vmem:[%s6323_s3 + $0x70] sm:$0xff] }
 0x69c   :  { %v3197_v61 = vmax.f32 %v3195_v5, %v3196_v41  ;;  %v3204_v46 = vmax.f32 %v3202_v8, %v3203_v24  ;;  %v3212_v25 = vsel %vm2968_vm15, %v6132_v57, -inf  ;;  %v6138_v23 = vadd.f32 %v3121_v28, %v2613_v51 }
 0x69d   :  { %v3270_v54 = vmul.f32 1.442695, %v3254_v22  ;;  %v3272_v19 = vmul.f32 1.442695, %v3255_v60  ;;  %vm3239_vm1 = vcmp.gt.f32.partialorder %v3183_v26, -1e+29  ;;  %v3932_v55 = vpop.f32.mrf.mxu0 }
 0x69e   :  { %v3247_v59 = vsel %vm3239_vm1, %v3183_v26, 0.0  ;;  %v3191_v30 = vrot.slane %v3190_v13, 1  ;;  %v3198_v37 = vrot.slane %v3197_v61, 2  ;;  %v3205_v16 = vrot.slane %v3204_v46, 4 }
 0x69f   :  { %4151 = vpow2.f32 %v3270_v54  ;;  %v3256_v11 = vsub.f32 %v6081_v42, %v3247_v59  ;;  %v3257_v49 = vsub.f32 %v6076_v14, %v3247_v59  ;;  %v3211_v15 = vsel %vm2968_vm15, %v6138_v23, -inf  ;;  %v3131_v45 = vpop.f32.mrf.mxu0 }
 0x6a0   :  { %4153 = vpow2.f32 %v3272_v19  ;;  %v3192_v27 = vmax.f32 %v3190_v13, %v3191_v30  ;;  %v3199_v1 = vmax.f32 %v3197_v61, %v3198_v37  ;;  %v3206_v43 = vmax.f32 %v3204_v46, %v3205_v16 }
 0x6a1   :  { %v3274_v35 = vmul.f32 1.442695, %v3256_v11  ;;  %v3276_v40 = vmul.f32 1.442695, %v3257_v49  ;;  %v3213_v36 = vmax.f32 %v3211_v15, %v3212_v25  ;;  %v6150_v17 = vadd.f32 %v3932_v55, %v2616_v58  ;;  %v3935_v12 = vpop.f32.mrf.mxu0 }
 0x6a2   :  { %vm3240_vm4 = vcmp.gt.f32.partialorder %v3192_v27, -1e+29  ;;  %v3200_v42 = vrot.slane %v3199_v1, 1  ;;  %v3207_v14 = vrot.slane %v3206_v43, 2  ;;  %v6152_v62 = vadd.f32 %v3131_v45, %v2615_v21 }
 0x6a3   :  { %4155 = vpow2.f32 %v3274_v35  ;;  %v3248_v2 = vsel %vm3240_vm4, %v3192_v27, 0.0  ;;  %v3214_v4 = vrot.slane %v3213_v36, 4  ;;  %v3221_v29 = vsel %vm2968_vm15, %v6150_v17, -inf  ;;  %v3141_v7 = vpop.f32.mrf.mxu0 }
 0x6a4   :  { %4157 = vpow2.f32 %v3276_v40  ;;  %v3258_v31 = vsub.f32 %v6095_v44, %v3248_v2  ;;  %v3259_v39 = vsub.f32 %v6090_v48, %v3248_v2  ;;  %v3201_v47 = vmax.f32 %v3199_v1, %v3200_v42 }
 0x6a5   :  { %v3208_v33 = vmax.f32 %v3206_v43, %v3207_v14  ;;  %v3215_v20 = vmax.f32 %v3213_v36, %v3214_v4  ;;  %v3220_v10 = vsel %vm2968_vm15, %v6152_v62, -inf  ;;  %v6166_v41 = vadd.f32 %v3935_v12, %v2618_v34 }
 0x6a6   :  { %v3278_v44 = vmul.f32 1.442695, %v3258_v31  ;;  %v3280_v5 = vmul.f32 1.442695, %v3259_v39  ;;  %vm3241_vm5 = vcmp.gt.f32.partialorder %v3201_v47, -1e+29  ;;  %v3222_v48 = vmax.f32 %v3220_v10, %v3221_v29 }
 0x6a7   :  { %v3249_v0 = vsel %vm3241_vm5, %v3201_v47, 0.0  ;;  %v3209_v9 = vrot.slane %v3208_v33, 1  ;;  %v3216_v3 = vrot.slane %v3215_v20, 2  ;;  %v6170_v22 = vadd.f32 %v3141_v7, %v2617_v18 }
 0x6a8   :  { %4159 = vpow2.f32 %v3278_v44  ;;  %v3260_v56 = vsub.f32 %v6109_v63, %v3249_v0  ;;  %v3261_v51 = vsub.f32 %v6104_v32, %v3249_v0  ;;  %v3223_v53 = vrot.slane %v3222_v48, 4 }
 0x6a9   :  { %4161 = vpow2.f32 %v3280_v5  ;;  %v3210_v24 = vmax.f32 %v3208_v33, %v3209_v9  ;;  %v3217_v8 = vmax.f32 %v3215_v20, %v3216_v3  ;;  %v3230_v61 = vsel %vm2968_vm15, %v6166_v41, -inf }
 0x6aa   :  { %v3282_v60 = vmul.f32 1.442695, %v3260_v56  ;;  %v3284_v26 = vmul.f32 1.442695, %v3261_v51  ;;  %v3224_v13 = vmax.f32 %v3222_v48, %v3223_v53  ;;  %v3229_v46 = vsel %vm2968_vm15, %v6170_v22, -inf }
 0x6ab   :  { %vm3242_vm6 = vcmp.gt.f32.partialorder %v3210_v24, -1e+29  ;;  %v3218_v28 = vrot.slane %v3217_v8, 1  ;;  %v3231_v54 = vmax.f32 %v3229_v46, %v3230_v61 }
 0x6ac   :  { %v6176_v63 = vpop.eup %4151  ;;  %4163 = vpow2.f32 %v3282_v60  ;;  %v3250_v32 = vsel %vm3242_vm6, %v3210_v24, 0.0  ;;  %v3225_v25 = vrot.slane %v3224_v13, 2 }
 0x6ad   :  { %v6178_v19 = vpop.eup %4153  ;;  %v3302_v55 = vsel %vm2968_vm15, %v6176_v63, 0.0  ;;  %4165 = vpow2.f32 %v3284_v26  ;;  %v3262_v59 = vsub.f32 %v6123_v6, %v3250_v32  ;;  %v3263_v30 = vsub.f32 %v6118_v38, %v3250_v32 }
 0x6ae   :  { %v3303_v37 = vsel %vm2968_vm15, %v6178_v19, 0.0  ;;  %v3219_v16 = vmax.f32 %v3217_v8, %v3218_v28  ;;  %v3226_v58 = vmax.f32 %v3224_v13, %v3225_v25  ;;  %v3232_v11 = vrot.slane %v3231_v54, 4 }
 0x6af   :  { %v3304_v49 = vadd.f32 %v3303_v37, %v3302_v55  ;;  %v3286_v15 = vmul.f32 1.442695, %v3262_v59  ;;  %v3288_v21 = vmul.f32 1.442695, %v3263_v30 }
 0x6b0   :  { %v6186_v45 = vpop.eup %4155  ;;  %vm3243_vm7 = vcmp.gt.f32.partialorder %v3219_v16, -1e+29  ;;  %v3227_v27 = vrot.slane %v3226_v58, 1  ;;  %v3233_v1 = vmax.f32 %v3231_v54, %v3232_v11 }
 0x6b1   :  { %v6188_v43 = vpop.eup %4157  ;;  %v3305_v35 = vrot.slane %v3304_v49, 4  ;;  %v3311_v38 = vsel %vm2968_vm15, %v6186_v45, 0.0  ;;  %4167 = vpow2.f32 %v3286_v15  ;;  %v3251_v6 = vsel %vm3243_vm7, %v3219_v16, 0.0 }
 0x6b2   :  { %v3312_v40 = vsel %vm2968_vm15, %v6188_v43, 0.0  ;;  %4169 = vpow2.f32 %v3288_v21  ;;  %v3264_v36 = vsub.f32 %v6138_v23, %v3251_v6  ;;  %v3265_v42 = vsub.f32 %v6132_v57, %v3251_v6 }
 0x6b3   :  { %v3306_v14 = vadd.f32 %v3305_v35, %v3304_v49  ;;  %v3313_v12 = vadd.f32 %v3312_v40, %v3311_v38  ;;  %v3228_v2 = vmax.f32 %v3226_v58, %v3227_v27  ;;  %v3234_v4 = vrot.slane %v3233_v1, 2 }
 0x6b4   :  { %v3290_v31 = vmul.f32 1.442695, %v3264_v36  ;;  %v3292_v39 = vmul.f32 1.442695, %v3265_v42 }
 0x6b5   :  { %v6196_v47 = vpop.eup %4159  ;;  %v3307_v34 = vrot.slane %v3306_v14, 2  ;;  %v3314_v33 = vrot.slane %v3313_v12, 4  ;;  %vm3244_vm8 = vcmp.gt.f32.partialorder %v3228_v2, -1e+29  ;;  %v3235_v20 = vmax.f32 %v3233_v1, %v3234_v4 }
 0x6b6   :  { %v6198_v29 = vpop.eup %4161  ;;  %v3320_v10 = vsel %vm2968_vm15, %v6196_v47, 0.0  ;;  %4171 = vpow2.f32 %v3290_v31  ;;  %v3252_v23 = vsel %vm3244_vm8, %v3228_v2, 0.0 }
 0x6b7   :  { %v3308_v57 = vadd.f32 %v3307_v34, %v3306_v14  ;;  %v3315_v18 = vadd.f32 %v3314_v33, %v3313_v12  ;;  %v3321_v44 = vsel %vm2968_vm15, %v6198_v29, 0.0  ;;  %4173 = vpow2.f32 %v3292_v39 }
 0x6b8   :  { %v3322_v5 = vadd.f32 %v3321_v44, %v3320_v10  ;;  %v3266_v48 = vsub.f32 %v6152_v62, %v3252_v23  ;;  %v3267_v7 = vsub.f32 %v6150_v17, %v3252_v23  ;;  %v3236_v0 = vrot.slane %v3235_v20, 1 }
 0x6b9   :  { %v6206_v9 = vpop.eup %4163  ;;  %v3309_v3 = vrot.slane %v3308_v57, 1  ;;  %v3316_v56 = vrot.slane %v3315_v18, 2 }
 0x6ba   :  { %v6208_v51 = vpop.eup %4165  ;;  %v3323_v53 = vrot.slane %v3322_v5, 4  ;;  %v3329_v24 = vsel %vm2968_vm15, %v6206_v9, 0.0  ;;  %v3294_v8 = vmul.f32 1.442695, %v3266_v48  ;;  %v3296_v60 = vmul.f32 1.442695, %v3267_v7 }
 0x6bb   :  { %v6212_v26 = vadd.f32 %v3309_v3, %v3308_v57  ;;  %v3317_v13 = vadd.f32 %v3316_v56, %v3315_v18  ;;  %v3330_v62 = vsel %vm2968_vm15, %v6208_v51, 0.0  ;;  %v3237_v17 = vmax.f32 %v3235_v20, %v3236_v0 }
 0x6bc   :  { %v3324_v28 = vadd.f32 %v3323_v53, %v3322_v5  ;;  %v3331_v61 = vadd.f32 %v3330_v62, %v3329_v24  ;;  %4175 = vpow2.f32 %v3294_v8 }
 0x6bd   :  { %v3318_v46 = vrot.slane %v3317_v13, 1  ;;  %4177 = vpow2.f32 %v3296_v60  ;;  %vm3245_vm9 = vcmp.gt.f32.partialorder %v3237_v17, -1e+29  ;;  %v3374_v25 = vmax.f32 %v6212_v26, 1e-30 }
 0x6be   :  { %v6216_v32 = vpop.eup %4167  ;;  %v3325_v54 = vrot.slane %v3324_v28, 2  ;;  %v3332_v55 = vrot.slane %v3331_v61, 4  ;;  %v3253_v59 = vsel %vm3245_vm9, %v3237_v17, 0.0 }
 0x6bf   :  { %v6219_v30 = vpop.eup %4169  ;;  %v3319_v37 = vadd.f32 %v3318_v46, %v3317_v13  ;;  %v3338_v16 = vsel %vm2968_vm15, %v6216_v32, 0.0  ;;  %v3268_v58 = vsub.f32 %v6170_v22, %v3253_v59  ;;  %v3269_v21 = vsub.f32 %v6166_v41, %v3253_v59 }
 0x6c0   :  { %v3326_v11 = vadd.f32 %v3325_v54, %v3324_v28  ;;  %v3333_v49 = vadd.f32 %v3332_v55, %v3331_v61  ;;  %v3339_v15 = vsel %vm2968_vm15, %v6219_v30, 0.0  ;;  %4179 = vrcp.f32 %v3374_v25 }
 0x6c1   :  { %v3375_v27 = vmax.f32 %v3319_v37, 1e-30  ;;  %v3340_v1 = vadd.f32 %v3339_v15, %v3338_v16  ;;  %v3298_v35 = vmul.f32 1.442695, %v3268_v58  ;;  %v3300_v40 = vmul.f32 1.442695, %v3269_v21 }
 0x6c2   :  { %v3327_v38 = vrot.slane %v3326_v11, 1  ;;  %v3334_v6 = vrot.slane %v3333_v49, 2 }
 0x6c3   :  { %v6229_v36 = vpop.eup %4171  ;;  %4181 = vrcp.f32 %v3375_v27  ;;  %v3341_v22 = vrot.slane %v3340_v1, 4 }
 0x6c4   :  { %v6231_v42 = vpop.eup %4173  ;;  %v3328_v14 = vadd.f32 %v3327_v38, %v3326_v11  ;;  %v3335_v12 = vadd.f32 %v3334_v6, %v3333_v49  ;;  %v3347_v41 = vsel %vm2968_vm15, %v6229_v36, 0.0  ;;  %4183 = vpow2.f32 %v3298_v35 }
 0x6c5   :  { %v3342_v2 = vadd.f32 %v3341_v22, %v3340_v1  ;;  %v3348_v4 = vsel %vm2968_vm15, %v6231_v42, 0.0  ;;  %4185 = vpow2.f32 %v3300_v40 }
 0x6c6   :  { %v3376_v31 = vmax.f32 %v3328_v14, 1e-30  ;;  %v3336_v39 = vrot.slane %v3335_v12, 1  ;;  %v3349_v34 = vadd.f32 %v3348_v4, %v3347_v41 }
 0x6c7   :  { %v3343_v33 = vrot.slane %v3342_v2, 2 }
 0x6c8   :  { %4187 = vrcp.f32 %v3376_v31  ;;  %v3337_v20 = vadd.f32 %v3336_v39, %v3335_v12  ;;  %v3350_v10 = vrot.slane %v3349_v34, 4 }
 0x6c9   :  { %v6237_v23 = vpop.eup %4175  ;;  %v3344_v57 = vadd.f32 %v3343_v33, %v3342_v2 }
 0x6ca   :  { %v6239_v18 = vpop.eup %4177  ;;  %v3377_v44 = vmax.f32 %v3337_v20, 1e-30  ;;  %v3351_v5 = vadd.f32 %v3350_v10, %v3349_v34  ;;  %v3356_v48 = vsel %vm2968_vm15, %v6237_v23, 0.0 }
 0x6cb   :  { %v3345_v7 = vrot.slane %v3344_v57, 1  ;;  %v3357_v0 = vsel %vm2968_vm15, %v6239_v18, 0.0 }
 0x6cc   :  { %4189 = vrcp.f32 %v3377_v44  ;;  %v3352_v3 = vrot.slane %v3351_v5, 2  ;;  %v3358_v56 = vadd.f32 %v3357_v0, %v3356_v48 }
 0x6cd   :  { %v3346_v53 = vadd.f32 %v3345_v7, %v3344_v57  ;;  %v4180_v60 = vpop.eup %4179 }
 0x6ce   :  { %v3353_v24 = vadd.f32 %v3352_v3, %v3351_v5  ;;  %v3359_v8 = vrot.slane %v3358_v56, 4  ;;  %v3390_v16 = vmul.f32 %v4180_v60, %v3374_v25 }
 0x6cf   :  { %v3378_v13 = vmax.f32 %v3346_v53, 1e-30 }
 0x6d0   :  { %v4182_v62 = vpop.eup %4181  ;;  %v3354_v17 = vrot.slane %v3353_v24, 1  ;;  %v3360_v28 = vadd.f32 %v3359_v8, %v3358_v56  ;;  %v3398_v6 = vsub.f32 2.0, %v3390_v16 }
 0x6d1   :  { %v6245_v61 = vpop.eup %4183  ;;  %v3391_v46 = vmul.f32 %v4182_v62, %v3375_v27  ;;  %4191 = vrcp.f32 %v3378_v13 }
 0x6d2   :  { %v6247_v54 = vpop.eup %4185  ;;  %v3355_v55 = vadd.f32 %v3354_v17, %v3353_v24  ;;  %v3361_v59 = vrot.slane %v3360_v28, 2  ;;  %v3365_v37 = vsel %vm2968_vm15, %v6245_v61, 0.0  ;;  %v3406_v39 = vmul.f32 %v4180_v60, %v3398_v6 }
 0x6d3   :  { %v3366_v58 = vsel %vm2968_vm15, %v6247_v54, 0.0  ;;  %v3399_v11 = vsub.f32 2.0, %v3391_v46 }
 0x6d4   :  { %v3379_v49 = vmax.f32 %v3355_v55, 1e-30  ;;  %v3362_v15 = vadd.f32 %v3361_v59, %v3360_v28  ;;  %v3367_v21 = vadd.f32 %v3366_v58, %v3365_v37  ;;  %v3415_v3 = vmul.f32 %v6178_v19, %v3406_v39 }
 0x6d5   :  { %v4188_v1 = vpop.eup %4187  ;;  %v3407_v40 = vmul.f32 %v4182_v62, %v3399_v11 }
 0x6d6   :  { %v3392_v27 = vmul.f32 %v4188_v1, %v3376_v31  ;;  %4193 = vrcp.f32 %v3379_v49  ;;  %v3363_v35 = vrot.slane %v3362_v15, 1  ;;  %v3368_v38 = vrot.slane %v3367_v21, 4 }
 0x6d7   :  { %v3416_v34 = vmul.f32 %v6186_v45, %v3407_v40  ;;  %v3417_v31 = vmul.f32 %v6188_v43, %v3407_v40 }
 0x6d8   :  { %v3400_v22 = vsub.f32 2.0, %v3392_v27  ;;  %v6255_v14 = vadd.f32 %v3363_v35, %v3362_v15  ;;  %v3369_v12 = vadd.f32 %v3368_v38, %v3367_v21 }
 0x6d9   :  { %v4190_v26 = vpop.eup %4189  ;;  %v3432_v56 = vmul.f32 %v3416_v34, %v5981_v52  ;;  %v3433_v45 = vmul.f32 %v5978_v50, %v3417_v31 }
 0x6da   :  { %v3408_v25 = vmul.f32 %v4188_v1, %v3400_v22  ;;  %v3393_v41 = vmul.f32 %v4190_v26, %v3377_v44  ;;  %v3380_v2 = vmax.f32 %v6255_v14, 1e-30  ;;  %v3370_v4 = vrot.slane %v3369_v12, 2 }
 0x6db   :  { %v3414_v44 = vmul.f32 %v6176_v63, %v3406_v39  ;;  %v3456_v46 = vsel %vm2968_vm15, %v3433_v45, 0.0 }
 0x6dc   :  { %v3401_v33 = vsub.f32 2.0, %v3393_v41  ;;  %4195 = vrcp.f32 %v3380_v2  ;;  %v3371_v20 = vadd.f32 %v3370_v4, %v3369_v12  ;;  %v3418_v57 = vmul.f32 %v6196_v47, %v3408_v25 }
 0x6dd   :  { %v3419_v5 = vmul.f32 %v6198_v29, %v3408_v25  ;;  %v3430_v62 = vmul.f32 %v3414_v44, %v5981_v52 }
 0x6de   :  { %v4192_v10 = vpop.eup %4191  ;;  %v3409_v48 = vmul.f32 %v4190_v26, %v3401_v33  ;;  %v3372_v0 = vrot.slane %v3371_v20, 1  ;;  %v3434_v47 = vmul.f32 %v3418_v57, %v5981_v52 }
 0x6df   :  { %v3394_v7 = vmul.f32 %v4192_v10, %v3378_v13  ;;  %v3435_v29 = vmul.f32 %v5978_v50, %v3419_v5  ;;  %v3446_v6 = vsel %vm2968_vm15, %v3430_v62, 0.0 }
 0x6e0   :  { %v3420_v43 = vmul.f32 %v6206_v9, %v3409_v48  ;;  %v3421_v53 = vmul.f32 %v6208_v51, %v3409_v48  ;;  %v3373_v8 = vadd.f32 %v3372_v0, %v3371_v20  ;;  %v3431_v9 = vmul.f32 %v5978_v50, %v3415_v3 }
 0x6e1   :  { %v3402_v24 = vsub.f32 2.0, %v3394_v7  ;;  %v3455_v51 = vsel %vm2968_vm15, %v3432_v56, 0.0  ;;  %v3464_v59 = vsel %vm2968_vm15, %v3434_v47, 0.0  ;;  %v3465_v37 = vsel %vm2968_vm15, %v3435_v29, 0.0 }
 0x6e2   :  { %v3436_v13 = vmul.f32 %v3420_v43, %v5981_v52  ;;  %v3437_v63 = vmul.f32 %v5978_v50, %v3421_v53  ;;  %v3381_v28 = vmax.f32 %v3373_v8, 1e-30  ;;  %v3457_v21 = vadd.f32 %v3456_v46, %v3455_v51 }
 0x6e3   :  { %v4194_v60 = vpop.eup %4193  ;;  %v3410_v19 = vmul.f32 %v4192_v10, %v3402_v24  ;;  %v3466_v27 = vadd.f32 %v3465_v37, %v3464_v59  ;;  %v3447_v40 = vsel %vm2968_vm15, %v3431_v9, 0.0 }
 0x6e4   :  { %v3395_v17 = vmul.f32 %v4194_v60, %v3379_v49  ;;  %v3473_v16 = vsel %vm2968_vm15, %v3436_v13, 0.0  ;;  %v3474_v11 = vsel %vm2968_vm15, %v3437_v63, 0.0  ;;  %4197 = vrcp.f32 %v3381_v28 }
 0x6e5   :  { %v3422_v55 = vmul.f32 %v6216_v32, %v3410_v19  ;;  %v3423_v58 = vmul.f32 %v6219_v30, %v3410_v19  ;;  %v3475_v22 = vadd.f32 %v3474_v11, %v3473_v16  ;;  %v3458_v25 = vrot.slane %v3457_v21, 4 }
 0x6e6   :  { %v3403_v15 = vsub.f32 2.0, %v3395_v17  ;;  %v3448_v4 = vadd.f32 %v3447_v40, %v3446_v6  ;;  %v3467_v39 = vrot.slane %v3466_v27, 4 }
 0x6e7   :  { %v3438_v49 = vmul.f32 %v3422_v55, %v5981_v52  ;;  %v3439_v1 = vmul.f32 %v5978_v50, %v3423_v58  ;;  %v3476_v33 = vrot.slane %v3475_v22, 4  ;;  %v3459_v48 = vadd.f32 %v3458_v25, %v3457_v21 }
 0x6e8   :  { %v3411_v35 = vmul.f32 %v4194_v60, %v3403_v15  ;;  %v3449_v0 = vrot.slane %v3448_v4, 4 }
 0x6e9   :  { %v3482_v32 = vsel %vm2968_vm15, %v3438_v49, 0.0  ;;  %v4196_v38 = vpop.eup %4195  ;;  %v3483_v30 = vsel %vm2968_vm15, %v3439_v1, 0.0  ;;  %v3477_v44 = vadd.f32 %v3476_v33, %v3475_v22  ;;  %v3460_v53 = vrot.slane %v3459_v48, 2 }
 0x6ea   :  { %v3484_v14 = vadd.f32 %v3483_v30, %v3482_v32  ;;  %v3424_v12 = vmul.f32 %v6229_v36, %v3411_v35  ;;  %v3425_v26 = vmul.f32 %v6231_v42, %v3411_v35  ;;  %v3396_v41 = vmul.f32 %v4196_v38, %v3380_v2 }
 0x6eb   :  { %v3468_v42 = vadd.f32 %v3467_v39, %v3466_v27  ;;  %v3450_v13 = vadd.f32 %v3449_v0, %v3448_v4  ;;  %v3478_v63 = vrot.slane %v3477_v44, 2 }
 0x6ec   :  { %v3440_v34 = vmul.f32 %v3424_v12, %v5981_v52  ;;  %v3441_v31 = vmul.f32 %v5978_v50, %v3425_v26  ;;  %v3404_v20 = vsub.f32 2.0, %v3396_v41  ;;  %v3485_v10 = vrot.slane %v3484_v14, 4 }
 0x6ed   :  { %v3469_v8 = vrot.slane %v3468_v42, 2  ;;  %v3451_v37 = vrot.slane %v3450_v13, 2  ;;  %v3479_v16 = vadd.f32 %v3478_v63, %v3477_v44 }
 0x6ee   :  { %v3491_v57 = vsel %vm2968_vm15, %v3440_v34, 0.0  ;;  %v3492_v5 = vsel %vm2968_vm15, %v3441_v31, 0.0  ;;  %v3412_v36 = vmul.f32 %v4196_v38, %v3404_v20  ;;  %v3486_v45 = vadd.f32 %v3485_v10, %v3484_v14 }
 0x6ef   :  { %v3493_v7 = vadd.f32 %v3492_v5, %v3491_v57  ;;  %v3470_v46 = vadd.f32 %v3469_v8, %v3468_v42  ;;  %v3452_v38 = vadd.f32 %v3451_v37, %v3450_v13  ;;  %v3480_v6 = vrot.slane %v3479_v16, 1 }
 0x6f0   :  { %v3426_v3 = vmul.f32 %v6237_v23, %v3412_v36  ;;  %v3427_v56 = vmul.f32 %v6239_v18, %v3412_v36  ;;  %v3487_v17 = vrot.slane %v3486_v45, 2  ;;  %v3461_v18 = vadd.f32 %v3460_v53, %v3459_v48 }
 0x6f1   :  { %v3494_v2 = vrot.slane %v3493_v7, 4  ;;  %v4198_v43 = vpop.eup %4197  ;;  %v3471_v1 = vrot.slane %v3470_v46, 1  ;;  %v3453_v41 = vrot.slane %v3452_v38, 1  ;;  %v3481_v4 = vadd.f32 %v3480_v6, %v3479_v16 }
 0x6f2   :  { %v3442_v47 = vmul.f32 %v3426_v3, %v5981_v52  ;;  %v3443_v29 = vmul.f32 %v5978_v50, %v3427_v56  ;;  %v3397_v60 = vmul.f32 %v4198_v43, %v3381_v28  ;;  %v3488_v58 = vadd.f32 %v3487_v17, %v3486_v45 }
 0x6f3   :  { %v3495_v24 = vadd.f32 %v3494_v2, %v3493_v7  ;;  %v3462_v15 = vrot.slane %v3461_v18, 1  ;;  %v3454_v57 = vadd.f32 %v3453_v41, %v3452_v38 }
 0x6f4   :  { %v3500_v19 = vsel %vm2968_vm15, %v3442_v47, 0.0  ;;  %v3501_v62 = vsel %vm2968_vm15, %v3443_v29, 0.0  ;;  %v3405_v9 = vsub.f32 2.0, %v3397_v60  ;;  %v3489_v40 = vrot.slane %v3488_v58, 1 }
 0x6f5   :  { %v3502_v23 = vadd.f32 %v3501_v62, %v3500_v19  ;;  %v3496_v51 = vrot.slane %v3495_v24, 2  ;;  %v3463_v12 = vadd.f32 %v3462_v15, %v3461_v18 }
 0x6f6   :  { %v3413_v59 = vmul.f32 %v4198_v43, %v3405_v9 }
 0x6f7   :  { %v3503_v55 = vrot.slane %v3502_v23, 4  ;;  %v3497_v21 = vadd.f32 %v3496_v51, %v3495_v24 }
 0x6f8   :  { %v3428_v28 = vmul.f32 %v6245_v61, %v3413_v59  ;;  %v3429_v49 = vmul.f32 %v6247_v54, %v3413_v59  ;;  %v3472_v54 = vadd.f32 %v3471_v1, %v3470_v46 }
 0x6f9   :  { %v3504_v11 = vadd.f32 %v3503_v55, %v3502_v23  ;;  %v3498_v61 = vrot.slane %v3497_v21, 1 }
 0x6fa   :  { %v3444_v32 = vmul.f32 %v3428_v28, %v5981_v52  ;;  %v3445_v35 = vmul.f32 %v5978_v50, %v3429_v49  ;;  %v3663_v50 = vld [vmem:[%s6324_s4 + $0x48] ss:$0 sm:$0xff]  ;;  %v3490_v52 = vadd.f32 %v3489_v40, %v3488_v58 }
 0x6fb   :  { %v3505_v27 = vrot.slane %v3504_v11, 2  ;;  %v3523_v34 = vadd.f32 %v3663_v50, %v3463_v12  ;;  %v3499_v31 = vadd.f32 %v3498_v61, %v3497_v21  ;;  %v3524_v20 = vadd.f32 %v3663_v50, %v3472_v54 }
 0x6fc   :  { %v3509_v30 = vsel %vm2968_vm15, %v3444_v32, 0.0  ;;  %v3510_v14 = vsel %vm2968_vm15, %v3445_v35, 0.0  ;;  %v3525_v5 = vadd.f32 %v3663_v50, %v3481_v4  ;;  %v3526_v7 = vadd.f32 %v3663_v50, %v3490_v52 }
 0x6fd   :  { %v3506_v22 = vadd.f32 %v3505_v27, %v3504_v11  ;;  %v3511_v26 = vadd.f32 %v3510_v14, %v3509_v30  ;;  %v3538_v36 = vrot.slane %v3523_v34, 7  ;;  %v3527_v0 = vadd.f32 %v3663_v50, %v3499_v31 }
 0x6fe   :  { %v3540_v44 = vrot.slane %v3524_v20, 6  ;;  %v3522_v3 = vadd.f32 %v3663_v50, %v3454_v57  ;;  %v3542_v56 = vrot.slane %v3525_v5, 5  ;;  %v3544_v43 = vrot.slane %v3526_v7, 4 }
 0x6ff   :  { %v3507_v25 = vrot.slane %v3506_v22, 1  ;;  %v3512_v39 = vrot.slane %v3511_v26, 4  ;;  %v3546_v24 = vrot.slane %v3527_v0, 3 }
 0x700   :  { %v3539_v53 = vsel %vm2646_vm10, %v3538_v36, %v3522_v3 }
 0x701   :  { %v3513_v33 = vadd.f32 %v3512_v39, %v3511_v26  ;;  %v3508_v10 = vadd.f32 %v3507_v25, %v3506_v22  ;;  %v3541_v29 = vsel %vm2649_vm11, %v3540_v44, %v3539_v53 }
 0x702   :  { %v3543_v60 = vsel %vm2652_vm12, %v3542_v56, %v3541_v29 }
 0x703   :  { %v3514_v48 = vrot.slane %v3513_v33, 2  ;;  %v3528_v2 = vadd.f32 %v3663_v50, %v3508_v10  ;;  %v3545_v63 = vsel %vm2655_vm13, %v3544_v43, %v3543_v60 }
 0x704   :  { %v3547_v19 = vsel %vm2658_vm14, %v3546_v24, %v3545_v63 }
 0x705   :  { %v3515_v42 = vadd.f32 %v3514_v48, %v3513_v33  ;;  %v3548_v8 = vrot.slane %v3528_v2, 2 }
 0x707   :  { %v3516_v45 = vrot.slane %v3515_v42, 1  ;;  %v3549_v17 = vsel %vm2661_vm2, %v3548_v8, %v3547_v19 }
 0x709   :  { %v3517_v47 = vadd.f32 %v3516_v45, %v3515_v42 }
 0x70b   :  { %v3529_v13 = vadd.f32 %v3663_v50, %v3517_v47 }
 0x70d   :  { %v3550_v62 = vrot.slane %v3529_v13, 1 }
 0x70f   :  { %v3551_v23 = vsel %vm2664_vm0, %v3550_v62, %v3549_v17 }
 0x710   :  { %3553 = vst.msk [vmem:[%s6325_s5] sm:$0xff] %vm2968_vm15, %v3551_v23 }
 0x711   :  { %3558 = vsyncpa [#allocation3], 1 }

</bundles_post_ra>
